<compile_context>
chip_gen: v5e
topology: v5e:2x2
jax: 0.10.0
libtpu: 0.0.40
codegen_flags: <defaults>
</compile_context>

<pallas_src>
import math
import numpy as np
import jax
import jax.numpy as jnp
from jax.experimental import pallas as pl
from jax.experimental.pallas import tpu as pltpu

N_LAYERS = 2      # Encoder n_layers
N_HEADS = 2       # Encoder n_heads
KERNEL_SIZE = 3   # FFN conv kernel size (symmetric "same" padding)

# Keep f32 matmuls exact: with C=8-wide contractions the MXU cost is negligible here and the
# reference check runs at rtol/atol=1e-3.
# TODO(synk): flip to Precision.DEFAULT (or bf16 MXU operands) after re-validating tolerance.
MM_PREC = jax.lax.Precision.HIGHEST


def _mm(a, b):
    return jnp.dot(a, b, preferred_element_type=jnp.float32, precision=MM_PREC)


def _nt(a, b):
    # a (M, K), b (N, K) -> a @ b.T  (contraction on the last dim of both)
    return jax.lax.dot_general(a, b, (((1,), (1,)), ((), ())),
                               preferred_element_type=jnp.float32, precision=MM_PREC)


def _layer_norm(z, gamma, beta, eps=1e-5):
    # VITS LayerNorm: normalize over channels (axis 0 in channel-major layout).
    mu = jnp.mean(z, axis=0, keepdims=True)
    var = jnp.mean(jnp.square(z - mu), axis=0, keepdims=True)
    return (z - mu) * jax.lax.rsqrt(var + eps) * gamma + beta


def _shift3(z):
    """Stack [z(.,t-1); z(.,t); z(.,t+1)] (zero at the edges) along the channel axis.

    Implements the three taps of a k=3 zero-padded conv1d with O(C*T) in-register shifts
    instead of (T, T) shift-matrix matmuls.
    """
    rows, t = z.shape
    zero = jnp.zeros((rows, 1), z.dtype)
    z_prev = jnp.concatenate([zero, z[:, :t - 1]], axis=1)   # column t holds z[:, t-1]
    z_next = jnp.concatenate([z[:, 1:], zero], axis=1)       # column t holds z[:, t+1]
    return jnp.concatenate([z_prev, z, z_next], axis=0)      # (3*rows, T)


def _flow_kernel(x_ref, m_ref,
                 wqkv_ref, bqkv_ref, wo_ref, bo_ref, ln_g_ref, ln_b_ref,
                 w1_ref, b1_ref, w2_ref, b2_ref, post_w_ref, post_b_ref,
                 y1_ref, logdet_ref):
    x = x_ref[0]              # (2C, T)  one batch element, channel-major (time on lanes)
    m = m_ref[0]              # (1, T)
    c2, t = x.shape
    c = c2 // 2
    dh = c // N_HEADS
    inv_sqrt_dh = 1.0 / math.sqrt(dh)

    x0 = x[:c, :]
    x1 = x[c:, :]

    # Key-side additive attention mask: 0 for valid keys, -1e4 for padded keys.
    # Query-side masking is unnecessary (padded rows are re-masked downstream, as in VITS).
    key_bias = (m - 1.0) * 1e4          # (1, T) broadcasts over (T, T) scores

    # ---------------- pre_transformer (VITS attentions.Encoder), eval mode ----------------
    h = x0 * m
    for l in range(N_LAYERS):
        # Multi-head self attention (window_size=None -> no relative attention).
        qkv = _mm(wqkv_ref[l], h) + bqkv_ref[l]          # fused QKV: (3C, T)
        q = qkv[0 * c:1 * c]
        k = qkv[1 * c:2 * c]
        v = qkv[2 * c:3 * c]
        heads = []
        for hd in range(N_HEADS):
            lo = hd * dh
            qh = q[lo:lo + dh]                           # (dh, T)
            kh = k[lo:lo + dh]
            vh = v[lo:lo + dh]
            s = _mm(qh.T, kh) * inv_sqrt_dh + key_bias   # (T, T) scores
            s = s - jnp.max(s, axis=-1, keepdims=True)
            p = jnp.exp(s)
            p = p / jnp.sum(p, axis=-1, keepdims=True)
            heads.append(_nt(vh, p))                     # (dh, T)
        o_cat = jnp.concatenate(heads, axis=0)           # (C, T)
        attn = _mm(wo_ref[l], o_cat) + bo_ref[l]         # single fused output projection
        # TODO(synk): nn.Dropout(p=0.1) is identity in eval mode; intentionally omitted.
        h = _layer_norm(h + attn, ln_g_ref[l, 0], ln_b_ref[l, 0])

        # FFN: conv1d(k=3, same pad) -> relu -> conv1d(k=3, same pad), masked like VITS FFN.
        zin = h * m
        z = jnp.maximum(_mm(w1_ref[l], _shift3(zin)) + b1_ref[l], 0.0)
        z = z * m
        z = _mm(w2_ref[l], _shift3(z)) + b2_ref[l]
        z = z * m
        h = _layer_norm(h + z, ln_g_ref[l, 1], ln_b_ref[l, 1])

    x0_enc = h * m            # encoder output x0_

    # ---------------- post 1x1 conv + affine coupling (forward, non-residual) --------------
    stats = (_mm(post_w_ref[...], x0_enc + x0) + post_b_ref[...]) * m   # (2C, T)
    m_stat = stats[:c]
    logs = stats[c:]
    # Only the x1 half of the aliased output is written; x0 passes through untouched in HBM.
    y1_ref[0] = m_stat + x1 * jnp.exp(logs) * m
    logdet_ref[...] = jnp.reshape(jnp.sum(logs), (1, 1, 1))


def mono_transformer_flow_layer(x, x_mask, params):
    """Forward pass (reverse=False, mean_only=False, residual_connection=False).

    x:      (B, channels, T)  float32   -- PyTorch NCL layout (channel-major)
    x_mask: (B, 1, T)         float32
    returns (x_out (B, channels, T), logdet (B,))
    """
    attn_w, attn_b, ln_g, ln_b, w1, b1, w2, b2, post_w, post_b = params
    B, C2, T = x.shape
    C = C2 // 2
    F = w1.shape[1]

    x = x.astype(jnp.float32)
    mask = x_mask.astype(jnp.float32)

    # Fuse / reshape parameters once, outside the kernel (matmul-ready, channel-major).
    wqkv = attn_w[:, :3].reshape(N_LAYERS, 3 * C, C)                       # (L, 3C, C)
    bqkv = attn_b[:, :3].reshape(N_LAYERS, 3 * C)[..., None]               # (L, 3C, 1)
    wo = attn_w[:, 3]                                                      # (L, C, C)
    bo = attn_b[:, 3][..., None]                                           # (L, C, 1)
    ln_g_k = ln_g[..., None]                                               # (L, 2, C, 1)
    ln_b_k = ln_b[..., None]
    w1f = jnp.transpose(w1, (0, 1, 3, 2)).reshape(N_LAYERS, F, KERNEL_SIZE * C)   # (L, F, 3C)
    b1f = b1[..., None]                                                    # (L, F, 1)
    w2f = jnp.transpose(w2, (0, 1, 3, 2)).reshape(N_LAYERS, C, KERNEL_SIZE * F)   # (L, C, 3F)
    b2f = b2[..., None]                                                    # (L, C, 1)
    post_bk = post_b[:, None]                                              # (2C, 1)

    param_list = [wqkv, bqkv, wo, bo, ln_g_k, ln_b_k, w1f, b1f, w2f, b2f, post_w, post_bk]

    def whole(a):
        zeros = (0,) * a.ndim
        return pl.BlockSpec(a.shape, lambda b: zeros)

    in_specs = ([pl.BlockSpec((1, C2, T), lambda b: (b, 0, 0)),
                 pl.BlockSpec((1, 1, T), lambda b: (b, 0, 0))]
                + [whole(p) for p in param_list])
    out_specs = (pl.BlockSpec((1, C, T), lambda b: (b, 1, 0)),   # x1 half of the aliased output
                 pl.BlockSpec((1, 1, 1), lambda b: (b, 0, 0)))
    out_shape = (jax.ShapeDtypeStruct((B, C2, T), jnp.float32),
                 jax.ShapeDtypeStruct((B, 1, 1), jnp.float32))

    y, logdet = pl.pallas_call(
        _flow_kernel,
        out_shape=out_shape,
        grid_spec=pltpu.PrefetchScalarGridSpec(
            num_scalar_prefetch=0,
            grid=(B,),
            in_specs=in_specs,
            out_specs=out_specs),
        input_output_aliases={0: 0},   # x aliases y: the untouched x0 half never re-written
        compiler_params=pltpu.CompilerParams(
            dimension_semantics=("parallel",)),
    )(x, mask, *param_list)

    return y, logdet[:, 0, 0]


def init_params(key, channels):
    """Deterministic synthetic parameters in natural PyTorch layouts:
    1x1-conv weights are (C_out, C_in), k=3 conv weights are (C_out, C_in, K)."""
    C = channels // 2
    F = C  # Encoder(filter_channels) == half_channels in this module
    ks = jax.random.split(key, 10)
    attn_w = 0.3 * jax.random.normal(ks[0], (N_LAYERS, 4, C, C), jnp.float32)      # q,k,v,o
    attn_b = 0.05 * jax.random.normal(ks[1], (N_LAYERS, 4, C), jnp.float32)
    ln_g = 1.0 + 0.1 * jax.random.normal(ks[2], (N_LAYERS, 2, C), jnp.float32)
    ln_b = 0.05 * jax.random.normal(ks[3], (N_LAYERS, 2, C), jnp.float32)
    w1 = 0.3 * jax.random.normal(ks[4], (N_LAYERS, F, C, KERNEL_SIZE), jnp.float32)
    b1 = 0.05 * jax.random.normal(ks[5], (N_LAYERS, F), jnp.float32)
    w2 = 0.3 * jax.random.normal(ks[6], (N_LAYERS, C, F, KERNEL_SIZE), jnp.float32)
    b2 = 0.05 * jax.random.normal(ks[7], (N_LAYERS, C), jnp.float32)
    # NOTE: the PyTorch module zero-initializes `post`; we use small deterministic nonzero
    # values so the affine-coupling / logdet path is numerically exercised.
    post_w = 0.05 * jax.random.normal(ks[8], (2 * C, C), jnp.float32)
    post_b = 0.02 * jax.random.normal(ks[9], (2 * C,), jnp.float32)
    return (attn_w, attn_b, ln_g, ln_b, w1, b1, w2, b2, post_w, post_b)


def reference_forward(x, x_mask, params):
    """Pure-JAX reference of the same forward pass (independent implementation: time-major,
    unfused weights, full (T,T) attention mask, padded convs)."""
    attn_w, attn_b, ln_g, ln_b, w1, b1, w2, b2, post_w, post_b = params
    B, C2, T = x.shape
    C = C2 // 2
    dh = C // N_HEADS
    prec = jax.lax.Precision.HIGHEST
    xt = jnp.transpose(x, (0, 2, 1)).astype(jnp.float32)          # (B, T, 2C)
    mask = jnp.transpose(x_mask, (0, 2, 1)).astype(jnp.float32)   # (B, T, 1)
    x0, x1 = xt[..., :C], xt[..., C:]
    amask = mask * jnp.transpose(mask, (0, 2, 1))                 # (B, T, T)

    def ln_fn(z, g, b):
        mu = jnp.mean(z, axis=-1, keepdims=True)
        var = jnp.mean(jnp.square(z - mu), axis=-1, keepdims=True)
        return (z - mu) / jnp.sqrt(var + 1e-5) * g + b

    h = x0 * mask
    for l in range(N_LAYERS):
        q = jnp.einsum('btc,dc->btd', h, attn_w[l, 0], precision=prec) + attn_b[l, 0]
        k = jnp.einsum('btc,dc->btd', h, attn_w[l, 1], precision=prec) + attn_b[l, 1]
        v = jnp.einsum('btc,dc->btd', h, attn_w[l, 2], precision=prec) + attn_b[l, 2]
        qh = q.reshape(B, T, N_HEADS, dh)
        kh = k.reshape(B, T, N_HEADS, dh)
        vh = v.reshape(B, T, N_HEADS, dh)
        s = jnp.einsum('bthd,bshd->bhts', qh, kh, precision=prec) / math.sqrt(dh)
        s = jnp.where(amask[:, None] == 0.0, -1e4, s)
        p = jax.nn.softmax(s, axis=-1)
        o = jnp.einsum('bhts,bshd->bthd', p, vh, precision=prec).reshape(B, T, C)
        o = jnp.einsum('btc,dc->btd', o, attn_w[l, 3], precision=prec) + attn_b[l, 3]
        h = ln_fn(h + o, ln_g[l, 0], ln_b[l, 0])

        zin = h * mask
        zpad = jnp.pad(zin, ((0, 0), (1, 1), (0, 0)))
        z = sum(jnp.einsum('btc,fc->btf', zpad[:, kk:kk + T], w1[l, :, :, kk], precision=prec)
                for kk in range(KERNEL_SIZE)) + b1[l]
        z = jnp.maximum(z, 0.0) * mask
        zpad = jnp.pad(z, ((0, 0), (1, 1), (0, 0)))
        z = sum(jnp.einsum('btf,cf->btc', zpad[:, kk:kk + T], w2[l, :, :, kk], precision=prec)
                for kk in range(KERNEL_SIZE)) + b2[l]
        z = z * mask
        h = ln_fn(h + z, ln_g[l, 1], ln_b[l, 1])
    h = h * mask

    stats = (jnp.einsum('btc,dc->btd', h + x0, post_w, precision=prec) + post_b) * mask
    m_, logs = stats[..., :C], stats[..., C:]
    x1n = m_ + x1 * jnp.exp(logs) * mask
    y = jnp.concatenate([x0, x1n], axis=-1)
    logdet = jnp.sum(logs, axis=(1, 2))
    return jnp.transpose(y, (0, 2, 1)), logdet


if __name__ == "__main__":
    B, CHANNELS, T = 2, 16, 64
    # hidden_channels is stored by the PyTorch module but unused by its forward().

    key = jax.random.PRNGKey(0)
    kx, kp = jax.random.split(key)
    x = jax.random.normal(kx, (B, CHANNELS, T), jnp.float32)
    lengths = jnp.array([T, 48])
    t_idx = jnp.arange(T)[None, :]
    x_mask = (t_idx < lengths[:, None]).astype(jnp.float32)[:, None, :]  # (B, 1, T)
    params = init_params(kp, CHANNELS)

    # Reference first, then the kernel.
    y_ref, logdet_ref = reference_forward(x, x_mask, params)

    y, logdet = mono_transformer_flow_layer(x, x_mask, params)
    jax.block_until_ready((y, logdet))

    np.testing.assert_allclose(np.asarray(y), np.asarray(y_ref), rtol=1e-3, atol=1e-3)
    np.testing.assert_allclose(np.asarray(logdet), np.asarray(logdet_ref), rtol=1e-3, atol=1e-3)
    print("KERNEL_OK")
</pallas_src>

<mosaic_0001>
module attributes {stable_mosaic.version = 11 : i64} {
  func.func @_flow_kernel(%arg0: i32, %arg1: memref<1x16x64xf32, #tpu.memory_space<vmem>>, %arg2: memref<1x1x64xf32, #tpu.memory_space<vmem>>, %arg3: memref<2x24x8xf32, #tpu.memory_space<vmem>>, %arg4: memref<2x24x1xf32, #tpu.memory_space<vmem>>, %arg5: memref<2x8x8xf32, #tpu.memory_space<vmem>>, %arg6: memref<2x8x1xf32, #tpu.memory_space<vmem>>, %arg7: memref<2x2x8x1xf32, #tpu.memory_space<vmem>>, %arg8: memref<2x2x8x1xf32, #tpu.memory_space<vmem>>, %arg9: memref<2x8x24xf32, #tpu.memory_space<vmem>>, %arg10: memref<2x8x1xf32, #tpu.memory_space<vmem>>, %arg11: memref<2x8x24xf32, #tpu.memory_space<vmem>>, %arg12: memref<2x8x1xf32, #tpu.memory_space<vmem>>, %arg13: memref<16x8xf32, #tpu.memory_space<vmem>>, %arg14: memref<16x1xf32, #tpu.memory_space<vmem>>, %arg15: memref<1x8x64xf32, #tpu.memory_space<vmem>>, %arg16: memref<1x1x1xf32, #tpu.memory_space<vmem>>) attributes {dimension_semantics = [#tpu.dimension_semantics<parallel>], iteration_bounds = array<i64: 2>, scalar_prefetch = 0 : i64, scratch_operands = 0 : i64, tpu.core_type = #tpu.core_type<tc>, window_params = [{transform_indices = @transform_0, window_bounds = array<i64: 1, 16, 64>}, {transform_indices = @transform_1, window_bounds = array<i64: 1, 1, 64>}, {pipeline_mode = #tpu.pipeline_mode<synchronous>, transform_indices = @transform_2, window_bounds = array<i64: 2, 24, 8>}, {pipeline_mode = #tpu.pipeline_mode<synchronous>, transform_indices = @transform_3, window_bounds = array<i64: 2, 24, 1>}, {pipeline_mode = #tpu.pipeline_mode<synchronous>, transform_indices = @transform_4, window_bounds = array<i64: 2, 8, 8>}, {pipeline_mode = #tpu.pipeline_mode<synchronous>, transform_indices = @transform_5, window_bounds = array<i64: 2, 8, 1>}, {pipeline_mode = #tpu.pipeline_mode<synchronous>, transform_indices = @transform_6, window_bounds = array<i64: 2, 2, 8, 1>}, {pipeline_mode = #tpu.pipeline_mode<synchronous>, transform_indices = @transform_7, window_bounds = array<i64: 2, 2, 8, 1>}, {pipeline_mode = #tpu.pipeline_mode<synchronous>, transform_indices = @transform_8, window_bounds = array<i64: 2, 8, 24>}, {pipeline_mode = #tpu.pipeline_mode<synchronous>, transform_indices = @transform_9, window_bounds = array<i64: 2, 8, 1>}, {pipeline_mode = #tpu.pipeline_mode<synchronous>, transform_indices = @transform_10, window_bounds = array<i64: 2, 8, 24>}, {pipeline_mode = #tpu.pipeline_mode<synchronous>, transform_indices = @transform_11, window_bounds = array<i64: 2, 8, 1>}, {pipeline_mode = #tpu.pipeline_mode<synchronous>, transform_indices = @transform_12, window_bounds = array<i64: 16, 8>}, {pipeline_mode = #tpu.pipeline_mode<synchronous>, transform_indices = @transform_13, window_bounds = array<i64: 16, 1>}, {transform_indices = @transform_14, window_bounds = array<i64: 1, 8, 64>}, {transform_indices = @transform_15, window_bounds = array<i64: 1, 1, 1>}]} {
    %c0 = arith.constant 0 : index
    %c0_0 = arith.constant 0 : index
    %c0_1 = arith.constant 0 : index
    %0 = vector.load %arg1[%c0, %c0_0, %c0_1] : memref<1x16x64xf32, #tpu.memory_space<vmem>>, vector<1x16x64xf32>
    %1 = vector.shape_cast %0 : vector<1x16x64xf32> to vector<16x64xf32>
    %c0_2 = arith.constant 0 : index
    %c0_3 = arith.constant 0 : index
    %c0_4 = arith.constant 0 : index
    %2 = vector.load %arg2[%c0_2, %c0_3, %c0_4] : memref<1x1x64xf32, #tpu.memory_space<vmem>>, vector<1x1x64xf32>
    %3 = vector.shape_cast %2 : vector<1x1x64xf32> to vector<1x64xf32>
    %4 = vector.extract_strided_slice %1 {offsets = [0, 0], sizes = [8, 64], strides = [1, 1]} : vector<16x64xf32> to vector<8x64xf32>
    %5 = vector.extract_strided_slice %1 {offsets = [8, 0], sizes = [8, 64], strides = [1, 1]} : vector<16x64xf32> to vector<8x64xf32>
    %cst = arith.constant 1.000000e+00 : f32
    %6 = vector.broadcast %cst : f32 to vector<1x64xf32>
    %7 = arith.subf %3, %6 : vector<1x64xf32>
    %cst_5 = arith.constant 1.000000e+04 : f32
    %8 = vector.broadcast %cst_5 : f32 to vector<1x64xf32>
    %9 = arith.mulf %7, %8 : vector<1x64xf32>
    %10 = vector.broadcast %3 : vector<1x64xf32> to vector<8x64xf32>
    %11 = arith.mulf %4, %10 : vector<8x64xf32>
    %c0_6 = arith.constant 0 : index
    %c0_7 = arith.constant 0 : index
    %c0_8 = arith.constant 0 : index
    %12 = vector.load %arg3[%c0_6, %c0_7, %c0_8] : memref<2x24x8xf32, #tpu.memory_space<vmem>>, vector<1x24x8xf32>
    %13 = vector.shape_cast %12 : vector<1x24x8xf32> to vector<24x8xf32>
    %cst_9 = arith.constant dense<0.000000e+00> : vector<24x64xf32>
    %14 = tpu.matmul %13, %11, %cst_9 {dimension_numbers = #tpu.dot_dimension_numbers<[1], [0], [0], [1], [0, 0, 1, 1], [], []>, precision = #tpu.contract_precision<fp32>} : vector<24x8xf32>, vector<8x64xf32>, vector<24x64xf32> -> vector<24x64xf32>
    %c0_10 = arith.constant 0 : index
    %c0_11 = arith.constant 0 : index
    %c0_12 = arith.constant 0 : index
    %15 = vector.load %arg4[%c0_10, %c0_11, %c0_12] : memref<2x24x1xf32, #tpu.memory_space<vmem>>, vector<1x24x1xf32>
    %16 = vector.shape_cast %15 : vector<1x24x1xf32> to vector<24x1xf32>
    %17 = vector.broadcast %16 : vector<24x1xf32> to vector<24x64xf32>
    %18 = arith.addf %14, %17 : vector<24x64xf32>
    %19 = vector.extract_strided_slice %18 {offsets = [0, 0], sizes = [8, 64], strides = [1, 1]} : vector<24x64xf32> to vector<8x64xf32>
    %20 = vector.extract_strided_slice %18 {offsets = [8, 0], sizes = [8, 64], strides = [1, 1]} : vector<24x64xf32> to vector<8x64xf32>
    %21 = vector.extract_strided_slice %18 {offsets = [16, 0], sizes = [8, 64], strides = [1, 1]} : vector<24x64xf32> to vector<8x64xf32>
    %22 = vector.extract_strided_slice %19 {offsets = [0, 0], sizes = [4, 64], strides = [1, 1]} : vector<8x64xf32> to vector<4x64xf32>
    %23 = vector.extract_strided_slice %20 {offsets = [0, 0], sizes = [4, 64], strides = [1, 1]} : vector<8x64xf32> to vector<4x64xf32>
    %24 = vector.extract_strided_slice %21 {offsets = [0, 0], sizes = [4, 64], strides = [1, 1]} : vector<8x64xf32> to vector<4x64xf32>
    %25 = tpu.transpose %22, [1, 0] : vector<4x64xf32> -> vector<64x4xf32>
    %cst_13 = arith.constant dense<0.000000e+00> : vector<64x64xf32>
    %26 = tpu.matmul %25, %23, %cst_13 {dimension_numbers = #tpu.dot_dimension_numbers<[1], [0], [0], [1], [0, 0, 1, 1], [], []>, precision = #tpu.contract_precision<fp32>} : vector<64x4xf32>, vector<4x64xf32>, vector<64x64xf32> -> vector<64x64xf32>
    %cst_14 = arith.constant 5.000000e-01 : f32
    %27 = vector.broadcast %cst_14 : f32 to vector<64x64xf32>
    %28 = arith.mulf %26, %27 : vector<64x64xf32>
    %29 = vector.broadcast %9 : vector<1x64xf32> to vector<64x64xf32>
    %30 = arith.addf %28, %29 : vector<64x64xf32>
    %cst_15 = arith.constant dense<0xFF800000> : vector<64xf32>
    %31 = vector.multi_reduction <maximumf>, %30, %cst_15 [1] : vector<64x64xf32> to vector<64xf32>
    %32 = vector.shape_cast %31 : vector<64xf32> to vector<64x1xf32>
    %33 = vector.broadcast %32 : vector<64x1xf32> to vector<64x64xf32>
    %34 = arith.subf %30, %33 : vector<64x64xf32>
    %35 = math.exp %34 : vector<64x64xf32>
    %cst_16 = arith.constant dense<0.000000e+00> : vector<64xf32>
    %36 = vector.multi_reduction <add>, %35, %cst_16 [1] : vector<64x64xf32> to vector<64xf32>
    %37 = vector.shape_cast %36 : vector<64xf32> to vector<64x1xf32>
    %38 = vector.broadcast %37 : vector<64x1xf32> to vector<64x64xf32>
    %39 = arith.divf %35, %38 : vector<64x64xf32>
    %cst_17 = arith.constant dense<0.000000e+00> : vector<4x64xf32>
    %40 = tpu.matmul %24, %39, %cst_17 {dimension_numbers = #tpu.dot_dimension_numbers<[1], [1], [0], [0], [0, 0, 1, 0], [], []>, precision = #tpu.contract_precision<fp32>} : vector<4x64xf32>, vector<64x64xf32>, vector<4x64xf32> -> vector<4x64xf32>
    %41 = vector.extract_strided_slice %19 {offsets = [4, 0], sizes = [4, 64], strides = [1, 1]} : vector<8x64xf32> to vector<4x64xf32>
    %42 = vector.extract_strided_slice %20 {offsets = [4, 0], sizes = [4, 64], strides = [1, 1]} : vector<8x64xf32> to vector<4x64xf32>
    %43 = vector.extract_strided_slice %21 {offsets = [4, 0], sizes = [4, 64], strides = [1, 1]} : vector<8x64xf32> to vector<4x64xf32>
    %44 = tpu.transpose %41, [1, 0] : vector<4x64xf32> -> vector<64x4xf32>
    %cst_18 = arith.constant dense<0.000000e+00> : vector<64x64xf32>
    %45 = tpu.matmul %44, %42, %cst_18 {dimension_numbers = #tpu.dot_dimension_numbers<[1], [0], [0], [1], [0, 0, 1, 1], [], []>, precision = #tpu.contract_precision<fp32>} : vector<64x4xf32>, vector<4x64xf32>, vector<64x64xf32> -> vector<64x64xf32>
    %cst_19 = arith.constant 5.000000e-01 : f32
    %46 = vector.broadcast %cst_19 : f32 to vector<64x64xf32>
    %47 = arith.mulf %45, %46 : vector<64x64xf32>
    %48 = vector.broadcast %9 : vector<1x64xf32> to vector<64x64xf32>
    %49 = arith.addf %47, %48 : vector<64x64xf32>
    %cst_20 = arith.constant dense<0xFF800000> : vector<64xf32>
    %50 = vector.multi_reduction <maximumf>, %49, %cst_20 [1] : vector<64x64xf32> to vector<64xf32>
    %51 = vector.shape_cast %50 : vector<64xf32> to vector<64x1xf32>
    %52 = vector.broadcast %51 : vector<64x1xf32> to vector<64x64xf32>
    %53 = arith.subf %49, %52 : vector<64x64xf32>
    %54 = math.exp %53 : vector<64x64xf32>
    %cst_21 = arith.constant dense<0.000000e+00> : vector<64xf32>
    %55 = vector.multi_reduction <add>, %54, %cst_21 [1] : vector<64x64xf32> to vector<64xf32>
    %56 = vector.shape_cast %55 : vector<64xf32> to vector<64x1xf32>
    %57 = vector.broadcast %56 : vector<64x1xf32> to vector<64x64xf32>
    %58 = arith.divf %54, %57 : vector<64x64xf32>
    %cst_22 = arith.constant dense<0.000000e+00> : vector<4x64xf32>
    %59 = tpu.matmul %43, %58, %cst_22 {dimension_numbers = #tpu.dot_dimension_numbers<[1], [1], [0], [0], [0, 0, 1, 0], [], []>, precision = #tpu.contract_precision<fp32>} : vector<4x64xf32>, vector<64x64xf32>, vector<4x64xf32> -> vector<4x64xf32>
    %60 = tpu.concatenate %40, %59 in 0 : vector<4x64xf32>, vector<4x64xf32> -> vector<8x64xf32>
    %c0_23 = arith.constant 0 : index
    %c0_24 = arith.constant 0 : index
    %c0_25 = arith.constant 0 : index
    %61 = vector.load %arg5[%c0_23, %c0_24, %c0_25] : memref<2x8x8xf32, #tpu.memory_space<vmem>>, vector<1x8x8xf32>
    %62 = vector.shape_cast %61 : vector<1x8x8xf32> to vector<8x8xf32>
    %cst_26 = arith.constant dense<0.000000e+00> : vector<8x64xf32>
    %63 = tpu.matmul %62, %60, %cst_26 {dimension_numbers = #tpu.dot_dimension_numbers<[1], [0], [0], [1], [0, 0, 1, 1], [], []>, precision = #tpu.contract_precision<fp32>} : vector<8x8xf32>, vector<8x64xf32>, vector<8x64xf32> -> vector<8x64xf32>
    %c0_27 = arith.constant 0 : index
    %c0_28 = arith.constant 0 : index
    %c0_29 = arith.constant 0 : index
    %64 = vector.load %arg6[%c0_27, %c0_28, %c0_29] : memref<2x8x1xf32, #tpu.memory_space<vmem>>, vector<1x8x1xf32>
    %65 = vector.shape_cast %64 : vector<1x8x1xf32> to vector<8x1xf32>
    %66 = vector.broadcast %65 : vector<8x1xf32> to vector<8x64xf32>
    %67 = arith.addf %63, %66 : vector<8x64xf32>
    %68 = arith.addf %11, %67 : vector<8x64xf32>
    %c0_30 = arith.constant 0 : index
    %c0_31 = arith.constant 0 : index
    %c0_32 = arith.constant 0 : index
    %c0_33 = arith.constant 0 : index
    %69 = vector.load %arg7[%c0_30, %c0_31, %c0_32, %c0_33] : memref<2x2x8x1xf32, #tpu.memory_space<vmem>>, vector<1x1x8x1xf32>
    %70 = vector.shape_cast %69 : vector<1x1x8x1xf32> to vector<8x1xf32>
    %c0_34 = arith.constant 0 : index
    %c0_35 = arith.constant 0 : index
    %c0_36 = arith.constant 0 : index
    %c0_37 = arith.constant 0 : index
    %71 = vector.load %arg8[%c0_34, %c0_35, %c0_36, %c0_37] : memref<2x2x8x1xf32, #tpu.memory_space<vmem>>, vector<1x1x8x1xf32>
    %72 = vector.shape_cast %71 : vector<1x1x8x1xf32> to vector<8x1xf32>
    %cst_38 = arith.constant dense<0.000000e+00> : vector<64xf32>
    %73 = vector.multi_reduction <add>, %68, %cst_38 [0] : vector<8x64xf32> to vector<64xf32>
    %74 = vector.shape_cast %73 : vector<64xf32> to vector<1x64xf32>
    %cst_39 = arith.constant 8.000000e+00 : f32
    %75 = vector.broadcast %cst_39 : f32 to vector<1x64xf32>
    %76 = arith.divf %74, %75 : vector<1x64xf32>
    %77 = vector.broadcast %76 : vector<1x64xf32> to vector<8x64xf32>
    %78 = arith.subf %68, %77 : vector<8x64xf32>
    %79 = arith.mulf %78, %78 : vector<8x64xf32>
    %cst_40 = arith.constant dense<0.000000e+00> : vector<64xf32>
    %80 = vector.multi_reduction <add>, %79, %cst_40 [0] : vector<8x64xf32> to vector<64xf32>
    %81 = vector.shape_cast %80 : vector<64xf32> to vector<1x64xf32>
    %cst_41 = arith.constant 8.000000e+00 : f32
    %82 = vector.broadcast %cst_41 : f32 to vector<1x64xf32>
    %83 = arith.divf %81, %82 : vector<1x64xf32>
    %84 = vector.broadcast %76 : vector<1x64xf32> to vector<8x64xf32>
    %85 = arith.subf %68, %84 : vector<8x64xf32>
    %cst_42 = arith.constant 9.99999974E-6 : f32
    %86 = vector.broadcast %cst_42 : f32 to vector<1x64xf32>
    %87 = arith.addf %83, %86 : vector<1x64xf32>
    %88 = math.rsqrt %87 : vector<1x64xf32>
    %89 = vector.broadcast %88 : vector<1x64xf32> to vector<8x64xf32>
    %90 = arith.mulf %85, %89 : vector<8x64xf32>
    %91 = vector.broadcast %70 : vector<8x1xf32> to vector<8x64xf32>
    %92 = arith.mulf %90, %91 : vector<8x64xf32>
    %93 = vector.broadcast %72 : vector<8x1xf32> to vector<8x64xf32>
    %94 = arith.addf %92, %93 : vector<8x64xf32>
    %95 = vector.broadcast %3 : vector<1x64xf32> to vector<8x64xf32>
    %96 = arith.mulf %94, %95 : vector<8x64xf32>
    %c0_43 = arith.constant 0 : index
    %c0_44 = arith.constant 0 : index
    %c0_45 = arith.constant 0 : index
    %97 = vector.load %arg9[%c0_43, %c0_44, %c0_45] : memref<2x8x24xf32, #tpu.memory_space<vmem>>, vector<1x8x24xf32>
    %98 = vector.shape_cast %97 : vector<1x8x24xf32> to vector<8x24xf32>
    %cst_46 = arith.constant 0.000000e+00 : f32
    %99 = vector.broadcast %cst_46 : f32 to vector<8x1xf32>
    %100 = vector.extract_strided_slice %96 {offsets = [0, 0], sizes = [8, 63], strides = [1, 1]} : vector<8x64xf32> to vector<8x63xf32>
    %101 = tpu.concatenate %99, %100 in 1 : vector<8x1xf32>, vector<8x63xf32> -> vector<8x64xf32>
    %102 = vector.extract_strided_slice %96 {offsets = [0, 1], sizes = [8, 63], strides = [1, 1]} : vector<8x64xf32> to vector<8x63xf32>
    %103 = tpu.concatenate %102, %99 in 1 : vector<8x63xf32>, vector<8x1xf32> -> vector<8x64xf32>
    %104 = tpu.concatenate %101, %96, %103 in 0 : vector<8x64xf32>, vector<8x64xf32>, vector<8x64xf32> -> vector<24x64xf32>
    %cst_47 = arith.constant dense<0.000000e+00> : vector<8x64xf32>
    %105 = tpu.matmul %98, %104, %cst_47 {dimension_numbers = #tpu.dot_dimension_numbers<[1], [0], [0], [1], [0, 0, 1, 1], [], []>, precision = #tpu.contract_precision<fp32>} : vector<8x24xf32>, vector<24x64xf32>, vector<8x64xf32> -> vector<8x64xf32>
    %c0_48 = arith.constant 0 : index
    %c0_49 = arith.constant 0 : index
    %c0_50 = arith.constant 0 : index
    %106 = vector.load %arg10[%c0_48, %c0_49, %c0_50] : memref<2x8x1xf32, #tpu.memory_space<vmem>>, vector<1x8x1xf32>
    %107 = vector.shape_cast %106 : vector<1x8x1xf32> to vector<8x1xf32>
    %108 = vector.broadcast %107 : vector<8x1xf32> to vector<8x64xf32>
    %109 = arith.addf %105, %108 : vector<8x64xf32>
    %cst_51 = arith.constant 0.000000e+00 : f32
    %110 = vector.broadcast %cst_51 : f32 to vector<8x64xf32>
    %111 = arith.maximumf %109, %110 : vector<8x64xf32>
    %112 = vector.broadcast %3 : vector<1x64xf32> to vector<8x64xf32>
    %113 = arith.mulf %111, %112 : vector<8x64xf32>
    %c0_52 = arith.constant 0 : index
    %c0_53 = arith.constant 0 : index
    %c0_54 = arith.constant 0 : index
    %114 = vector.load %arg11[%c0_52, %c0_53, %c0_54] : memref<2x8x24xf32, #tpu.memory_space<vmem>>, vector<1x8x24xf32>
    %115 = vector.shape_cast %114 : vector<1x8x24xf32> to vector<8x24xf32>
    %cst_55 = arith.constant 0.000000e+00 : f32
    %116 = vector.broadcast %cst_55 : f32 to vector<8x1xf32>
    %117 = vector.extract_strided_slice %113 {offsets = [0, 0], sizes = [8, 63], strides = [1, 1]} : vector<8x64xf32> to vector<8x63xf32>
    %118 = tpu.concatenate %116, %117 in 1 : vector<8x1xf32>, vector<8x63xf32> -> vector<8x64xf32>
    %119 = vector.extract_strided_slice %113 {offsets = [0, 1], sizes = [8, 63], strides = [1, 1]} : vector<8x64xf32> to vector<8x63xf32>
    %120 = tpu.concatenate %119, %116 in 1 : vector<8x63xf32>, vector<8x1xf32> -> vector<8x64xf32>
    %121 = tpu.concatenate %118, %113, %120 in 0 : vector<8x64xf32>, vector<8x64xf32>, vector<8x64xf32> -> vector<24x64xf32>
    %cst_56 = arith.constant dense<0.000000e+00> : vector<8x64xf32>
    %122 = tpu.matmul %115, %121, %cst_56 {dimension_numbers = #tpu.dot_dimension_numbers<[1], [0], [0], [1], [0, 0, 1, 1], [], []>, precision = #tpu.contract_precision<fp32>} : vector<8x24xf32>, vector<24x64xf32>, vector<8x64xf32> -> vector<8x64xf32>
    %c0_57 = arith.constant 0 : index
    %c0_58 = arith.constant 0 : index
    %c0_59 = arith.constant 0 : index
    %123 = vector.load %arg12[%c0_57, %c0_58, %c0_59] : memref<2x8x1xf32, #tpu.memory_space<vmem>>, vector<1x8x1xf32>
    %124 = vector.shape_cast %123 : vector<1x8x1xf32> to vector<8x1xf32>
    %125 = vector.broadcast %124 : vector<8x1xf32> to vector<8x64xf32>
    %126 = arith.addf %122, %125 : vector<8x64xf32>
    %127 = vector.broadcast %3 : vector<1x64xf32> to vector<8x64xf32>
    %128 = arith.mulf %126, %127 : vector<8x64xf32>
    %129 = arith.addf %94, %128 : vector<8x64xf32>
    %c0_60 = arith.constant 0 : index
    %c1 = arith.constant 1 : index
    %c0_61 = arith.constant 0 : index
    %c0_62 = arith.constant 0 : index
    %130 = vector.load %arg7[%c0_60, %c1, %c0_61, %c0_62] : memref<2x2x8x1xf32, #tpu.memory_space<vmem>>, vector<1x1x8x1xf32>
    %131 = vector.shape_cast %130 : vector<1x1x8x1xf32> to vector<8x1xf32>
    %c0_63 = arith.constant 0 : index
    %c1_64 = arith.constant 1 : index
    %c0_65 = arith.constant 0 : index
    %c0_66 = arith.constant 0 : index
    %132 = vector.load %arg8[%c0_63, %c1_64, %c0_65, %c0_66] : memref<2x2x8x1xf32, #tpu.memory_space<vmem>>, vector<1x1x8x1xf32>
    %133 = vector.shape_cast %132 : vector<1x1x8x1xf32> to vector<8x1xf32>
    %cst_67 = arith.constant dense<0.000000e+00> : vector<64xf32>
    %134 = vector.multi_reduction <add>, %129, %cst_67 [0] : vector<8x64xf32> to vector<64xf32>
    %135 = vector.shape_cast %134 : vector<64xf32> to vector<1x64xf32>
    %cst_68 = arith.constant 8.000000e+00 : f32
    %136 = vector.broadcast %cst_68 : f32 to vector<1x64xf32>
    %137 = arith.divf %135, %136 : vector<1x64xf32>
    %138 = vector.broadcast %137 : vector<1x64xf32> to vector<8x64xf32>
    %139 = arith.subf %129, %138 : vector<8x64xf32>
    %140 = arith.mulf %139, %139 : vector<8x64xf32>
    %cst_69 = arith.constant dense<0.000000e+00> : vector<64xf32>
    %141 = vector.multi_reduction <add>, %140, %cst_69 [0] : vector<8x64xf32> to vector<64xf32>
    %142 = vector.shape_cast %141 : vector<64xf32> to vector<1x64xf32>
    %cst_70 = arith.constant 8.000000e+00 : f32
    %143 = vector.broadcast %cst_70 : f32 to vector<1x64xf32>
    %144 = arith.divf %142, %143 : vector<1x64xf32>
    %145 = vector.broadcast %137 : vector<1x64xf32> to vector<8x64xf32>
    %146 = arith.subf %129, %145 : vector<8x64xf32>
    %cst_71 = arith.constant 9.99999974E-6 : f32
    %147 = vector.broadcast %cst_71 : f32 to vector<1x64xf32>
    %148 = arith.addf %144, %147 : vector<1x64xf32>
    %149 = math.rsqrt %148 : vector<1x64xf32>
    %150 = vector.broadcast %149 : vector<1x64xf32> to vector<8x64xf32>
    %151 = arith.mulf %146, %150 : vector<8x64xf32>
    %152 = vector.broadcast %131 : vector<8x1xf32> to vector<8x64xf32>
    %153 = arith.mulf %151, %152 : vector<8x64xf32>
    %154 = vector.broadcast %133 : vector<8x1xf32> to vector<8x64xf32>
    %155 = arith.addf %153, %154 : vector<8x64xf32>
    %c1_72 = arith.constant 1 : index
    %c0_73 = arith.constant 0 : index
    %c0_74 = arith.constant 0 : index
    %156 = vector.load %arg3[%c1_72, %c0_73, %c0_74] : memref<2x24x8xf32, #tpu.memory_space<vmem>>, vector<1x24x8xf32>
    %157 = vector.shape_cast %156 : vector<1x24x8xf32> to vector<24x8xf32>
    %cst_75 = arith.constant dense<0.000000e+00> : vector<24x64xf32>
    %158 = tpu.matmul %157, %155, %cst_75 {dimension_numbers = #tpu.dot_dimension_numbers<[1], [0], [0], [1], [0, 0, 1, 1], [], []>, precision = #tpu.contract_precision<fp32>} : vector<24x8xf32>, vector<8x64xf32>, vector<24x64xf32> -> vector<24x64xf32>
    %c1_76 = arith.constant 1 : index
    %c0_77 = arith.constant 0 : index
    %c0_78 = arith.constant 0 : index
    %159 = vector.load %arg4[%c1_76, %c0_77, %c0_78] : memref<2x24x1xf32, #tpu.memory_space<vmem>>, vector<1x24x1xf32>
    %160 = vector.shape_cast %159 : vector<1x24x1xf32> to vector<24x1xf32>
    %161 = vector.broadcast %160 : vector<24x1xf32> to vector<24x64xf32>
    %162 = arith.addf %158, %161 : vector<24x64xf32>
    %163 = vector.extract_strided_slice %162 {offsets = [0, 0], sizes = [8, 64], strides = [1, 1]} : vector<24x64xf32> to vector<8x64xf32>
    %164 = vector.extract_strided_slice %162 {offsets = [8, 0], sizes = [8, 64], strides = [1, 1]} : vector<24x64xf32> to vector<8x64xf32>
    %165 = vector.extract_strided_slice %162 {offsets = [16, 0], sizes = [8, 64], strides = [1, 1]} : vector<24x64xf32> to vector<8x64xf32>
    %166 = vector.extract_strided_slice %163 {offsets = [0, 0], sizes = [4, 64], strides = [1, 1]} : vector<8x64xf32> to vector<4x64xf32>
    %167 = vector.extract_strided_slice %164 {offsets = [0, 0], sizes = [4, 64], strides = [1, 1]} : vector<8x64xf32> to vector<4x64xf32>
    %168 = vector.extract_strided_slice %165 {offsets = [0, 0], sizes = [4, 64], strides = [1, 1]} : vector<8x64xf32> to vector<4x64xf32>
    %169 = tpu.transpose %166, [1, 0] : vector<4x64xf32> -> vector<64x4xf32>
    %cst_79 = arith.constant dense<0.000000e+00> : vector<64x64xf32>
    %170 = tpu.matmul %169, %167, %cst_79 {dimension_numbers = #tpu.dot_dimension_numbers<[1], [0], [0], [1], [0, 0, 1, 1], [], []>, precision = #tpu.contract_precision<fp32>} : vector<64x4xf32>, vector<4x64xf32>, vector<64x64xf32> -> vector<64x64xf32>
    %cst_80 = arith.constant 5.000000e-01 : f32
    %171 = vector.broadcast %cst_80 : f32 to vector<64x64xf32>
    %172 = arith.mulf %170, %171 : vector<64x64xf32>
    %173 = vector.broadcast %9 : vector<1x64xf32> to vector<64x64xf32>
    %174 = arith.addf %172, %173 : vector<64x64xf32>
    %cst_81 = arith.constant dense<0xFF800000> : vector<64xf32>
    %175 = vector.multi_reduction <maximumf>, %174, %cst_81 [1] : vector<64x64xf32> to vector<64xf32>
    %176 = vector.shape_cast %175 : vector<64xf32> to vector<64x1xf32>
    %177 = vector.broadcast %176 : vector<64x1xf32> to vector<64x64xf32>
    %178 = arith.subf %174, %177 : vector<64x64xf32>
    %179 = math.exp %178 : vector<64x64xf32>
    %cst_82 = arith.constant dense<0.000000e+00> : vector<64xf32>
    %180 = vector.multi_reduction <add>, %179, %cst_82 [1] : vector<64x64xf32> to vector<64xf32>
    %181 = vector.shape_cast %180 : vector<64xf32> to vector<64x1xf32>
    %182 = vector.broadcast %181 : vector<64x1xf32> to vector<64x64xf32>
    %183 = arith.divf %179, %182 : vector<64x64xf32>
    %cst_83 = arith.constant dense<0.000000e+00> : vector<4x64xf32>
    %184 = tpu.matmul %168, %183, %cst_83 {dimension_numbers = #tpu.dot_dimension_numbers<[1], [1], [0], [0], [0, 0, 1, 0], [], []>, precision = #tpu.contract_precision<fp32>} : vector<4x64xf32>, vector<64x64xf32>, vector<4x64xf32> -> vector<4x64xf32>
    %185 = vector.extract_strided_slice %163 {offsets = [4, 0], sizes = [4, 64], strides = [1, 1]} : vector<8x64xf32> to vector<4x64xf32>
    %186 = vector.extract_strided_slice %164 {offsets = [4, 0], sizes = [4, 64], strides = [1, 1]} : vector<8x64xf32> to vector<4x64xf32>
    %187 = vector.extract_strided_slice %165 {offsets = [4, 0], sizes = [4, 64], strides = [1, 1]} : vector<8x64xf32> to vector<4x64xf32>
    %188 = tpu.transpose %185, [1, 0] : vector<4x64xf32> -> vector<64x4xf32>
    %cst_84 = arith.constant dense<0.000000e+00> : vector<64x64xf32>
    %189 = tpu.matmul %188, %186, %cst_84 {dimension_numbers = #tpu.dot_dimension_numbers<[1], [0], [0], [1], [0, 0, 1, 1], [], []>, precision = #tpu.contract_precision<fp32>} : vector<64x4xf32>, vector<4x64xf32>, vector<64x64xf32> -> vector<64x64xf32>
    %cst_85 = arith.constant 5.000000e-01 : f32
    %190 = vector.broadcast %cst_85 : f32 to vector<64x64xf32>
    %191 = arith.mulf %189, %190 : vector<64x64xf32>
    %192 = vector.broadcast %9 : vector<1x64xf32> to vector<64x64xf32>
    %193 = arith.addf %191, %192 : vector<64x64xf32>
    %cst_86 = arith.constant dense<0xFF800000> : vector<64xf32>
    %194 = vector.multi_reduction <maximumf>, %193, %cst_86 [1] : vector<64x64xf32> to vector<64xf32>
    %195 = vector.shape_cast %194 : vector<64xf32> to vector<64x1xf32>
    %196 = vector.broadcast %195 : vector<64x1xf32> to vector<64x64xf32>
    %197 = arith.subf %193, %196 : vector<64x64xf32>
    %198 = math.exp %197 : vector<64x64xf32>
    %cst_87 = arith.constant dense<0.000000e+00> : vector<64xf32>
    %199 = vector.multi_reduction <add>, %198, %cst_87 [1] : vector<64x64xf32> to vector<64xf32>
    %200 = vector.shape_cast %199 : vector<64xf32> to vector<64x1xf32>
    %201 = vector.broadcast %200 : vector<64x1xf32> to vector<64x64xf32>
    %202 = arith.divf %198, %201 : vector<64x64xf32>
    %cst_88 = arith.constant dense<0.000000e+00> : vector<4x64xf32>
    %203 = tpu.matmul %187, %202, %cst_88 {dimension_numbers = #tpu.dot_dimension_numbers<[1], [1], [0], [0], [0, 0, 1, 0], [], []>, precision = #tpu.contract_precision<fp32>} : vector<4x64xf32>, vector<64x64xf32>, vector<4x64xf32> -> vector<4x64xf32>
    %204 = tpu.concatenate %184, %203 in 0 : vector<4x64xf32>, vector<4x64xf32> -> vector<8x64xf32>
    %c1_89 = arith.constant 1 : index
    %c0_90 = arith.constant 0 : index
    %c0_91 = arith.constant 0 : index
    %205 = vector.load %arg5[%c1_89, %c0_90, %c0_91] : memref<2x8x8xf32, #tpu.memory_space<vmem>>, vector<1x8x8xf32>
    %206 = vector.shape_cast %205 : vector<1x8x8xf32> to vector<8x8xf32>
    %cst_92 = arith.constant dense<0.000000e+00> : vector<8x64xf32>
    %207 = tpu.matmul %206, %204, %cst_92 {dimension_numbers = #tpu.dot_dimension_numbers<[1], [0], [0], [1], [0, 0, 1, 1], [], []>, precision = #tpu.contract_precision<fp32>} : vector<8x8xf32>, vector<8x64xf32>, vector<8x64xf32> -> vector<8x64xf32>
    %c1_93 = arith.constant 1 : index
    %c0_94 = arith.constant 0 : index
    %c0_95 = arith.constant 0 : index
    %208 = vector.load %arg6[%c1_93, %c0_94, %c0_95] : memref<2x8x1xf32, #tpu.memory_space<vmem>>, vector<1x8x1xf32>
    %209 = vector.shape_cast %208 : vector<1x8x1xf32> to vector<8x1xf32>
    %210 = vector.broadcast %209 : vector<8x1xf32> to vector<8x64xf32>
    %211 = arith.addf %207, %210 : vector<8x64xf32>
    %212 = arith.addf %155, %211 : vector<8x64xf32>
    %c1_96 = arith.constant 1 : index
    %c0_97 = arith.constant 0 : index
    %c0_98 = arith.constant 0 : index
    %c0_99 = arith.constant 0 : index
    %213 = vector.load %arg7[%c1_96, %c0_97, %c0_98, %c0_99] : memref<2x2x8x1xf32, #tpu.memory_space<vmem>>, vector<1x1x8x1xf32>
    %214 = vector.shape_cast %213 : vector<1x1x8x1xf32> to vector<8x1xf32>
    %c1_100 = arith.constant 1 : index
    %c0_101 = arith.constant 0 : index
    %c0_102 = arith.constant 0 : index
    %c0_103 = arith.constant 0 : index
    %215 = vector.load %arg8[%c1_100, %c0_101, %c0_102, %c0_103] : memref<2x2x8x1xf32, #tpu.memory_space<vmem>>, vector<1x1x8x1xf32>
    %216 = vector.shape_cast %215 : vector<1x1x8x1xf32> to vector<8x1xf32>
    %cst_104 = arith.constant dense<0.000000e+00> : vector<64xf32>
    %217 = vector.multi_reduction <add>, %212, %cst_104 [0] : vector<8x64xf32> to vector<64xf32>
    %218 = vector.shape_cast %217 : vector<64xf32> to vector<1x64xf32>
    %cst_105 = arith.constant 8.000000e+00 : f32
    %219 = vector.broadcast %cst_105 : f32 to vector<1x64xf32>
    %220 = arith.divf %218, %219 : vector<1x64xf32>
    %221 = vector.broadcast %220 : vector<1x64xf32> to vector<8x64xf32>
    %222 = arith.subf %212, %221 : vector<8x64xf32>
    %223 = arith.mulf %222, %222 : vector<8x64xf32>
    %cst_106 = arith.constant dense<0.000000e+00> : vector<64xf32>
    %224 = vector.multi_reduction <add>, %223, %cst_106 [0] : vector<8x64xf32> to vector<64xf32>
    %225 = vector.shape_cast %224 : vector<64xf32> to vector<1x64xf32>
    %cst_107 = arith.constant 8.000000e+00 : f32
    %226 = vector.broadcast %cst_107 : f32 to vector<1x64xf32>
    %227 = arith.divf %225, %226 : vector<1x64xf32>
    %228 = vector.broadcast %220 : vector<1x64xf32> to vector<8x64xf32>
    %229 = arith.subf %212, %228 : vector<8x64xf32>
    %cst_108 = arith.constant 9.99999974E-6 : f32
    %230 = vector.broadcast %cst_108 : f32 to vector<1x64xf32>
    %231 = arith.addf %227, %230 : vector<1x64xf32>
    %232 = math.rsqrt %231 : vector<1x64xf32>
    %233 = vector.broadcast %232 : vector<1x64xf32> to vector<8x64xf32>
    %234 = arith.mulf %229, %233 : vector<8x64xf32>
    %235 = vector.broadcast %214 : vector<8x1xf32> to vector<8x64xf32>
    %236 = arith.mulf %234, %235 : vector<8x64xf32>
    %237 = vector.broadcast %216 : vector<8x1xf32> to vector<8x64xf32>
    %238 = arith.addf %236, %237 : vector<8x64xf32>
    %239 = vector.broadcast %3 : vector<1x64xf32> to vector<8x64xf32>
    %240 = arith.mulf %238, %239 : vector<8x64xf32>
    %c1_109 = arith.constant 1 : index
    %c0_110 = arith.constant 0 : index
    %c0_111 = arith.constant 0 : index
    %241 = vector.load %arg9[%c1_109, %c0_110, %c0_111] : memref<2x8x24xf32, #tpu.memory_space<vmem>>, vector<1x8x24xf32>
    %242 = vector.shape_cast %241 : vector<1x8x24xf32> to vector<8x24xf32>
    %cst_112 = arith.constant 0.000000e+00 : f32
    %243 = vector.broadcast %cst_112 : f32 to vector<8x1xf32>
    %244 = vector.extract_strided_slice %240 {offsets = [0, 0], sizes = [8, 63], strides = [1, 1]} : vector<8x64xf32> to vector<8x63xf32>
    %245 = tpu.concatenate %243, %244 in 1 : vector<8x1xf32>, vector<8x63xf32> -> vector<8x64xf32>
    %246 = vector.extract_strided_slice %240 {offsets = [0, 1], sizes = [8, 63], strides = [1, 1]} : vector<8x64xf32> to vector<8x63xf32>
    %247 = tpu.concatenate %246, %243 in 1 : vector<8x63xf32>, vector<8x1xf32> -> vector<8x64xf32>
    %248 = tpu.concatenate %245, %240, %247 in 0 : vector<8x64xf32>, vector<8x64xf32>, vector<8x64xf32> -> vector<24x64xf32>
    %cst_113 = arith.constant dense<0.000000e+00> : vector<8x64xf32>
    %249 = tpu.matmul %242, %248, %cst_113 {dimension_numbers = #tpu.dot_dimension_numbers<[1], [0], [0], [1], [0, 0, 1, 1], [], []>, precision = #tpu.contract_precision<fp32>} : vector<8x24xf32>, vector<24x64xf32>, vector<8x64xf32> -> vector<8x64xf32>
    %c1_114 = arith.constant 1 : index
    %c0_115 = arith.constant 0 : index
    %c0_116 = arith.constant 0 : index
    %250 = vector.load %arg10[%c1_114, %c0_115, %c0_116] : memref<2x8x1xf32, #tpu.memory_space<vmem>>, vector<1x8x1xf32>
    %251 = vector.shape_cast %250 : vector<1x8x1xf32> to vector<8x1xf32>
    %252 = vector.broadcast %251 : vector<8x1xf32> to vector<8x64xf32>
    %253 = arith.addf %249, %252 : vector<8x64xf32>
    %cst_117 = arith.constant 0.000000e+00 : f32
    %254 = vector.broadcast %cst_117 : f32 to vector<8x64xf32>
    %255 = arith.maximumf %253, %254 : vector<8x64xf32>
    %256 = vector.broadcast %3 : vector<1x64xf32> to vector<8x64xf32>
    %257 = arith.mulf %255, %256 : vector<8x64xf32>
    %c1_118 = arith.constant 1 : index
    %c0_119 = arith.constant 0 : index
    %c0_120 = arith.constant 0 : index
    %258 = vector.load %arg11[%c1_118, %c0_119, %c0_120] : memref<2x8x24xf32, #tpu.memory_space<vmem>>, vector<1x8x24xf32>
    %259 = vector.shape_cast %258 : vector<1x8x24xf32> to vector<8x24xf32>
    %cst_121 = arith.constant 0.000000e+00 : f32
    %260 = vector.broadcast %cst_121 : f32 to vector<8x1xf32>
    %261 = vector.extract_strided_slice %257 {offsets = [0, 0], sizes = [8, 63], strides = [1, 1]} : vector<8x64xf32> to vector<8x63xf32>
    %262 = tpu.concatenate %260, %261 in 1 : vector<8x1xf32>, vector<8x63xf32> -> vector<8x64xf32>
    %263 = vector.extract_strided_slice %257 {offsets = [0, 1], sizes = [8, 63], strides = [1, 1]} : vector<8x64xf32> to vector<8x63xf32>
    %264 = tpu.concatenate %263, %260 in 1 : vector<8x63xf32>, vector<8x1xf32> -> vector<8x64xf32>
    %265 = tpu.concatenate %262, %257, %264 in 0 : vector<8x64xf32>, vector<8x64xf32>, vector<8x64xf32> -> vector<24x64xf32>
    %cst_122 = arith.constant dense<0.000000e+00> : vector<8x64xf32>
    %266 = tpu.matmul %259, %265, %cst_122 {dimension_numbers = #tpu.dot_dimension_numbers<[1], [0], [0], [1], [0, 0, 1, 1], [], []>, precision = #tpu.contract_precision<fp32>} : vector<8x24xf32>, vector<24x64xf32>, vector<8x64xf32> -> vector<8x64xf32>
    %c1_123 = arith.constant 1 : index
    %c0_124 = arith.constant 0 : index
    %c0_125 = arith.constant 0 : index
    %267 = vector.load %arg12[%c1_123, %c0_124, %c0_125] : memref<2x8x1xf32, #tpu.memory_space<vmem>>, vector<1x8x1xf32>
    %268 = vector.shape_cast %267 : vector<1x8x1xf32> to vector<8x1xf32>
    %269 = vector.broadcast %268 : vector<8x1xf32> to vector<8x64xf32>
    %270 = arith.addf %266, %269 : vector<8x64xf32>
    %271 = vector.broadcast %3 : vector<1x64xf32> to vector<8x64xf32>
    %272 = arith.mulf %270, %271 : vector<8x64xf32>
    %273 = arith.addf %238, %272 : vector<8x64xf32>
    %c1_126 = arith.constant 1 : index
    %c1_127 = arith.constant 1 : index
    %c0_128 = arith.constant 0 : index
    %c0_129 = arith.constant 0 : index
    %274 = vector.load %arg7[%c1_126, %c1_127, %c0_128, %c0_129] : memref<2x2x8x1xf32, #tpu.memory_space<vmem>>, vector<1x1x8x1xf32>
    %275 = vector.shape_cast %274 : vector<1x1x8x1xf32> to vector<8x1xf32>
    %c1_130 = arith.constant 1 : index
    %c1_131 = arith.constant 1 : index
    %c0_132 = arith.constant 0 : index
    %c0_133 = arith.constant 0 : index
    %276 = vector.load %arg8[%c1_130, %c1_131, %c0_132, %c0_133] : memref<2x2x8x1xf32, #tpu.memory_space<vmem>>, vector<1x1x8x1xf32>
    %277 = vector.shape_cast %276 : vector<1x1x8x1xf32> to vector<8x1xf32>
    %cst_134 = arith.constant dense<0.000000e+00> : vector<64xf32>
    %278 = vector.multi_reduction <add>, %273, %cst_134 [0] : vector<8x64xf32> to vector<64xf32>
    %279 = vector.shape_cast %278 : vector<64xf32> to vector<1x64xf32>
    %cst_135 = arith.constant 8.000000e+00 : f32
    %280 = vector.broadcast %cst_135 : f32 to vector<1x64xf32>
    %281 = arith.divf %279, %280 : vector<1x64xf32>
    %282 = vector.broadcast %281 : vector<1x64xf32> to vector<8x64xf32>
    %283 = arith.subf %273, %282 : vector<8x64xf32>
    %284 = arith.mulf %283, %283 : vector<8x64xf32>
    %cst_136 = arith.constant dense<0.000000e+00> : vector<64xf32>
    %285 = vector.multi_reduction <add>, %284, %cst_136 [0] : vector<8x64xf32> to vector<64xf32>
    %286 = vector.shape_cast %285 : vector<64xf32> to vector<1x64xf32>
    %cst_137 = arith.constant 8.000000e+00 : f32
    %287 = vector.broadcast %cst_137 : f32 to vector<1x64xf32>
    %288 = arith.divf %286, %287 : vector<1x64xf32>
    %289 = vector.broadcast %281 : vector<1x64xf32> to vector<8x64xf32>
    %290 = arith.subf %273, %289 : vector<8x64xf32>
    %cst_138 = arith.constant 9.99999974E-6 : f32
    %291 = vector.broadcast %cst_138 : f32 to vector<1x64xf32>
    %292 = arith.addf %288, %291 : vector<1x64xf32>
    %293 = math.rsqrt %292 : vector<1x64xf32>
    %294 = vector.broadcast %293 : vector<1x64xf32> to vector<8x64xf32>
    %295 = arith.mulf %290, %294 : vector<8x64xf32>
    %296 = vector.broadcast %275 : vector<8x1xf32> to vector<8x64xf32>
    %297 = arith.mulf %295, %296 : vector<8x64xf32>
    %298 = vector.broadcast %277 : vector<8x1xf32> to vector<8x64xf32>
    %299 = arith.addf %297, %298 : vector<8x64xf32>
    %300 = vector.broadcast %3 : vector<1x64xf32> to vector<8x64xf32>
    %301 = arith.mulf %299, %300 : vector<8x64xf32>
    %c0_139 = arith.constant 0 : index
    %c0_140 = arith.constant 0 : index
    %302 = vector.load %arg13[%c0_139, %c0_140] : memref<16x8xf32, #tpu.memory_space<vmem>>, vector<16x8xf32>
    %303 = arith.addf %301, %4 : vector<8x64xf32>
    %cst_141 = arith.constant dense<0.000000e+00> : vector<16x64xf32>
    %304 = tpu.matmul %302, %303, %cst_141 {dimension_numbers = #tpu.dot_dimension_numbers<[1], [0], [0], [1], [0, 0, 1, 1], [], []>, precision = #tpu.contract_precision<fp32>} : vector<16x8xf32>, vector<8x64xf32>, vector<16x64xf32> -> vector<16x64xf32>
    %c0_142 = arith.constant 0 : index
    %c0_143 = arith.constant 0 : index
    %305 = vector.load %arg14[%c0_142, %c0_143] : memref<16x1xf32, #tpu.memory_space<vmem>>, vector<16x1xf32>
    %306 = vector.broadcast %305 : vector<16x1xf32> to vector<16x64xf32>
    %307 = arith.addf %304, %306 : vector<16x64xf32>
    %308 = vector.broadcast %3 : vector<1x64xf32> to vector<16x64xf32>
    %309 = arith.mulf %307, %308 : vector<16x64xf32>
    %310 = vector.extract_strided_slice %309 {offsets = [0, 0], sizes = [8, 64], strides = [1, 1]} : vector<16x64xf32> to vector<8x64xf32>
    %311 = vector.extract_strided_slice %309 {offsets = [8, 0], sizes = [8, 64], strides = [1, 1]} : vector<16x64xf32> to vector<8x64xf32>
    %312 = math.exp %311 : vector<8x64xf32>
    %313 = arith.mulf %5, %312 : vector<8x64xf32>
    %314 = vector.broadcast %3 : vector<1x64xf32> to vector<8x64xf32>
    %315 = arith.mulf %313, %314 : vector<8x64xf32>
    %316 = arith.addf %310, %315 : vector<8x64xf32>
    %c0_144 = arith.constant 0 : index
    %c0_145 = arith.constant 0 : index
    %c0_146 = arith.constant 0 : index
    %317 = vector.load %arg15[%c0_144, %c0_145, %c0_146] : memref<1x8x64xf32, #tpu.memory_space<vmem>>, vector<1x8x64xf32>
    %318 = vector.shape_cast %317 : vector<1x8x64xf32> to vector<8x64xf32>
    %319 = vector.shape_cast %316 : vector<8x64xf32> to vector<1x8x64xf32>
    tpu.vector_store %arg15[%c0_144, %c0_145, %c0_146], %319 {strides = array<i32>} : memref<1x8x64xf32, #tpu.memory_space<vmem>>, vector<1x8x64xf32>,
    %320 = vector.shape_cast %311 : vector<8x64xf32> to vector<1x8x64xf32>
    %cst_147 = arith.constant dense<0.000000e+00> : vector<1xf32>
    %321 = vector.multi_reduction <add>, %320, %cst_147 [1, 2] : vector<1x8x64xf32> to vector<1xf32>
    %322 = vector.shape_cast %321 : vector<1xf32> to vector<1x1x1xf32>
    %323 = vector.extract %322[0, 0, 0] : f32 from vector<1x1x1xf32>
    %324 = vector.broadcast %323 : f32 to vector<1x1x1xf32>
    %c0_148 = arith.constant 0 : index
    %c0_149 = arith.constant 0 : index
    %c0_150 = arith.constant 0 : index
    %325 = vector.load %arg16[%c0_148, %c0_149, %c0_150] : memref<1x1x1xf32, #tpu.memory_space<vmem>>, vector<1x1x1xf32>
    tpu.vector_store %arg16[%c0_148, %c0_149, %c0_150], %324 {strides = array<i32>} : memref<1x1x1xf32, #tpu.memory_space<vmem>>, vector<1x1x1xf32>,
    return
  }
  func.func @transform_0(%arg0: i32) -> (i32, i32, i32) {
    %c0_i32 = arith.constant 0 : i32
    %c0_i32_0 = arith.constant 0 : i32
    %c0_i32_1 = arith.constant 0 : i32
    return %arg0, %c0_i32, %c0_i32_0 : i32, i32, i32
  }
  func.func @transform_1(%arg0: i32) -> (i32, i32, i32) {
    %c0_i32 = arith.constant 0 : i32
    %c0_i32_0 = arith.constant 0 : i32
    %c0_i32_1 = arith.constant 0 : i32
    return %arg0, %c0_i32, %c0_i32_0 : i32, i32, i32
  }
  func.func @transform_2(%arg0: i32) -> (i32, i32, i32) {
    %c0_i32 = arith.constant 0 : i32
    %c0_i32_0 = arith.constant 0 : i32
    %c0_i32_1 = arith.constant 0 : i32
    %c0_i32_2 = arith.constant 0 : i32
    return %c0_i32, %c0_i32_0, %c0_i32_1 : i32, i32, i32
  }
  func.func @transform_3(%arg0: i32) -> (i32, i32, i32) {
    %c0_i32 = arith.constant 0 : i32
    %c0_i32_0 = arith.constant 0 : i32
    %c0_i32_1 = arith.constant 0 : i32
    %c0_i32_2 = arith.constant 0 : i32
    return %c0_i32, %c0_i32_0, %c0_i32_1 : i32, i32, i32
  }
  func.func @transform_4(%arg0: i32) -> (i32, i32, i32) {
    %c0_i32 = arith.constant 0 : i32
    %c0_i32_0 = arith.constant 0 : i32
    %c0_i32_1 = arith.constant 0 : i32
    %c0_i32_2 = arith.constant 0 : i32
    return %c0_i32, %c0_i32_0, %c0_i32_1 : i32, i32, i32
  }
  func.func @transform_5(%arg0: i32) -> (i32, i32, i32) {
    %c0_i32 = arith.constant 0 : i32
    %c0_i32_0 = arith.constant 0 : i32
    %c0_i32_1 = arith.constant 0 : i32
    %c0_i32_2 = arith.constant 0 : i32
    return %c0_i32, %c0_i32_0, %c0_i32_1 : i32, i32, i32
  }
  func.func @transform_6(%arg0: i32) -> (i32, i32, i32, i32) {
    %c0_i32 = arith.constant 0 : i32
    %c0_i32_0 = arith.constant 0 : i32
    %c0_i32_1 = arith.constant 0 : i32
    %c0_i32_2 = arith.constant 0 : i32
    %c0_i32_3 = arith.constant 0 : i32
    return %c0_i32, %c0_i32_0, %c0_i32_1, %c0_i32_2 : i32, i32, i32, i32
  }
  func.func @transform_7(%arg0: i32) -> (i32, i32, i32, i32) {
    %c0_i32 = arith.constant 0 : i32
    %c0_i32_0 = arith.constant 0 : i32
    %c0_i32_1 = arith.constant 0 : i32
    %c0_i32_2 = arith.constant 0 : i32
    %c0_i32_3 = arith.constant 0 : i32
    return %c0_i32, %c0_i32_0, %c0_i32_1, %c0_i32_2 : i32, i32, i32, i32
  }
  func.func @transform_8(%arg0: i32) -> (i32, i32, i32) {
    %c0_i32 = arith.constant 0 : i32
    %c0_i32_0 = arith.constant 0 : i32
    %c0_i32_1 = arith.constant 0 : i32
    %c0_i32_2 = arith.constant 0 : i32
    return %c0_i32, %c0_i32_0, %c0_i32_1 : i32, i32, i32
  }
  func.func @transform_9(%arg0: i32) -> (i32, i32, i32) {
    %c0_i32 = arith.constant 0 : i32
    %c0_i32_0 = arith.constant 0 : i32
    %c0_i32_1 = arith.constant 0 : i32
    %c0_i32_2 = arith.constant 0 : i32
    return %c0_i32, %c0_i32_0, %c0_i32_1 : i32, i32, i32
  }
  func.func @transform_10(%arg0: i32) -> (i32, i32, i32) {
    %c0_i32 = arith.constant 0 : i32
    %c0_i32_0 = arith.constant 0 : i32
    %c0_i32_1 = arith.constant 0 : i32
    %c0_i32_2 = arith.constant 0 : i32
    return %c0_i32, %c0_i32_0, %c0_i32_1 : i32, i32, i32
  }
  func.func @transform_11(%arg0: i32) -> (i32, i32, i32) {
    %c0_i32 = arith.constant 0 : i32
    %c0_i32_0 = arith.constant 0 : i32
    %c0_i32_1 = arith.constant 0 : i32
    %c0_i32_2 = arith.constant 0 : i32
    return %c0_i32, %c0_i32_0, %c0_i32_1 : i32, i32, i32
  }
  func.func @transform_12(%arg0: i32) -> (i32, i32) {
    %c0_i32 = arith.constant 0 : i32
    %c0_i32_0 = arith.constant 0 : i32
    %c0_i32_1 = arith.constant 0 : i32
    return %c0_i32, %c0_i32_0 : i32, i32
  }
  func.func @transform_13(%arg0: i32) -> (i32, i32) {
    %c0_i32 = arith.constant 0 : i32
    %c0_i32_0 = arith.constant 0 : i32
    %c0_i32_1 = arith.constant 0 : i32
    return %c0_i32, %c0_i32_0 : i32, i32
  }
  func.func @transform_14(%arg0: i32) -> (i32, i32, i32) {
    %c1_i32 = arith.constant 1 : i32
    %c0_i32 = arith.constant 0 : i32
    %c0_i32_0 = arith.constant 0 : i32
    return %arg0, %c1_i32, %c0_i32 : i32, i32, i32
  }
  func.func @transform_15(%arg0: i32) -> (i32, i32, i32) {
    %c0_i32 = arith.constant 0 : i32
    %c0_i32_0 = arith.constant 0 : i32
    %c0_i32_1 = arith.constant 0 : i32
    return %arg0, %c0_i32, %c0_i32_0 : i32, i32, i32
  }
}

</mosaic_0001>

<bundles_post_ra>
// kernel: tpu_custom_call.1
= control target key start
LH: loop header
LB: loop body
LE: loop exit
PB: predicated region body
PF: predicated region fallthrough
CT: control target
= control target key end

     0   :  { %s6498_s18 = smov 0   ;;  %s7977_s0 = inlined_call_operand.vmem [shape: f32[2,16,64], index: 0, kind: input, shape index: {}, may-alias: {0,14}]   ;;  %s7978_s1 = inlined_call_operand.vmem [shape: f32[2,1,64], index: 1, kind: input, shape index: {}]   ;;  %s7979_s2 = inlined_call_operand.vmem [shape: f32[2,24,8], index: 2, kind: input, shape index: {}]   ;;  %s7980_s3 = inlined_call_operand.vmem [shape: f32[2,24,1], index: 3, kind: input, shape index: {}]   ;;  %s7981_s4 = inlined_call_operand.vmem [shape: f32[2,8,8], index: 4, kind: input, shape index: {}]   ;;  %s7982_s5 = inlined_call_operand.vmem [shape: f32[2,8,1], index: 5, kind: input, shape index: {}]   ;;  %s7983_s6 = inlined_call_operand.vmem [shape: f32[2,2,8,1], index: 6, kind: input, shape index: {}]   ;;  %s7984_s7 = inlined_call_operand.vmem [shape: f32[2,2,8,1], index: 7, kind: input, shape index: {}]   ;;  %s7985_s8 = inlined_call_operand.vmem [shape: f32[2,8,24], index: 8, kind: input, shape index: {}]   ;;  %s7986_s9 = inlined_call_operand.vmem [shape: f32[2,8,1], index: 9, kind: input, shape index: {}]   ;;  %s7987_s10 = inlined_call_operand.vmem [shape: f32[2,8,24], index: 10, kind: input, shape index: {}]   ;;  %s7988_s11 = inlined_call_operand.vmem [shape: f32[2,8,1], index: 11, kind: input, shape index: {}]   ;;  %s7989_s12 = inlined_call_operand.vmem [shape: f32[16,8], index: 12, kind: input, shape index: {}]   ;;  %s7990_s13 = inlined_call_operand.vmem [shape: f32[16,1], index: 13, kind: input, shape index: {}]   ;;  %s7991_s14 = inlined_call_operand.vmem [shape: f32[2,16,64], index: 14, kind: output, shape index: {0}, may-alias: {0,14}]   ;;  %s7992_s15 = inlined_call_operand.vmem [shape: f32[2,1,1], index: 15, kind: output, shape index: {1}]  }
   0x1 LB: > { %s6209_s19 = sadd.s32 4294967295, %s6412_s18   ;;  %p6213_p0 = scmp.ge.s32.totalorder %s6412_s18, 1  ;;  %s6412_s18 = sphi %s6498_s18, %s26_s18  }
   0x2   : > { %p448_p1 = scmp.lt.s32.totalorder %s6412_s18, 3 }
   0x4   : > { %p449_p2 = pnand %p6213_p0, %p448_p1 }
   0x6   : > { %452 = sbr.rel (%p449_p2) target bundleno = 5435 (0x153b), region = 76 }
   0xb   : > { %p503_p3 = scmp.lt.s32.totalorder %s6209_s19, 1  ;;  %v531_v0 = vld [vmem:[%s7979_s2 + $0x10] sm:$0xff]  ;;  %vm550_vm0 = vcmask 64512   ;;  %v529_v1 = vld [vmem:[%s7979_s2] sm:$0xff]  ;;  %v530_v2 = vld [vmem:[%s7979_s2 + $0x8] sm:$0xff]  ;;  %v6414_v6 = vmov 0  }
   0xc   : > { %v558_v3 = vsel %vm550_vm0, %v531_v0, 0  ;;  %v552_v4 = vsel %vm550_vm0, %v529_v1, 0  ;;  %v555_v5 = vsel %vm550_vm0, %v530_v2, 0  ;;  %6259 = vset.pattern.permute.xlu0 %v6414_v6  ;;  %v532_v7 = vld [vmem:[%s7980_s3] sm:$0xff]  ;;  %v533_v19 = vld [vmem:[%s7980_s3 + $0x8] sm:$0xff]  ;;  %vm825_vm1 = vcmask 1043456  }
   0xd   : > { %s8047_s19 = smov (!%p503_p3, %s6209_s19), 1  ;;  %v593_v8 = vand.u32 4294901760, %v558_v3  ;;  %v577_v9 = vand.u32 4294901760, %v552_v4  ;;  %v585_v10 = vand.u32 4294901760, %v555_v5  ;;  %537 = vperm.xlu0 %6259, %v532_v7   ;;  %vm800_vm2 = vcmask 31744   ;;  %s6416_s24 = smov 1  }
   0xe   : > { %s7993_s28 = sshll.u32 %s8047_s19, 4  ;;  %s6529_s16 = scalar_lea.vmem %s7978_s1, %s8047_s19  ;;  %vm1211_vm3 = vcmask 523264  }
   0xf   : > { %v594_v11 = vsub.f32 %v558_v3, %v593_v8  ;;  %v578_v12 = vsub.f32 %v552_v4, %v577_v9  ;;  %s6536_s21 = scalar_lea.vmem %s7977_s0, %s7993_s28  ;;  %v6262_v13 = vld [vmem:[%s6529_s16] ss:$0 sm:$0xff]  ;;  %v586_v17 = vsub.f32 %v555_v5, %v585_v10  ;;  %s7994_s25 = smov 127  }
  0x10   : > { %v520_v14 = vld [vmem:[%s6536_s21] sm:$0xff]  ;;  %s8044_s29 = smov 127   ;;  %s8045_s26 = sshll.u32 %s8047_s19, 4 }
  0x11   : > { %v595_v15 = vand.u32 4294901760, %v594_v11  ;;  %v579_v16 = vand.u32 4294901760, %v578_v12  ;;  %v6540_v18 = vmul.f32 %v6262_v13, %v520_v14  ;;  %v587_v25 = vand.u32 4294901760, %v586_v17  ;;  %s6161_s17 = scalar_lea.vmem %s7991_s14, %s8045_s26 }
  0x13   : > { %v596_v20 = vsub.f32 %v594_v11, %v595_v15  ;;  %v580_v21 = vsub.f32 %v578_v12, %v579_v16  ;;  %v575_v22 = vand.u32 4294901760, %v6540_v18  ;;  %v588_v28 = vsub.f32 %v586_v17, %v587_v25 }
  0x15   : > { %v597_v23 = vand.u32 4294901760, %v596_v20  ;;  %v581_v24 = vand.u32 4294901760, %v580_v21  ;;  %542 = vperm.xlu0 %6259, %v533_v19   ;;  %6242 = vmatpush.msra.mxu2 %v575_v22  ;;  %v618_v26 = vsub.f32 %v6540_v18, %v575_v22  ;;  %v589_v31 = vand.u32 4294901760, %v588_v28 }
  0x16   : > { %576 = vmatpush.msra.mxu0 %v575_v22 }
  0x17   : > { %598 = vmatmul.f32.vlgmr.msra.gmra.mxu2 %v597_v23  ;;  %582 = vmatmul.f32.vlgmr.msra.gmra.mxu0 %v581_v24  ;;  %v619_v27 = vand.u32 4294901760, %v618_v26 }
  0x18   : > { %653 = vmatpush.msrb.mxu2 %v618_v26 }
  0x19   : > { %v620_v29 = vsub.f32 %v618_v26, %v619_v27  ;;  %724 = vmatpush.msrb.mxu0 %v619_v27 }
  0x1b   : > { %v621_v30 = vand.u32 4294901760, %v620_v29 }
  0x1d   : > { %6243 = vmatpush.msra.mxu3 %v621_v30  ;;  %622 = vmatpush.msra.mxu1 %v621_v30 }
  0x1e   : > { %632 = vmatmul.f32.vlgmr.msra.gmra.mxu3 %v593_v8  ;;  %624 = vmatmul.f32.vlgmr.msra.gmra.mxu1 %v577_v9 }
  0x1f   : > { %656 = vmatmul.f32.vlgmr.msrb.gmra.mxu2 %v578_v12  ;;  %686 = vmatpush.msrb.mxu3 %v575_v22 }
  0x20   : > { %590 = vmatmul.f32.gmra.mxu0 %v589_v31  ;;  %754 = vmatpush.msrb.mxu1 %v575_v22 }
  0x26   : > { %690 = vmatmul.f32.vlgmr.msrb.gmra.mxu3 %v579_v16  ;;  %628 = vmatmul.f32.gmra.mxu1 %v585_v10 }
  0x27   : > { %661 = vmatmul.f32.gmra.mxu2 %v586_v17 }
  0x28   : > { %726 = vmatmul.f32.vlgmr.msrb.gmra.mxu0 %v577_v9 }
  0x2e   : > { %696 = vmatmul.f32.gmra.mxu3 %v587_v25  ;;  %756 = vmatmul.f32.vlgmr.msrb.gmra.mxu1 %v577_v9 }
  0x2f   : > { %666 = vmatmul.f32.gmra.mxu2 %v594_v11 }
  0x30   : > { %730 = vmatmul.f32.gmra.mxu0 %v585_v10 }
  0x36   : > { %702 = vmatmul.f32.gmra.mxu3 %v595_v15  ;;  %760 = vmatmul.f32.gmra.mxu1 %v585_v10 }
  0x38   : > { %734 = vmatmul.f32.gmra.mxu0 %v593_v8 }
  0x3e   : > { %764 = vmatmul.f32.gmra.mxu1 %v593_v8 }
  0x7f   : > { %v538_v35 = vpop.permute.xlu0 %537 }
  0x87   : > { %v543_v42 = vpop.permute.xlu0 %542 }
  0x94   : > { %v583_v32 = vpop.f32.mrf.mxu0 }
  0x95   : > { %v584_v38 = vadd.f32 %v583_v32, %v538_v35 }
  0x9a   : > { %v6547_v33 = vpop.f32.mrf.mxu2 }
  0x9b   : > { %v625_v34 = vpop.f32.mrf.mxu1 }
  0x9c   : > { %v626_v41 = vadd.f32 %v625_v34, %v584_v38 }
  0x9d   : > { %v591_v36 = vpop.f32.mrf.mxu0 }
  0x9e   : > { %v592_v46 = vadd.f32 %v591_v36, %v543_v42 }
  0xa1   : > { %v6549_v37 = vpop.f32.mrf.mxu3 }
  0xa2   : > { %v657_v39 = vpop.f32.mrf.mxu2 }
  0xa3   : > { %v629_v40 = vpop.f32.mrf.mxu1  ;;  %v658_v44 = vadd.f32 %v657_v39, %v626_v41 }
  0xa4   : > { %v630_v51 = vadd.f32 %v629_v40, %v592_v46 }
  0xa5   : > { %v727_v43 = vpop.f32.mrf.mxu0 }
  0xa9   : > { %v691_v45 = vpop.f32.mrf.mxu3 }
  0xaa   : > { %v692_v47 = vadd.f32 %v691_v45, %v658_v44  ;;  %v662_v50 = vpop.f32.mrf.mxu2 }
  0xab   : > { %v757_v49 = vpop.f32.mrf.mxu1  ;;  %v663_v53 = vadd.f32 %v662_v50, %v630_v51 }
  0xac   : > { %v728_v48 = vadd.f32 %v727_v43, %v692_v47 }
  0xad   : > { %v731_v55 = vpop.f32.mrf.mxu0 }
  0xae   : > { %v6551_v52 = vadd.f32 %v757_v49, %v728_v48 }
  0xb0   : > { %768 = vxpose.xlu1.b32.start.end [1/1] (short) (narrow) %v6551_v52, 64 }
  0xb1   : > { %v697_v54 = vpop.f32.mrf.mxu3 }
  0xb2   : > { %v698_v56 = vadd.f32 %v697_v54, %v663_v53 }
  0xb3   : > { %v761_v58 = vpop.f32.mrf.mxu1 }
  0xb4   : > { %v732_v57 = vadd.f32 %v731_v55, %v698_v56 }
  0xb6   : > { %v6554_v59 = vadd.f32 %v761_v58, %v732_v57 }
  0xb8   : > { %v827_v60 = vsel %vm825_vm1, %v6554_v59, 0 }
  0xb9   : > { %v844_v61 = vand.u32 4294901760, %v827_v60 }
  0xbb   : > { %v927_v62 = vsub.f32 %v827_v60, %v844_v61  ;;  %845 = vmatpush.msra.mxu2 %v844_v61  ;;  %1040 = vmatpush.msra.mxu1 %v844_v61 }
  0xbd   : > { %982 = vmatpush.msra.mxu0 %v927_v62  ;;  %v928_v63 = vand.u32 4294901760, %v927_v62 }
  0xbf   : > { %1108 = vmatpush.msrb.mxu2 %v928_v63  ;;  %v929_v0 = vsub.f32 %v927_v62, %v928_v63 }
  0xc1   : > { %v930_v1 = vand.u32 4294901760, %v929_v0  ;;  %v6585_v0 = vpop.f32.mrf.mxu3 }
  0xc3   : > { %931 = vmatpush.msra.mxu3 %v930_v1  ;;  %v6587_v1 = vpop.f32.mrf.mxu2 }
  0xc5   : > { %1158 = vmatpush.msrb.mxu3 %v844_v61 }
 0x103   : > { %6260 = vset.pattern.permute.xlu1 %v6414_v6 }
 0x154   : > { %v784_v2 = vpop.trf.xlu1 }
 0x155   : > { %v802_v3 = vsel %vm800_vm2, %v784_v2, 0 }
 0x156   : > { %v6560_v4 = vand.u32 4294901760, %v802_v3 }
 0x158   : > { %v847_v5 = vsub.f32 %v802_v3, %v6560_v4  ;;  %933 = vmatmul.f32.vlgmr.msra.gmra.mxu3 %v6560_v4 }
 0x15a   : > { %v848_v7 = vand.u32 4294901760, %v847_v5  ;;  %985 = vmatmul.f32.vlgmr.msra.gmra.mxu0 %v847_v5 }
 0x15c   : > { %v849_v8 = vsub.f32 %v847_v5, %v848_v7  ;;  %1044 = vmatmul.f32.vlgmr.msra.gmra.mxu1 %v848_v7  ;;  %v785_v9 = vpop.trf.xlu1 }
 0x15d   : > { %v805_v10 = vsel %vm800_vm2, %v785_v9, 0 }
 0x15e   : > { %v850_v11 = vand.u32 4294901760, %v849_v8  ;;  %v6565_v12 = vand.u32 4294901760, %v805_v10 }
 0x160   : > { %v855_v13 = vsub.f32 %v805_v10, %v6565_v12  ;;  %851 = vmatmul.f32.vlgmr.msra.gmra.mxu2 %v850_v11  ;;  %937 = vmatmul.f32.gmra.mxu3 %v6565_v12 }
 0x162   : > { %990 = vmatmul.f32.gmra.mxu0 %v855_v13  ;;  %v856_v14 = vand.u32 4294901760, %v855_v13 }
 0x164   : > { %1050 = vmatmul.f32.gmra.mxu1 %v856_v14  ;;  %v786_v15 = vpop.trf.xlu1  ;;  %v857_v16 = vsub.f32 %v855_v13, %v856_v14  ;;  %v6601_v14 = vpop.f32.mrf.mxu0 }
 0x165   : > { %v808_v17 = vsel %vm800_vm2, %v786_v15, 0  ;;  %v6603_v15 = vpop.f32.mrf.mxu1 }
 0x166   : > { %v6570_v19 = vand.u32 4294901760, %v808_v17  ;;  %v858_v20 = vand.u32 4294901760, %v857_v16 }
 0x168   : > { %v863_v21 = vsub.f32 %v808_v17, %v6570_v19  ;;  %859 = vmatmul.f32.gmra.mxu2 %v858_v20  ;;  %941 = vmatmul.f32.gmra.mxu3 %v6570_v19 }
 0x16a   : > { %995 = vmatmul.f32.gmra.mxu0 %v863_v21  ;;  %v864_v22 = vand.u32 4294901760, %v863_v21 }
 0x16c   : > { %1056 = vmatmul.f32.gmra.mxu1 %v864_v22  ;;  %v787_v23 = vpop.trf.xlu1  ;;  %v865_v24 = vsub.f32 %v863_v21, %v864_v22 }
 0x16d   : > { %v811_v25 = vsel %vm800_vm2, %v787_v23, 0 }
 0x16e   : > { %v870_v26 = vand.u32 4294901760, %v811_v25  ;;  %v866_v27 = vand.u32 4294901760, %v865_v24 }
 0x170   : > { %v871_v28 = vsub.f32 %v811_v25, %v870_v26  ;;  %867 = vmatmul.f32.gmra.mxu2 %v866_v27  ;;  %945 = vmatmul.f32.gmra.mxu3 %v870_v26 }
 0x172   : > { %1000 = vmatmul.f32.gmra.mxu0 %v871_v28  ;;  %v872_v29 = vand.u32 4294901760, %v871_v28 }
 0x174   : > { %1062 = vmatmul.f32.gmra.mxu1 %v872_v29  ;;  %v788_v30 = vpop.trf.xlu1  ;;  %v873_v31 = vsub.f32 %v871_v28, %v872_v29 }
 0x175   : > { %v814_v32 = vsel %vm800_vm2, %v788_v30, 0 }
 0x176   : > { %v878_v34 = vand.u32 4294901760, %v814_v32  ;;  %v874_v35 = vand.u32 4294901760, %v873_v31 }
 0x178   : > { %v879_v36 = vsub.f32 %v814_v32, %v878_v34  ;;  %875 = vmatmul.f32.gmra.mxu2 %v874_v35  ;;  %949 = vmatmul.f32.gmra.mxu3 %v878_v34 }
 0x17a   : > { %1005 = vmatmul.f32.gmra.mxu0 %v879_v36  ;;  %v880_v38 = vand.u32 4294901760, %v879_v36 }
 0x17c   : > { %1068 = vmatmul.f32.gmra.mxu1 %v880_v38  ;;  %v789_v39 = vpop.trf.xlu1  ;;  %v881_v40 = vsub.f32 %v879_v36, %v880_v38 }
 0x17d   : > { %v817_v41 = vsel %vm800_vm2, %v789_v39, 0 }
 0x17e   : > { %v886_v42 = vand.u32 4294901760, %v817_v41  ;;  %v882_v43 = vand.u32 4294901760, %v881_v40 }
 0x180   : > { %v887_v44 = vsub.f32 %v817_v41, %v886_v42  ;;  %883 = vmatmul.f32.gmra.mxu2 %v882_v43  ;;  %953 = vmatmul.f32.gmra.mxu3 %v886_v42  ;;  %v522_v43 = vld [vmem:[%s6529_s16] sm:$0x1] }
 0x182   : > { %1010 = vmatmul.f32.gmra.mxu0 %v887_v44  ;;  %v888_v45 = vand.u32 4294901760, %v887_v44 }
 0x184   : > { %1074 = vmatmul.f32.gmra.mxu1 %v888_v45  ;;  %v790_v46 = vpop.trf.xlu1  ;;  %v889_v47 = vsub.f32 %v887_v44, %v888_v45 }
 0x185   : > { %v820_v48 = vsel %vm800_vm2, %v790_v46, 0  ;;  %v6218_v46 = vadd.f32 -1.0, %v522_v43 }
 0x186   : > { %v894_v49 = vand.u32 4294901760, %v820_v48  ;;  %v890_v50 = vand.u32 4294901760, %v889_v47 }
 0x188   : > { %v895_v51 = vsub.f32 %v820_v48, %v894_v49  ;;  %891 = vmatmul.f32.gmra.mxu2 %v890_v50  ;;  %957 = vmatmul.f32.gmra.mxu3 %v894_v49  ;;  %v524_v50 = vmul.f32 10000.0, %v6218_v46 }
 0x18a   : > { %1015 = vmatmul.f32.gmra.mxu0 %v895_v51  ;;  %v896_v53 = vand.u32 4294901760, %v895_v51 }
 0x18c   : > { %1080 = vmatmul.f32.gmra.mxu1 %v896_v53  ;;  %v791_v54 = vpop.trf.xlu1  ;;  %v897_v55 = vsub.f32 %v895_v51, %v896_v53 }
 0x18d   : > { %v823_v56 = vsel %vm800_vm2, %v791_v54, 0 }
 0x18e   : > { %v902_v57 = vand.u32 4294901760, %v823_v56  ;;  %v898_v58 = vand.u32 4294901760, %v897_v55  ;;  %v6630_v55 = vperm.slane %v524_v50, 0 }
 0x190   : > { %v903_v60 = vsub.f32 %v823_v56, %v902_v57  ;;  %899 = vmatmul.f32.gmra.mxu2 %v898_v58  ;;  %961 = vmatmul.f32.gmra.mxu3 %v902_v57 }
 0x192   : > { %1020 = vmatmul.f32.gmra.mxu0 %v903_v60  ;;  %v904_v61 = vand.u32 4294901760, %v903_v60 }
 0x194   : > { %1086 = vmatmul.f32.gmra.mxu1 %v904_v61  ;;  %v905_v62 = vsub.f32 %v903_v60, %v904_v61 }
 0x196   : > { %v906_v63 = vand.u32 4294901760, %v905_v62 }
 0x198   : > { %907 = vmatmul.f32.gmra.mxu2 %v906_v63  ;;  %1160 = vmatmul.f32.vlgmr.msrb.gmra.mxu3 %v6560_v4 }
 0x1a0   : > { %1110 = vmatmul.f32.vlgmr.msrb.gmra.mxu2 %v6560_v4  ;;  %1164 = vmatmul.f32.gmra.mxu3 %v6565_v12 }
 0x1a8   : > { %1114 = vmatmul.f32.gmra.mxu2 %v6565_v12  ;;  %1168 = vmatmul.f32.gmra.mxu3 %v6570_v19 }
 0x1b0   : > { %1118 = vmatmul.f32.gmra.mxu2 %v6570_v19  ;;  %1172 = vmatmul.f32.gmra.mxu3 %v870_v26 }
 0x1b8   : > { %1122 = vmatmul.f32.gmra.mxu2 %v870_v26  ;;  %1176 = vmatmul.f32.gmra.mxu3 %v878_v34 }
 0x1c0   : > { %1126 = vmatmul.f32.gmra.mxu2 %v878_v34  ;;  %1180 = vmatmul.f32.gmra.mxu3 %v886_v42 }
 0x1c8   : > { %1130 = vmatmul.f32.gmra.mxu2 %v886_v42  ;;  %1184 = vmatmul.f32.gmra.mxu3 %v894_v49 }
 0x1d0   : > { %1134 = vmatmul.f32.gmra.mxu2 %v894_v49  ;;  %1188 = vmatmul.f32.gmra.mxu3 %v902_v57 }
 0x1d7   : > { %v6605_v19 = vpop.f32.mrf.mxu0 }
 0x1d8   : > { %1138 = vmatmul.f32.gmra.mxu2 %v902_v57 }
 0x1d9   : > { %v6607_v20 = vpop.f32.mrf.mxu1 }
 0x1db   : > { %v6589_v2 = vpop.f32.mrf.mxu3 }
 0x1df   : > { %v6609_v23 = vpop.f32.mrf.mxu0 }
 0x1e1   : > { %v6613_v26 = vpop.f32.mrf.mxu1 }
 0x1e3   : > { %v6591_v3 = vpop.f32.mrf.mxu2  ;;  %v6593_v4 = vpop.f32.mrf.mxu3 }
 0x1e7   : > { %v6615_v27 = vpop.f32.mrf.mxu0 }
 0x1e9   : > { %v6621_v30 = vpop.f32.mrf.mxu1 }
 0x1eb   : > { %v6595_v5 = vpop.f32.mrf.mxu2  ;;  %v6597_v7 = vpop.f32.mrf.mxu3 }
 0x1ef   : > { %v1001_v34 = vpop.f32.mrf.mxu0 }
 0x1f1   : > { %v1063_v35 = vpop.f32.mrf.mxu1 }
 0x1f3   : > { %v6599_v8 = vpop.f32.mrf.mxu2  ;;  %v946_v9 = vpop.f32.mrf.mxu3 }
 0x1f7   : > { %v1006_v39 = vpop.f32.mrf.mxu0 }
 0x1f9   : > { %v1069_v41 = vpop.f32.mrf.mxu1 }
 0x1fb   : > { %v876_v10 = vpop.f32.mrf.mxu2  ;;  %v950_v11 = vpop.f32.mrf.mxu3 }
 0x1ff   : > { %v1011_v47 = vpop.f32.mrf.mxu0 }
 0x201   : > { %v1075_v53 = vpop.f32.mrf.mxu1 }
 0x203   : > { %v884_v12 = vpop.f32.mrf.mxu2  ;;  %v954_v13 = vpop.f32.mrf.mxu3 }
 0x204   : > { %v951_v40 = vadd.f32 %v950_v11, %v884_v12 }
 0x206   : > { %v1007_v44 = vadd.f32 %v1006_v39, %v951_v40 }
 0x207   : > { %v1016_v62 = vpop.f32.mrf.mxu0 }
 0x208   : > { %v1070_v48 = vadd.f32 %v1069_v41, %v1007_v44  ;;  %v947_v41 = vadd.f32 %v946_v9, %v876_v10 }
 0x209   : > { %v1081_v40 = vpop.f32.mrf.mxu1 }
 0x20b   : > { %v892_v16 = vpop.f32.mrf.mxu2  ;;  %v958_v17 = vpop.f32.mrf.mxu3 }
 0x20c   : > { %v955_v58 = vadd.f32 %v954_v13, %v892_v16 }
 0x20e   : > { %v1012_v12 = vadd.f32 %v1011_v47, %v955_v58  ;;  %v943_v47 = vadd.f32 %v6597_v7, %v6599_v8  ;;  %v939_v7 = vadd.f32 %v6593_v4, %v6595_v5  ;;  %v935_v4 = vadd.f32 %v6589_v2, %v6591_v3 }
 0x210   : > { %v1076_v44 = vadd.f32 %v1075_v53, %v1012_v12 }
 0x213   : > { %v900_v21 = vpop.f32.mrf.mxu2  ;;  %v962_v22 = vpop.f32.mrf.mxu3 }
 0x214   : > { %v959_v60 = vadd.f32 %v958_v17, %v900_v21  ;;  %v1021_v21 = vpop.f32.mrf.mxu0 }
 0x216   : > { %v1017_v39 = vadd.f32 %v1016_v62, %v959_v60 }
 0x21b   : > { %v908_v24 = vpop.f32.mrf.mxu2  ;;  %v6611_v25 = vpop.f32.mrf.mxu3 }
 0x21c   : > { %v963_v43 = vadd.f32 %v962_v22, %v908_v24 }
 0x223   : > { %v6617_v28 = vpop.f32.mrf.mxu2  ;;  %v6619_v29 = vpop.f32.mrf.mxu3 }
 0x22b   : > { %v6623_v31 = vpop.f32.mrf.mxu2  ;;  %v6625_v32 = vpop.f32.mrf.mxu3 }
 0x233   : > { %v6627_v36 = vpop.f32.mrf.mxu2  ;;  %v1173_v38 = vpop.f32.mrf.mxu3 }
 0x23b   : > { %v1123_v42 = vpop.f32.mrf.mxu2  ;;  %v1177_v45 = vpop.f32.mrf.mxu3 }
 0x243   : > { %v1127_v49 = vpop.f32.mrf.mxu2  ;;  %v1181_v57 = vpop.f32.mrf.mxu3 }
 0x244   : > { %v1128_v51 = vadd.f32 %v1127_v49, %v1070_v48  ;;  %v1002_v48 = vadd.f32 %v1001_v34, %v947_v41  ;;  %v1022_v49 = vadd.f32 %v1021_v21, %v963_v43  ;;  %v997_v34 = vadd.f32 %v6615_v27, %v943_v47 }
 0x245   : > { %v992_v27 = vadd.f32 %v6609_v23, %v939_v7 }
 0x246   : > { %v1178_v54 = vadd.f32 %v1177_v45, %v1128_v51  ;;  %v1082_v45 = vadd.f32 %v1081_v40, %v1017_v39  ;;  %v1064_v58 = vadd.f32 %v1063_v35, %v1002_v48  ;;  %v1058_v8 = vadd.f32 %v6621_v30, %v997_v34 }
 0x247   : > { %v1052_v5 = vadd.f32 %v6613_v26, %v992_v27 }
 0x248   : > { %v1196_v56 = vmul.f32 0.5, %v1178_v54  ;;  %v1124_v22 = vadd.f32 %v1123_v42, %v1064_v58  ;;  %v1120_v42 = vadd.f32 %v6627_v36, %v1058_v8 }
 0x249   : > { %v1116_v30 = vadd.f32 %v6623_v31, %v1052_v5 }
 0x24a   : > { %v6633_v61 = vadd.f32 %v6630_v55, %v1196_v56  ;;  %v1087_v56 = vpop.f32.mrf.mxu1 }
 0x24b   : > { %v1131_v63 = vpop.f32.mrf.mxu2  ;;  %v1185_v46 = vpop.f32.mrf.mxu3  ;;  %v1088_v60 = vadd.f32 %v1087_v56, %v1022_v49 }
 0x24c   : > { %v1224_v11 = vsel %vm1211_vm3, %v6633_v61, -inf  ;;  %v1132_v16 = vadd.f32 %v1131_v63, %v1076_v44 }
 0x24d   : > { %1225 = vmax.xlane.f32.xlu0 %v1224_v11  ;;  %v1174_v11 = vadd.f32 %v1173_v38, %v1124_v22  ;;  %v1170_v38 = vadd.f32 %v6625_v32, %v1120_v42 }
 0x24e   : > { %v1182_v51 = vadd.f32 %v1181_v57, %v1132_v16 }
 0x24f   : > { %v1195_v40 = vmul.f32 0.5, %v1174_v11  ;;  %v1194_v36 = vmul.f32 0.5, %v1170_v38 }
 0x250   : > { %v1197_v24 = vmul.f32 0.5, %v1182_v51 }
 0x251   : > { %v1206_v44 = vadd.f32 %v6630_v55, %v1195_v40  ;;  %v1205_v23 = vadd.f32 %v6630_v55, %v1194_v36 }
 0x252   : > { %v1208_v39 = vadd.f32 %v6630_v55, %v1197_v24 }
 0x253   : > { %v1135_v13 = vpop.f32.mrf.mxu2  ;;  %v1189_v63 = vpop.f32.mrf.mxu3  ;;  %v1218_v2 = vsel %vm1211_vm3, %v1205_v23, -inf }
 0x254   : > { %v1136_v17 = vadd.f32 %v1135_v13, %v1082_v45  ;;  %v1227_v41 = vsel %vm1211_vm3, %v1208_v39, -inf  ;;  %v1221_v45 = vsel %vm1211_vm3, %v1206_v44, -inf  ;;  %v1166_v13 = vadd.f32 %v6619_v29, %v1116_v30 }
 0x256   : > { %v1186_v50 = vadd.f32 %v1185_v46, %v1136_v17  ;;  %v987_v46 = vadd.f32 %v6605_v19, %v935_v4  ;;  %v1193_v17 = vmul.f32 0.5, %v1166_v13  ;;  %v1669_v13 = vrot.slane %v6551_v52, 4 }
 0x258   : > { %v1198_v54 = vmul.f32 0.5, %v1186_v50  ;;  %v1046_v32 = vadd.f32 %v6607_v20, %v987_v46  ;;  %v1204_v26 = vadd.f32 %v6630_v55, %v1193_v17  ;;  %v534_v46 = vld [vmem:[%s7980_s3 + $0x10] sm:$0xff] }
 0x25a   : > { %v1209_v9 = vadd.f32 %v6630_v55, %v1198_v54  ;;  %v1112_v16 = vadd.f32 %v6617_v28, %v1046_v32  ;;  %v1215_v21 = vsel %vm1211_vm3, %v1204_v26, -inf }
 0x25b   : > { %v1139_v10 = vpop.f32.mrf.mxu2 }
 0x25c   : > { %v1140_v53 = vadd.f32 %v1139_v10, %v1088_v60  ;;  %v1230_v62 = vsel %vm1211_vm3, %v1209_v9, -inf  ;;  %v1162_v3 = vadd.f32 %v6611_v25, %v1112_v16 }
 0x25d   : > { %1231 = vmax.xlane.f32.xlu2 %v1230_v62 }
 0x25e   : > { %v1190_v57 = vadd.f32 %v1189_v63, %v1140_v53  ;;  %v1192_v31 = vmul.f32 0.5, %v1162_v3 }
 0x260   : > { %v1199_v12 = vmul.f32 0.5, %v1190_v57  ;;  %v1203_v19 = vadd.f32 %v6630_v55, %v1192_v31 }
 0x262   : > { %v1210_v35 = vadd.f32 %v6630_v55, %v1199_v12  ;;  %v1212_v29 = vsel %vm1211_vm3, %v1203_v19, -inf }
 0x264   : > { %v1233_v43 = vsel %vm1211_vm3, %v1210_v35, -inf }
 0x265   : > { %1228 = vmax.xlane.f32.xlu2 %v1227_v41  ;;  %1234 = vmax.xlane.f32.xlu1 %v1233_v43 }
 0x26d   : > { %1222 = vmax.xlane.f32.xlu2 %v1221_v45 }
 0x275   : > { %1219 = vmax.xlane.f32.xlu2 %v1218_v2 }
 0x27d   : > { %1216 = vmax.xlane.f32.xlu2 %v1215_v21 }
 0x285   : > { %1213 = vmax.xlane.f32.xlu2 %v1212_v29 }
 0x2c0   : > { %v1226_v58 = vpop.xlane.xlu0 %1225 }
 0x2c1   : > { %v1240_v53 = vsub.f32 %v6633_v61, %v1226_v58 }
 0x2c3   : > { %v1252_v63 = vmul.f32 1.442695, %v1240_v53 }
 0x2d0   : > { %v1232_v20 = vpop.xlane.xlu2 %1231 }
 0x2d1   : > { %v1242_v56 = vsub.f32 %v1209_v9, %v1232_v20 }
 0x2d3   : > { %v1256_v25 = vmul.f32 1.442695, %v1242_v56 }
 0x2d8   : > { %v1229_v48 = vpop.xlane.xlu2 %1228  ;;  %v1235_v28 = vpop.xlane.xlu1 %1234 }
 0x2d9   : > { %v1241_v49 = vsub.f32 %v1208_v39, %v1229_v48  ;;  %v1243_v50 = vsub.f32 %v1210_v35, %v1235_v28 }
 0x2db   : > { %v1254_v51 = vmul.f32 1.442695, %v1241_v49  ;;  %v1258_v54 = vmul.f32 1.442695, %v1243_v50 }
 0x2dd   : > { %6263 = vpow2.f32 %v1254_v51 }
 0x2de   : > { %6265 = vpow2.f32 %v1258_v54 }
 0x2df   : > { %6267 = vpow2.f32 %v1256_v25 }
 0x2e0   : > { %v1223_v47 = vpop.xlane.xlu2 %1222 }
 0x2e1   : > { %v1239_v60 = vsub.f32 %v1206_v44, %v1223_v47 }
 0x2e3   : > { %v6669_v10 = vpop.eup %6263  ;;  %v1250_v22 = vmul.f32 1.442695, %v1239_v60 }
 0x2e4   : > { %v6671_v24 = vpop.eup %6265  ;;  %v1275_v62 = vsel %vm1211_vm3, %v6669_v10, 0.0 }
 0x2e5   : > { %6269 = vpow2.f32 %v1250_v22  ;;  %1276 = vadd.xlane.f32.xlu0 %v1275_v62  ;;  %v1281_v9 = vsel %vm1211_vm3, %v6671_v24, 0.0  ;;  %v6678_v57 = vpop.eup %6267 }
 0x2e6   : > { %1282 = vadd.xlane.f32.xlu2 %v1281_v9  ;;  %6271 = vpow2.f32 %v1252_v63  ;;  %v1278_v39 = vsel %vm1211_vm3, %v6678_v57, 0.0 }
 0x2e8   : > { %v1220_v34 = vpop.xlane.xlu2 %1219 }
 0x2e9   : > { %v1238_v12 = vsub.f32 %v1205_v23, %v1220_v34 }
 0x2eb   : > { %v6680_v11 = vpop.eup %6269  ;;  %v1248_v7 = vmul.f32 1.442695, %v1238_v12 }
 0x2ec   : > { %v1269_v61 = vsel %vm1211_vm3, %v6680_v11, 0.0  ;;  %v6686_v42 = vpop.eup %6271 }
 0x2ed   : > { %1270 = vadd.xlane.f32.xlu0 %v1269_v61  ;;  %6273 = vpow2.f32 %v1248_v7  ;;  %v1272_v41 = vsel %vm1211_vm3, %v6686_v42, 0.0 }
 0x2ee   : > { %1279 = vadd.xlane.f32.xlu2 %v1278_v39 }
 0x2f0   : > { %v1217_v8 = vpop.xlane.xlu2 %1216 }
 0x2f1   : > { %v1237_v35 = vsub.f32 %v1204_v26, %v1217_v8 }
 0x2f3   : > { %v1246_v40 = vmul.f32 1.442695, %v1237_v35  ;;  %v6690_v38 = vpop.eup %6273 }
 0x2f4   : > { %v1266_v30 = vsel %vm1211_vm3, %v6690_v38, 0.0 }
 0x2f5   : > { %6275 = vpow2.f32 %v1246_v40 }
 0x2f6   : > { %1273 = vadd.xlane.f32.xlu2 %v1272_v41 }
 0x2f8   : > { %v1214_v43 = vpop.xlane.xlu2 %1213 }
 0x2f9   : > { %v1236_v27 = vsub.f32 %v1203_v19, %v1214_v43 }
 0x2fb   : > { %v6692_v44 = vpop.eup %6275  ;;  %v1244_v4 = vmul.f32 1.442695, %v1236_v27 }
 0x2fc   : > { %v1263_v5 = vsel %vm1211_vm3, %v6692_v44, 0.0 }
 0x2fd   : > { %6277 = vpow2.f32 %v1244_v4  ;;  %1264 = vadd.xlane.f32.xlu0 %v1263_v5 }
 0x2fe   : > { %1267 = vadd.xlane.f32.xlu2 %v1266_v30 }
 0x303   : > { %v6698_v36 = vpop.eup %6277 }
 0x304   : > { %v1260_v45 = vsel %vm1211_vm3, %v6698_v36, 0.0 }
 0x306   : > { %1261 = vadd.xlane.f32.xlu2 %v1260_v45 }
 0x311   : > { %547 = vperm.xlu0 %6259, %v534_v46  }
 0x32f   : > { %1671 = vxpose.xlu2.b32.start.end [1/1] (short) (narrow) %v1669_v13, 64 }
 0x358   : > { %v1277_v23 = vpop.xlane.xlu0 %1276 }
 0x359   : > { %6279 = vrcp.f32 %v1277_v23  ;;  %v1283_v32 = vpop.xlane.xlu2 %1282  ;;  %v1370_v52 = vand.u32 2147483648, %v1277_v23  ;;  %v1368_v48 = vand.u32 2147483647, %v1277_v23  ;;  %vm1364_vm6 = vweird.f32 %v1277_v23 }
 0x35a   : > { %6281 = vrcp.f32 %v1283_v32  ;;  %v1400_v20 = vand.u32 2147483648, %v1283_v32  ;;  %v1398_v49 = vand.u32 2147483647, %v1283_v32  ;;  %vm1394_vm8 = vweird.f32 %v1283_v32 }
 0x35b   : > { %v1371_v47 = vor.u32 1.1754944e-38, %v1370_v52  ;;  %vm1369_vm10 = vcmp.eq.f32.partialorder %v1368_v48, 8.507059e+37 }
 0x35c   : > { %v1401_v58 = vor.u32 1.1754944e-38, %v1400_v20  ;;  %vm1399_vm11 = vcmp.eq.f32.partialorder %v1398_v49, 8.507059e+37 }
 0x35f   : > { %v6280_v16 = vpop.eup %6279 }
 0x360   : > { %v6282_v17 = vpop.eup %6281  ;;  %v1360_v2 = vmul.f32 %v6280_v16, %v1277_v23  ;;  %v6706_v3 = vpop.xlane.xlu0 %1270  ;;  %vm1365_vm4 = vweird.f32 %v6280_v16 }
 0x361   : > { %v1390_v26 = vmul.f32 %v6282_v17, %v1283_v32  ;;  %6283 = vrcp.f32 %v6706_v3  ;;  %v1280_v31 = vpop.xlane.xlu2 %1279  ;;  %vm1395_vm5 = vweird.f32 %v6282_v17  ;;  %vm1366_vm7 = vmor %vm1364_vm6, %vm1365_vm4  ;;  %v1340_v12 = vand.u32 2147483648, %v6706_v3 }
 0x362   : > { %v1361_v21 = vsub.f32 1.0, %v1360_v2  ;;  %6285 = vrcp.f32 %v1280_v31  ;;  %vm1396_vm9 = vmor %vm1394_vm8, %vm1395_vm5  ;;  %v1383_v8 = vand.u32 2147483647, %v1280_v31  ;;  %v1385_v35 = vand.u32 2147483648, %v1280_v31 }
 0x363   : > { %v1391_v19 = vsub.f32 1.0, %v1390_v26  ;;  %vm1334_vm14 = vweird.f32 %v6706_v3  ;;  %v1338_v4 = vand.u32 2147483647, %v6706_v3  ;;  %vm1379_vm4 = vweird.f32 %v1280_v31 }
 0x364   : > { %v1362_v29 = vmul.f32 %v6280_v16, %v1361_v21  ;;  %v1341_v13 = vor.u32 1.1754944e-38, %v1340_v12  ;;  %vm1384_vm6 = vcmp.eq.f32.partialorder %v1383_v8, 8.507059e+37 }
 0x365   : > { %v1392_v28 = vmul.f32 %v6282_v17, %v1391_v19 }
 0x366   : > { %v1363_v50 = vadd.f32 %v6280_v16, %v1362_v29 }
 0x367   : > { %v6284_v51 = vpop.eup %6283  ;;  %v1393_v54 = vadd.f32 %v6282_v17, %v1392_v28 }
 0x368   : > { %v6286_v56 = vpop.eup %6285  ;;  %v1367_v25 = vsel %vm1366_vm7, %v6280_v16, %v1363_v50  ;;  %v1330_v60 = vmul.f32 %v6284_v51, %v6706_v3  ;;  %vm1335_vm12 = vweird.f32 %v6284_v51  ;;  %vm1339_vm7 = vcmp.eq.f32.partialorder %v1338_v4, 8.507059e+37 }
 0x369   : > { %v1397_v22 = vsel %vm1396_vm9, %v6282_v17, %v1393_v54  ;;  %v1375_v53 = vmul.f32 %v6286_v56, %v1280_v31  ;;  %v1274_v62 = vpop.xlane.xlu2 %1273  ;;  %v1372_v9 = vsel %vm1369_vm10, %v1371_v47, %v1367_v25  ;;  %vm1380_vm13 = vweird.f32 %v6286_v56  ;;  %vm6718_vm15 = vmor %vm1334_vm14, %vm1335_vm12 }
 0x36a   : > { %v1402_v63 = vsel %vm1399_vm11, %v1401_v58, %v1397_v22  ;;  %v1331_v34 = vsub.f32 1.0, %v1330_v60  ;;  %6287 = vrcp.f32 %v1274_v62  ;;  %v1373_v43 = vmul.f32 %v6669_v10, %v1372_v9  ;;  %vm1381_vm5 = vmor %vm1379_vm4, %vm1380_vm13 }
 0x36b   : > { %v1376_v61 = vsub.f32 1.0, %v1375_v53  ;;  %v1403_v39 = vmul.f32 %v6671_v24, %v1402_v63  ;;  %v1386_v10 = vor.u32 1.1754944e-38, %v1385_v35  ;;  %v1353_v31 = vand.u32 2147483647, %v1274_v62 }
 0x36c   : > { %v1332_v7 = vmul.f32 %v6284_v51, %v1331_v34  ;;  %v1423_v3 = vsel %vm1211_vm3, %v1373_v43, 0  ;;  %v1355_v29 = vand.u32 2147483648, %v1274_v62  ;;  %vm1349_vm9 = vweird.f32 %v1274_v62 }
 0x36d   : > { %v1377_v40 = vmul.f32 %v6286_v56, %v1376_v61  ;;  %v1429_v41 = vsel %vm1211_vm3, %v1403_v39, 0  ;;  %v6737_v20 = vand.u32 4294901760, %v1423_v3  ;;  %vm1354_vm10 = vcmp.eq.f32.partialorder %v1353_v31, 8.507059e+37 }
 0x36e   : > { %v1333_v27 = vadd.f32 %v6284_v51, %v1332_v7  ;;  %v6716_v5 = vand.u32 4294901760, %v1429_v41  ;;  %v1356_v54 = vor.u32 1.1754944e-38, %v1355_v29 }
 0x36f   : > { %v1378_v24 = vadd.f32 %v6286_v56, %v1377_v40 }
 0x370   : > { %v6288_v45 = vpop.eup %6287  ;;  %v1337_v46 = vsel %vm6718_vm15, %v6284_v51, %v1333_v27  ;;  %1440 = vmatpush.xpose.msrb.mxu0 %v6716_v5  ;;  %v6726_v23 = vsub.f32 %v1429_v41, %v6716_v5  ;;  %1648 = vmatpush.xpose.msra.mxu3 %v6716_v5  ;;  %v6729_v32 = vpop.xlane.xlu0 %1264 }
 0x371   : > { %v1382_v16 = vsel %vm1381_vm5, %v6286_v56, %v1378_v24  ;;  %v1345_v17 = vmul.f32 %v6288_v45, %v1274_v62  ;;  %v6731_v2 = vpop.xlane.xlu2 %1267  ;;  %6289 = vrcp.f32 %v6729_v32  ;;  %v1342_v21 = vsel %vm1339_vm7, %v1341_v13, %v1337_v46 }
 0x372   : > { %v1387_v26 = vsel %vm1384_vm6, %v1386_v10, %v1382_v16  ;;  %6291 = vrcp.f32 %v6731_v2  ;;  %v1474_v52 = vand.u32 4294901760, %v6726_v23  ;;  %vm1350_vm8 = vweird.f32 %v6288_v45 }
 0x373   : > { %v1346_v19 = vsub.f32 1.0, %v1345_v17  ;;  %v1388_v28 = vmul.f32 %v6678_v57, %v1387_v26  ;;  %v1343_v50 = vmul.f32 %v6680_v11, %v1342_v21  ;;  %vm1351_vm11 = vmor %vm1349_vm9, %vm1350_vm8  ;;  %vm1304_vm12 = vweird.f32 %v6729_v32 }
 0x374   : > { %1605 = vmatpush.xpose.msra.mxu2 %v1474_v52  ;;  %v1475_v49 = vsub.f32 %v6726_v23, %v1474_v52  ;;  %v6747_v57 = vsub.f32 %v1423_v3, %v6737_v20  ;;  %v1308_v11 = vand.u32 2147483647, %v6729_v32  ;;  %v1310_v62 = vand.u32 2147483648, %v6729_v32 }
 0x375   : > { %v1347_v48 = vmul.f32 %v6288_v45, %v1346_v19  ;;  %v1426_v56 = vsel %vm1211_vm3, %v1388_v28, 0  ;;  %v1417_v12 = vsel %vm1211_vm3, %v1343_v50, 0  ;;  %vm1319_vm13 = vweird.f32 %v6731_v2 }
 0x376   : > { %v6744_v47 = vand.u32 4294901760, %v1426_v56  ;;  %v1476_v58 = vand.u32 4294901760, %v1475_v49  ;;  %v1323_v39 = vand.u32 2147483647, %v6731_v2  ;;  %v1325_v7 = vand.u32 2147483648, %v6731_v2 }
 0x377   : > { %v1348_v51 = vadd.f32 %v6288_v45, %v1347_v48  ;;  %v6290_v25 = vpop.eup %6289  ;;  %v1486_v41 = vand.u32 4294901760, %v6747_v57  ;;  %vm6767_vm15 = vcmp.eq.f32.partialorder %v1308_v11, 8.507059e+37  ;;  %v6771_v4 = vand.u32 4294901760, %v1417_v12 }
 0x378   : > { %v6292_v60 = vpop.eup %6291  ;;  %v1300_v53 = vmul.f32 %v6290_v25, %v6729_v32  ;;  %1442 = vmatpush.xpose.msrb.mxu0 %v6744_v47  ;;  %1477 = vmatpush.xpose.msrb.mxu1 %v1476_v58  ;;  %v6763_v35 = vsub.f32 %v1426_v56, %v6744_v47  ;;  %vm1305_vm14 = vweird.f32 %v6290_v25  ;;  %vm6776_vm5 = vcmp.eq.f32.partialorder %v1323_v39, 8.507059e+37 }
 0x379   : > { %v1352_v22 = vsel %vm1351_vm11, %v6288_v45, %v1348_v51  ;;  %v6752_v9 = vpop.xlane.xlu2 %1261  ;;  %v1315_v34 = vmul.f32 %v6292_v60, %v6731_v2  ;;  %1650 = vmatpush.xpose.msra.mxu3 %v6744_v47  ;;  %vm1320_vm4 = vweird.f32 %v6292_v60  ;;  %vm1306_vm6 = vmor %vm1304_vm12, %vm1305_vm14  ;;  %v1326_v3 = vor.u32 1.1754944e-38, %v1325_v7 }
 0x37a   : > { %v1357_v63 = vsel %vm1354_vm10, %v1356_v54, %v1352_v22  ;;  %6293 = vrcp.f32 %v6752_v9  ;;  %v1301_v61 = vsub.f32 1.0, %v1300_v53  ;;  %v1480_v24 = vand.u32 4294901760, %v6763_v35  ;;  %vm1321_vm7 = vmor %vm1319_vm13, %vm1320_vm4 }
 0x37b   : > { %v1316_v8 = vsub.f32 1.0, %v1315_v34  ;;  %v1358_v40 = vmul.f32 %v6686_v42, %v1357_v63  ;;  %v1311_v42 = vor.u32 1.1754944e-38, %v1310_v62  ;;  %v1487_v31 = vsub.f32 %v6747_v57, %v1486_v41 }
 0x37c   : > { %v1302_v43 = vmul.f32 %v6290_v25, %v1301_v61  ;;  %1444 = vmatpush.xpose.msrb.mxu0 %v6737_v20  ;;  %1609 = vmatpush.xpose.msra.mxu2 %v1480_v24  ;;  %v1481_v26 = vsub.f32 %v6763_v35, %v1480_v24  ;;  %v1293_v29 = vand.u32 2147483647, %v6752_v9  ;;  %v6799_v49 = vsub.f32 %v1417_v12, %v6771_v4 }
 0x37d   : > { %v1317_v30 = vmul.f32 %v6292_v60, %v1316_v8  ;;  %v1420_v45 = vsel %vm1211_vm3, %v1358_v40, 0  ;;  %1652 = vmatpush.xpose.msra.mxu3 %v6737_v20  ;;  %vm1289_vm9 = vweird.f32 %v6752_v9 }
 0x37e   : > { %v1303_v46 = vadd.f32 %v6290_v25, %v1302_v43  ;;  %v6781_v10 = vand.u32 4294901760, %v1420_v45  ;;  %v1482_v28 = vand.u32 4294901760, %v1481_v26  ;;  %v1498_v34 = vand.u32 4294901760, %v6799_v49 }
 0x37f   : > { %v1318_v17 = vadd.f32 %v6292_v60, %v1317_v30  ;;  %vm1294_vm11 = vcmp.eq.f32.partialorder %v1293_v29, 8.507059e+37  ;;  %v1703_v30 = vrot.slane %v6554_v59, 4 }
 0x380   : > { %v6294_v16 = vpop.eup %6293  ;;  %v1307_v21 = vsel %vm1306_vm6, %v6290_v25, %v1303_v46  ;;  %v6793_v52 = vsub.f32 %v1420_v45, %v6781_v10  ;;  %1446 = vmatpush.xpose.msrb.mxu0 %v6781_v10  ;;  %v1295_v25 = vand.u32 2147483648, %v6752_v9  ;;  %1483 = vmatpush.xpose.msrb.mxu1 %v1482_v28 }
 0x381   : > { %v1285_v19 = vmul.f32 %v6294_v16, %v6752_v9  ;;  %v1312_v32 = vsel %vm6767_vm15, %v1311_v42, %v1307_v21  ;;  %v1322_v48 = vsel %vm1321_vm7, %v6292_v60, %v1318_v17  ;;  %1654 = vmatpush.xpose.msra.mxu3 %v6781_v10  ;;  %1613 = vmatpush.xpose.msra.mxu2 %v1486_v41  ;;  %v1488_v60 = vand.u32 4294901760, %v1487_v31 }
 0x382   : > { %v1327_v2 = vsel %vm6776_vm5, %v1326_v3, %v1322_v48  ;;  %v1492_v54 = vand.u32 4294901760, %v6793_v52  ;;  %v1313_v56 = vmul.f32 %v6692_v44, %v1312_v32  ;;  %vm1290_vm8 = vweird.f32 %v6294_v16 }
 0x383   : > { %v1286_v50 = vsub.f32 1.0, %v1285_v19  ;;  %v548_v51 = vpop.permute.xlu0 %547  ;;  %v1328_v22 = vmul.f32 %v6690_v38, %v1327_v2  ;;  %vm1291_vm10 = vmor %vm1289_vm9, %vm1290_vm8  ;;  %v1296_v61 = vor.u32 1.1754944e-38, %v1295_v25  ;;  %v1499_v9 = vsub.f32 %v6799_v49, %v1498_v34 }
 0x384   : > { %v600_v58 = vadd.f32 %v6547_v33, %v548_v51  ;;  %v1493_v11 = vsub.f32 %v6793_v52, %v1492_v54  ;;  %v1411_v62 = vsel %vm1211_vm3, %v1313_v56, 0  ;;  %1448 = vmatpush.xpose.msrb.mxu0 %v6771_v4  ;;  %1489 = vmatpush.xpose.msrb.mxu1 %v1488_v60 }
 0x385   : > { %v1287_v53 = vmul.f32 %v6294_v16, %v1286_v50  ;;  %v1414_v44 = vsel %vm1211_vm3, %v1328_v22, 0  ;;  %v6815_v12 = vand.u32 4294901760, %v1411_v62  ;;  %1656 = vmatpush.xpose.msra.mxu3 %v6771_v4  ;;  %1617 = vmatpush.xpose.msra.mxu2 %v1492_v54  ;;  %v1500_v46 = vand.u32 4294901760, %v1499_v9 }
 0x386   : > { %v634_v63 = vadd.f32 %v6549_v37, %v600_v58  ;;  %v6819_v38 = vand.u32 4294901760, %v1414_v44  ;;  %v1494_v37 = vand.u32 4294901760, %v1493_v11 }
 0x387   : > { %v1288_v33 = vadd.f32 %v6294_v16, %v1287_v53  ;;  %v1509_v43 = vsub.f32 %v1411_v62, %v6815_v12 }
 0x388   : > { %v668_v39 = vadd.f32 %v6587_v1, %v634_v63  ;;  %v1503_v8 = vsub.f32 %v1414_v44, %v6819_v38  ;;  %1450 = vmatpush.xpose.msrb.mxu0 %v6819_v38  ;;  %1495 = vmatpush.xpose.msrb.mxu1 %v1494_v37 }
 0x389   : > { %v1292_v7 = vsel %vm1291_vm10, %v6294_v16, %v1288_v33  ;;  %1658 = vmatpush.xpose.msra.mxu3 %v6819_v38  ;;  %1621 = vmatpush.xpose.msra.mxu2 %v1498_v34  ;;  %v1510_v13 = vand.u32 4294901760, %v1509_v43 }
 0x38a   : > { %v1297_v40 = vsel %vm1294_vm11, %v1296_v61, %v1292_v7  ;;  %v704_v41 = vadd.f32 %v6585_v0, %v668_v39  ;;  %v1504_v27 = vand.u32 4294901760, %v1503_v8 }
 0x38b   : > { %v1298_v1 = vmul.f32 %v6698_v36, %v1297_v40  ;;  %v1728_v36 = vsel %vm825_vm1, %v1703_v30, 0  ;;  %v1511_v26 = vsub.f32 %v1509_v43, %v1510_v13 }
 0x38c   : > { %v736_v24 = vadd.f32 %v6601_v14, %v704_v41  ;;  %v1505_v0 = vsub.f32 %v1503_v8, %v1504_v27  ;;  %1452 = vmatpush.xpose.msrb.mxu0 %v6815_v12  ;;  %1501 = vmatpush.xpose.msrb.mxu1 %v1500_v46  ;;  %v1745_v21 = vand.u32 4294901760, %v1728_v36 }
 0x38d   : > { %v1408_v45 = vsel %vm1211_vm3, %v1298_v1, 0  ;;  %1660 = vmatpush.xpose.msra.mxu3 %v6815_v12  ;;  %1625 = vmatpush.xpose.msra.mxu2 %v1504_v27  ;;  %v1512_v32 = vand.u32 4294901760, %v1511_v26 }
 0x38e   : > { %v1453_v42 = vand.u32 4294901760, %v1408_v45  ;;  %v6834_v16 = vadd.f32 %v6603_v15, %v736_v24  ;;  %v1506_v59 = vand.u32 4294901760, %v1505_v0  ;;  %v1828_v48 = vsub.f32 %v1728_v36, %v1745_v21 }
 0x390   : > { %v1515_v14 = vsub.f32 %v1408_v45, %v1453_v42  ;;  %v1405_v17 = vsel %vm1211_vm3, %v6834_v16, 0  ;;  %1454 = vmatpush.xpose.msrb.mxu0 %v1453_v42  ;;  %1507 = vmatpush.xpose.msrb.mxu1 %v1506_v59 }
 0x391   : > { %v1455_v3 = vand.u32 4294901760, %v1405_v17  ;;  %6261 = vset.pattern.permute.xlu2 %v6414_v6  ;;  %1662 = vmatpush.xpose.msra.mxu3 %v1453_v42 }
 0x392   : > { %v1516_v31 = vand.u32 4294901760, %v1515_v14  ;;  %1629 = vmatpush.xpose.msra.mxu2 %v1510_v13 }
 0x393   : > { %v1456_v15 = vsub.f32 %v1405_v17, %v1455_v3 }
 0x394   : > { %1535 = vmatpush.xpose.msra.mxu0 %v6726_v23  ;;  %v1517_v19 = vsub.f32 %v1515_v14, %v1516_v31  ;;  %1664 = vmatmul.f32.vlgmr.msra.gmra.mxu3 %v1455_v3  ;;  %v1829_v23 = vand.u32 4294901760, %v1828_v48 }
 0x395   : > { %1941 = vmatpush.msrb.mxu3 %v1745_v21  ;;  %v1457_v29 = vand.u32 4294901760, %v1456_v15  ;;  %1513 = vmatpush.xpose.msrb.mxu1 %v1512_v32 }
 0x396   : > { %1633 = vmatpush.xpose.msra.mxu2 %v1516_v31  ;;  %v1518_v6 = vand.u32 4294901760, %v1517_v19 }
 0x397   : > { %v1458_v28 = vsub.f32 %v1456_v15, %v1457_v29 }
 0x398   : > { %1538 = vmatpush.xpose.msra.mxu0 %v6763_v35 }
 0x399   : > { %v1459_v2 = vand.u32 4294901760, %v1458_v28  ;;  %1635 = vmatmul.f32.vlgmr.msra.gmra.mxu2 %v1455_v3  ;;  %1519 = vmatpush.xpose.msrb.mxu1 %v1518_v6 }
 0x39a   : > { %1883 = vmatpush.msrb.mxu2 %v1828_v48 }
 0x39b   : > { %1460 = vmatmul.f32.vlgmr.msrb.gmra.mxu0 %v1459_v2 }
 0x39c   : > { %1541 = vmatpush.xpose.msra.mxu0 %v6747_v57  ;;  %1521 = vmatmul.f32.vlgmr.msrb.gmra.mxu1 %v1455_v3 }
 0x39d   : > { %1572 = vmatpush.xpose.msra.mxu1 %v6716_v5  ;;  %v1830_v5 = vsub.f32 %v1828_v48, %v1829_v23 }
 0x3a0   : > { %1544 = vmatpush.xpose.msra.mxu0 %v6793_v52 }
 0x3a1   : > { %1574 = vmatpush.xpose.msra.mxu1 %v6744_v47  ;;  %v1831_v47 = vand.u32 4294901760, %v1830_v5 }
 0x3a4   : > { %1547 = vmatpush.xpose.msra.mxu0 %v6799_v49 }
 0x3a5   : > { %1576 = vmatpush.xpose.msra.mxu1 %v6737_v20 }
 0x3a8   : > { %1550 = vmatpush.xpose.msra.mxu0 %v1503_v8 }
 0x3a9   : > { %1578 = vmatpush.xpose.msra.mxu1 %v6781_v10 }
 0x3ac   : > { %1553 = vmatpush.xpose.msra.mxu0 %v1509_v43 }
 0x3ad   : > { %1580 = vmatpush.xpose.msra.mxu1 %v6771_v4 }
 0x3b0   : > { %1556 = vmatpush.xpose.msra.mxu0 %v1515_v14 }
 0x3b1   : > { %1582 = vmatpush.xpose.msra.mxu1 %v6819_v38 }
 0x3b3   : > { %1559 = vmatmul.f32.vlgmr.msra.gmra.mxu0 %v1456_v15 }
 0x3b4   : > { %1746 = vmatpush.msrb.mxu0 %v1745_v21 }
 0x3b5   : > { %1584 = vmatpush.xpose.msra.mxu1 %v6815_v12 }
 0x3b6   : > { %2009 = vmatpush.msra.mxu0 %v1829_v23 }
 0x3b9   : > { %1586 = vmatpush.xpose.msra.mxu1 %v1453_v42 }
 0x3bc   : > { %1590 = vmatmul.f32.vlgmr.msra.gmra.mxu1 %v1457_v29 }
 0x3bd   : > { %1832 = vmatpush.msrb.mxu1 %v1831_v47 }
 0x3bf   : > { %2059 = vmatpush.msra.mxu1 %v1745_v21 }
 0x3c8   : > { %v1687_v20 = vpop.trf.xlu2 }
 0x3c9   : > { %v1705_v57 = vsel %vm800_vm2, %v1687_v20, 0 }
 0x3ca   : > { %v6854_v35 = vand.u32 4294901760, %v1705_v57 }
 0x3cc   : > { %v1748_v4 = vsub.f32 %v1705_v57, %v6854_v35  ;;  %1834 = vmatmul.f32.vlgmr.msrb.gmra.mxu1 %v6854_v35 }
 0x3ce   : > { %v1749_v10 = vand.u32 4294901760, %v1748_v4  ;;  %1886 = vmatmul.f32.vlgmr.msrb.gmra.mxu2 %v1748_v4 }
 0x3d0   : > { %v1750_v52 = vsub.f32 %v1748_v4, %v1749_v10  ;;  %1945 = vmatmul.f32.vlgmr.msrb.gmra.mxu3 %v1749_v10  ;;  %v1688_v49 = vpop.trf.xlu2 }
 0x3d1   : > { %v1708_v50 = vsel %vm800_vm2, %v1688_v49, 0 }
 0x3d2   : > { %v1751_v51 = vand.u32 4294901760, %v1750_v52  ;;  %v6859_v54 = vand.u32 4294901760, %v1708_v50 }
 0x3d4   : > { %v1756_v56 = vsub.f32 %v1708_v50, %v6859_v54  ;;  %1752 = vmatmul.f32.vlgmr.msrb.gmra.mxu0 %v1751_v51  ;;  %1838 = vmatmul.f32.gmra.mxu1 %v6859_v54 }
 0x3d6   : > { %1891 = vmatmul.f32.gmra.mxu2 %v1756_v56  ;;  %v1757_v25 = vand.u32 4294901760, %v1756_v56 }
 0x3d8   : > { %1951 = vmatmul.f32.gmra.mxu3 %v1757_v25  ;;  %v1689_v58 = vpop.trf.xlu2  ;;  %v1758_v60 = vsub.f32 %v1756_v56, %v1757_v25 }
 0x3d9   : > { %v1711_v22 = vsel %vm800_vm2, %v1689_v58, 0 }
 0x3da   : > { %v6864_v53 = vand.u32 4294901760, %v1711_v22  ;;  %v1759_v11 = vand.u32 4294901760, %v1758_v60 }
 0x3dc   : > { %v1764_v62 = vsub.f32 %v1711_v22, %v6864_v53  ;;  %1760 = vmatmul.f32.gmra.mxu0 %v1759_v11  ;;  %1842 = vmatmul.f32.gmra.mxu1 %v6864_v53 }
 0x3de   : > { %1896 = vmatmul.f32.gmra.mxu2 %v1764_v62  ;;  %v1765_v63 = vand.u32 4294901760, %v1764_v62 }
 0x3e0   : > { %1957 = vmatmul.f32.gmra.mxu3 %v1765_v63  ;;  %v1690_v44 = vpop.trf.xlu2  ;;  %v1766_v34 = vsub.f32 %v1764_v62, %v1765_v63 }
 0x3e1   : > { %v1714_v12 = vsel %vm800_vm2, %v1690_v44, 0 }
 0x3e2   : > { %v1771_v33 = vand.u32 4294901760, %v1714_v12  ;;  %v1767_v38 = vand.u32 4294901760, %v1766_v34 }
 0x3e4   : > { %v1772_v61 = vsub.f32 %v1714_v12, %v1771_v33  ;;  %1768 = vmatmul.f32.gmra.mxu0 %v1767_v38  ;;  %1846 = vmatmul.f32.gmra.mxu1 %v1771_v33 }
 0x3e6   : > { %1901 = vmatmul.f32.gmra.mxu2 %v1772_v61  ;;  %v1773_v39 = vand.u32 4294901760, %v1772_v61 }
 0x3e8   : > { %1963 = vmatmul.f32.gmra.mxu3 %v1773_v39  ;;  %v1691_v37 = vpop.trf.xlu2  ;;  %v1774_v7 = vsub.f32 %v1772_v61, %v1773_v39 }
 0x3e9   : > { %v1717_v8 = vsel %vm800_vm2, %v1691_v37, 0 }
 0x3ea   : > { %v1779_v40 = vand.u32 4294901760, %v1717_v8  ;;  %v1775_v41 = vand.u32 4294901760, %v1774_v7 }
 0x3ec   : > { %v1780_v9 = vsub.f32 %v1717_v8, %v1779_v40  ;;  %1776 = vmatmul.f32.gmra.mxu0 %v1775_v41  ;;  %1850 = vmatmul.f32.gmra.mxu1 %v1779_v40 }
 0x3ee   : > { %1906 = vmatmul.f32.gmra.mxu2 %v1780_v9  ;;  %v1781_v43 = vand.u32 4294901760, %v1780_v9 }
 0x3f0   : > { %1969 = vmatmul.f32.gmra.mxu3 %v1781_v43  ;;  %v1692_v27 = vpop.trf.xlu2  ;;  %v1782_v1 = vsub.f32 %v1780_v9, %v1781_v43 }
 0x3f1   : > { %v1720_v30 = vsel %vm800_vm2, %v1692_v27, 0 }
 0x3f2   : > { %v1787_v24 = vand.u32 4294901760, %v1720_v30  ;;  %v1783_v45 = vand.u32 4294901760, %v1782_v1 }
 0x3f4   : > { %v1788_v0 = vsub.f32 %v1720_v30, %v1787_v24  ;;  %1784 = vmatmul.f32.gmra.mxu0 %v1783_v45  ;;  %1854 = vmatmul.f32.gmra.mxu1 %v1787_v24 }
 0x3f6   : > { %1911 = vmatmul.f32.gmra.mxu2 %v1788_v0  ;;  %v1789_v46 = vand.u32 4294901760, %v1788_v0 }
 0x3f8   : > { %1975 = vmatmul.f32.gmra.mxu3 %v1789_v46  ;;  %v1693_v42 = vpop.trf.xlu2  ;;  %v1790_v13 = vsub.f32 %v1788_v0, %v1789_v46 }
 0x3f9   : > { %v1723_v36 = vsel %vm800_vm2, %v1693_v42, 0 }
 0x3fa   : > { %v1795_v59 = vand.u32 4294901760, %v1723_v36  ;;  %v1791_v14 = vand.u32 4294901760, %v1790_v13 }
 0x3fc   : > { %v1796_v17 = vsub.f32 %v1723_v36, %v1795_v59  ;;  %1792 = vmatmul.f32.gmra.mxu0 %v1791_v14  ;;  %1858 = vmatmul.f32.gmra.mxu1 %v1795_v59 }
 0x3fe   : > { %1916 = vmatmul.f32.gmra.mxu2 %v1796_v17  ;;  %v1797_v3 = vand.u32 4294901760, %v1796_v17 }
 0x400   : > { %1981 = vmatmul.f32.gmra.mxu3 %v1797_v3  ;;  %v1694_v26 = vpop.trf.xlu2  ;;  %v1798_v31 = vsub.f32 %v1796_v17, %v1797_v3 }
 0x401   : > { %v1726_v21 = vsel %vm800_vm2, %v1694_v26, 0 }
 0x402   : > { %v1803_v15 = vand.u32 4294901760, %v1726_v21  ;;  %v1799_v19 = vand.u32 4294901760, %v1798_v31 }
 0x404   : > { %v1804_v29 = vsub.f32 %v1726_v21, %v1803_v15  ;;  %1800 = vmatmul.f32.gmra.mxu0 %v1799_v19  ;;  %1862 = vmatmul.f32.gmra.mxu1 %v1803_v15 }
 0x406   : > { %1921 = vmatmul.f32.gmra.mxu2 %v1804_v29  ;;  %v1805_v32 = vand.u32 4294901760, %v1804_v29 }
 0x408   : > { %1987 = vmatmul.f32.gmra.mxu3 %v1805_v32  ;;  %v1806_v48 = vsub.f32 %v1804_v29, %v1805_v32 }
 0x40a   : > { %v1807_v28 = vand.u32 4294901760, %v1806_v48 }
 0x40c   : > { %1808 = vmatmul.f32.gmra.mxu0 %v1807_v28  ;;  %2061 = vmatmul.f32.vlgmr.msra.gmra.mxu1 %v6854_v35 }
 0x414   : > { %2011 = vmatmul.f32.vlgmr.msra.gmra.mxu0 %v6854_v35  ;;  %2065 = vmatmul.f32.gmra.mxu1 %v6859_v54 }
 0x417   : > { %v6897_v25 = vpop.f32.mrf.mxu3 }
 0x418   : > { %v6881_v2 = vpop.f32.mrf.mxu0 }
 0x419   : > { %v6879_v6 = vpop.f32.mrf.mxu1 }
 0x41c   : > { %2015 = vmatmul.f32.gmra.mxu0 %v6859_v54  ;;  %2069 = vmatmul.f32.gmra.mxu1 %v6864_v53  ;;  %v6895_v56 = vpop.f32.mrf.mxu2 }
 0x424   : > { %2019 = vmatmul.f32.gmra.mxu0 %v6864_v53  ;;  %2073 = vmatmul.f32.gmra.mxu1 %v1771_v33 }
 0x42c   : > { %2023 = vmatmul.f32.gmra.mxu0 %v1771_v33  ;;  %2077 = vmatmul.f32.gmra.mxu1 %v1779_v40 }
 0x430   : > { %v6885_v5 = vpop.f32.mrf.mxu0 }
 0x434   : > { %2027 = vmatmul.f32.gmra.mxu0 %v1779_v40  ;;  %2081 = vmatmul.f32.gmra.mxu1 %v1787_v24 }
 0x439   : > { %v6883_v23 = vpop.f32.mrf.mxu1 }
 0x43c   : > { %2031 = vmatmul.f32.gmra.mxu0 %v1787_v24  ;;  %2085 = vmatmul.f32.gmra.mxu1 %v1795_v59 }
 0x444   : > { %2035 = vmatmul.f32.gmra.mxu0 %v1795_v59  ;;  %2089 = vmatmul.f32.gmra.mxu1 %v1803_v15 }
 0x449   : > { %v1835_v47 = vpop.f32.mrf.mxu1 }
 0x44c   : > { %2039 = vmatmul.f32.gmra.mxu0 %v1803_v15 }
 0x451   : > { %v1753_v20 = vpop.f32.mrf.mxu0  ;;  %v6887_v57 = vpop.f32.mrf.mxu1 }
 0x452   : > { %v1887_v22 = vpop.f32.mrf.mxu2  ;;  %v1836_v37 = vadd.f32 %v1835_v47, %v1753_v20 }
 0x453   : > { %v1946_v53 = vpop.f32.mrf.mxu3 }
 0x454   : > { %v1888_v9 = vadd.f32 %v1887_v22, %v1836_v37 }
 0x456   : > { %v1947_v1 = vadd.f32 %v1946_v53, %v1888_v9 }
 0x459   : > { %v6889_v35 = vpop.f32.mrf.mxu0  ;;  %v1843_v4 = vpop.f32.mrf.mxu1 }
 0x45a   : > { %v6899_v63 = vpop.f32.mrf.mxu2 }
 0x45b   : > { %v6901_v12 = vpop.f32.mrf.mxu3 }
 0x461   : > { %v1769_v10 = vpop.f32.mrf.mxu0  ;;  %v6891_v52 = vpop.f32.mrf.mxu1 }
 0x462   : > { %v1897_v33 = vpop.f32.mrf.mxu2  ;;  %v1844_v7 = vadd.f32 %v1843_v4, %v1769_v10 }
 0x463   : > { %v1958_v39 = vpop.f32.mrf.mxu3 }
 0x464   : > { %v1898_v43 = vadd.f32 %v1897_v33, %v1844_v7 }
 0x466   : > { %v1959_v30 = vadd.f32 %v1958_v39, %v1898_v43 }
 0x469   : > { %v6893_v49 = vpop.f32.mrf.mxu0  ;;  %v1851_v50 = vpop.f32.mrf.mxu1 }
 0x46a   : > { %v6907_v41 = vpop.f32.mrf.mxu2 }
 0x46b   : > { %v6909_v27 = vpop.f32.mrf.mxu3 }
 0x471   : > { %v1785_v51 = vpop.f32.mrf.mxu0  ;;  %v1855_v54 = vpop.f32.mrf.mxu1 }
 0x472   : > { %v1907_v13 = vpop.f32.mrf.mxu2  ;;  %v1852_v7 = vadd.f32 %v1851_v50, %v1785_v51  ;;  %v1848_v50 = vadd.f32 %v6891_v52, %v6893_v49 }
 0x473   : > { %v1970_v17 = vpop.f32.mrf.mxu3 }
 0x479   : > { %v1793_v58 = vpop.f32.mrf.mxu0  ;;  %v1859_v60 = vpop.f32.mrf.mxu1 }
 0x47a   : > { %v1912_v19 = vpop.f32.mrf.mxu2  ;;  %v1856_v29 = vadd.f32 %v1855_v54, %v1793_v58 }
 0x47b   : > { %v1976_v28 = vpop.f32.mrf.mxu3 }
 0x47c   : > { %v1913_v47 = vadd.f32 %v1912_v19, %v1856_v29 }
 0x47e   : > { %v1977_v4 = vadd.f32 %v1976_v28, %v1913_v47  ;;  %v1840_v47 = vadd.f32 %v6887_v57, %v6889_v35 }
 0x481   : > { %v1801_v11 = vpop.f32.mrf.mxu0  ;;  %v1863_v62 = vpop.f32.mrf.mxu1 }
 0x482   : > { %v1860_v10 = vadd.f32 %v1859_v60, %v1801_v11  ;;  %v1917_v22 = vpop.f32.mrf.mxu2  ;;  %v1908_v11 = vadd.f32 %v1907_v13, %v1852_v7  ;;  %v1903_v13 = vadd.f32 %v6907_v41, %v1848_v50 }
 0x483   : > { %v1982_v39 = vpop.f32.mrf.mxu3 }
 0x484   : > { %v1918_v33 = vadd.f32 %v1917_v22, %v1860_v10  ;;  %v1971_v51 = vadd.f32 %v1970_v17, %v1908_v11  ;;  %v1965_v52 = vadd.f32 %v6909_v27, %v1903_v13 }
 0x489   : > { %v1809_v44 = vpop.f32.mrf.mxu0  ;;  %v2062_v34 = vpop.f32.mrf.mxu1 }
 0x48a   : > { %v1864_v54 = vadd.f32 %v1863_v62, %v1809_v44  ;;  %v1922_v60 = vpop.f32.mrf.mxu2 }
 0x491   : > { %v2012_v38 = vpop.f32.mrf.mxu0  ;;  %v6903_v61 = vpop.f32.mrf.mxu1 }
 0x492   : > { %v2013_v45 = vadd.f32 %v2012_v38, %v1947_v1 }
 0x494   : > { %v2063_v36 = vadd.f32 %v2062_v34, %v2013_v45 }
 0x496   : > { %v2093_v26 = vmul.f32 0.5, %v2063_v36 }
 0x498   : > { %v6919_v15 = vadd.f32 %v2093_v26, %v6630_v55 }
 0x499   : > { %v6905_v8 = vpop.f32.mrf.mxu0  ;;  %v2070_v40 = vpop.f32.mrf.mxu1 }
 0x49a   : > { %v2109_v48 = vsel %vm1211_vm3, %v6919_v15, -inf }
 0x4a1   : > { %v2020_v24 = vpop.f32.mrf.mxu0  ;;  %v6911_v46 = vpop.f32.mrf.mxu1 }
 0x4a2   : > { %v2021_v0 = vadd.f32 %v2020_v24, %v1959_v30  ;;  %v1923_v24 = vadd.f32 %v1922_v60, %v1864_v54 }
 0x4a4   : > { %v2071_v42 = vadd.f32 %v2070_v40, %v2021_v0  ;;  %v1983_v40 = vadd.f32 %v1982_v39, %v1918_v33 }
 0x4a6   : > { %v2095_v59 = vmul.f32 0.5, %v2071_v42  ;;  %v1988_v42 = vpop.f32.mrf.mxu3 }
 0x4a7   : > { %v1989_v62 = vadd.f32 %v1988_v42, %v1923_v24 }
 0x4a8   : > { %v6914_v14 = vadd.f32 %v2095_v59, %v6630_v55 }
 0x4a9   : > { %v2024_v3 = vpop.f32.mrf.mxu0  ;;  %v2078_v21 = vpop.f32.mrf.mxu1 }
 0x4aa   : > { %v2115_v31 = vsel %vm1211_vm3, %v6914_v14, -inf  ;;  %v2025_v17 = vadd.f32 %v2024_v3, %v1965_v52 }
 0x4ab   : > { %2116 = vmax.xlane.f32.xlu1 %v2115_v31 }
 0x4ac   : > { %v2075_v10 = vadd.f32 %v6911_v46, %v2025_v17 }
 0x4ae   : > { %v2096_v57 = vmul.f32 0.5, %v2075_v10 }
 0x4b0   : > { %v2104_v3 = vadd.f32 %v2096_v57, %v6630_v55 }
 0x4b1   : > { %v2028_v32 = vpop.f32.mrf.mxu0  ;;  %v2082_v20 = vpop.f32.mrf.mxu1 }
 0x4b2   : > { %v2029_v59 = vadd.f32 %v2028_v32, %v1971_v51 }
 0x4b3   : > { %2110 = vmax.xlane.f32.xlu1 %v2109_v48 }
 0x4b4   : > { %v2079_v48 = vadd.f32 %v2078_v21, %v2029_v59 }
 0x4b9   : > { %v2032_v53 = vpop.f32.mrf.mxu0  ;;  %v2086_v9 = vpop.f32.mrf.mxu1 }
 0x4ba   : > { %v2033_v34 = vadd.f32 %v2032_v53, %v1977_v4  ;;  %v1893_v4 = vadd.f32 %v6899_v63, %v1840_v47 }
 0x4bc   : > { %v2083_v38 = vadd.f32 %v2082_v20, %v2033_v34  ;;  %v2097_v20 = vmul.f32 0.5, %v2079_v48  ;;  %v1953_v21 = vadd.f32 %v6901_v12, %v1893_v4  ;;  %v2118_v34 = vsel %vm1211_vm3, %v2104_v3, -inf }
 0x4be   : > { %v2098_v37 = vmul.f32 0.5, %v2083_v38  ;;  %v2105_v41 = vadd.f32 %v2097_v20, %v6630_v55  ;;  %v2017_v22 = vadd.f32 %v6905_v8, %v1953_v21  ;;  %v2570_v20 = vld [vmem:[%s7982_s5] sm:$0xff] }
 0x4c0   : > { %v6924_v58 = vadd.f32 %v2098_v37, %v6630_v55  ;;  %v2121_v35 = vsel %vm1211_vm3, %v2105_v41, -inf  ;;  %v2067_v27 = vadd.f32 %v6903_v61, %v2017_v22 }
 0x4c1   : > { %v2036_v43 = vpop.f32.mrf.mxu0  ;;  %v2090_v19 = vpop.f32.mrf.mxu1 }
 0x4c2   : > { %v2037_v1 = vadd.f32 %v2036_v43, %v1983_v40  ;;  %v2124_v30 = vsel %vm1211_vm3, %v6924_v58, -inf  ;;  %v2094_v53 = vmul.f32 0.5, %v2067_v27 }
 0x4c3   : > { %2125 = vmax.xlane.f32.xlu0 %v2124_v30 }
 0x4c4   : > { %v2087_v45 = vadd.f32 %v2086_v9, %v2037_v1  ;;  %v2102_v63 = vadd.f32 %v2094_v53, %v6630_v55 }
 0x4c6   : > { %v2099_v0 = vmul.f32 0.5, %v2087_v45  ;;  %v2112_v46 = vsel %vm1211_vm3, %v2102_v63, -inf }
 0x4c8   : > { %v2107_v44 = vadd.f32 %v2099_v0, %v6630_v55 }
 0x4c9   : > { %v2040_v36 = vpop.f32.mrf.mxu0 }
 0x4ca   : > { %v2041_v26 = vadd.f32 %v2040_v36, %v1989_v62  ;;  %v2127_v31 = vsel %vm1211_vm3, %v2107_v44, -inf }
 0x4cb   : > { %2128 = vmax.xlane.f32.xlu2 %v2127_v31 }
 0x4cc   : > { %v2091_v29 = vadd.f32 %v2090_v19, %v2041_v26 }
 0x4ce   : > { %v2100_v28 = vmul.f32 0.5, %v2091_v29 }
 0x4d0   : > { %v2108_v49 = vadd.f32 %v2100_v28, %v6630_v55 }
 0x4d2   : > { %v2130_v32 = vsel %vm1211_vm3, %v2108_v49, -inf }
 0x4d3   : > { %2131 = vmax.xlane.f32.xlu0 %v2130_v32  ;;  %v2727_v32 = vld [vmem:[%s7984_s7] sm:$0xff] }
 0x4db   : > { %2122 = vmax.xlane.f32.xlu0 %v2121_v35 }
 0x4e3   : > { %2119 = vmax.xlane.f32.xlu0 %v2118_v34 }
 0x4eb   : > { %2113 = vmax.xlane.f32.xlu0 %v2112_v46 }
 0x51e   : > { %v2117_v9 = vpop.xlane.xlu1 %2116 }
 0x51f   : > { %v2135_v11 = vsub.f32 %v6914_v14, %v2117_v9 }
 0x526   : > { %v2111_v0 = vpop.xlane.xlu1 %2110 }
 0x536   : > { %v2126_v12 = vpop.xlane.xlu0 %2125 }
 0x537   : > { %v2138_v61 = vsub.f32 %v6924_v58, %v2126_v12  ;;  %v2145_v58 = vmul.f32 1.442695, %v2135_v11 }
 0x539   : > { %v2151_v43 = vmul.f32 1.442695, %v2138_v61 }
 0x53e   : > { %v2129_v33 = vpop.xlane.xlu2 %2128 }
 0x53f   : > { %v2139_v8 = vsub.f32 %v2107_v44, %v2129_v33  ;;  %v2133_v44 = vsub.f32 %v6919_v15, %v2111_v0 }
 0x541   : > { %v2153_v38 = vmul.f32 1.442695, %v2139_v8  ;;  %v2141_v26 = vmul.f32 1.442695, %v2133_v44 }
 0x543   : > { %6295 = vpow2.f32 %v2153_v38 }
 0x546   : > { %v2132_v39 = vpop.xlane.xlu0 %2131 }
 0x547   : > { %v2140_v37 = vsub.f32 %v2108_v49, %v2132_v39  ;;  %v2301_v39 = vrot.slane %v6834_v16, 4 }
 0x549   : > { %v6949_v7 = vpop.eup %6295  ;;  %v2155_v40 = vmul.f32 1.442695, %v2140_v37 }
 0x54a   : > { %v2175_v54 = vsel %vm1211_vm3, %v6949_v7, 0.0 }
 0x54b   : > { %6297 = vpow2.f32 %v2155_v40  ;;  %2176 = vadd.xlane.f32.xlu1 %v2175_v54 }
 0x54c   : > { %6299 = vpow2.f32 %v2151_v43 }
 0x54e   : > { %v2123_v1 = vpop.xlane.xlu0 %2122 }
 0x54f   : > { %v2137_v30 = vsub.f32 %v2105_v41, %v2123_v1 }
 0x551   : > { %v6954_v60 = vpop.eup %6297  ;;  %v2149_v24 = vmul.f32 1.442695, %v2137_v30  ;;  %v6996_v30 = vsel %vm1211_vm3, %v2301_v39, 0 }
 0x552   : > { %v2178_v45 = vsel %vm1211_vm3, %v6954_v60, 0.0  ;;  %v6959_v50 = vpop.eup %6299 }
 0x553   : > { %6301 = vpow2.f32 %v2149_v24  ;;  %2179 = vadd.xlane.f32.xlu0 %v2178_v45  ;;  %v2172_v14 = vsel %vm1211_vm3, %v6959_v50, 0.0 }
 0x554   : > { %6303 = vpow2.f32 %v2145_v58 }
 0x556   : > { %v2120_v42 = vpop.xlane.xlu0 %2119 }
 0x557   : > { %v2136_v51 = vsub.f32 %v2104_v3, %v2120_v42 }
 0x559   : > { %v6961_v62 = vpop.eup %6301  ;;  %v2147_v36 = vmul.f32 1.442695, %v2136_v51 }
 0x55a   : > { %v2169_v59 = vsel %vm1211_vm3, %v6961_v62, 0.0  ;;  %v6968_v19 = vpop.eup %6303 }
 0x55b   : > { %6305 = vpow2.f32 %v2147_v36  ;;  %2173 = vadd.xlane.f32.xlu0 %v2172_v14  ;;  %2170 = vadd.xlane.f32.xlu1 %v2169_v59  ;;  %v2163_v15 = vsel %vm1211_vm3, %v6968_v19, 0.0 }
 0x55c   : > { %6307 = vpow2.f32 %v2141_v26 }
 0x55e   : > { %v2114_v31 = vpop.xlane.xlu0 %2113 }
 0x55f   : > { %v2134_v13 = vsub.f32 %v2102_v63, %v2114_v31 }
 0x561   : > { %v6970_v29 = vpop.eup %6305  ;;  %v2143_v48 = vmul.f32 1.442695, %v2134_v13 }
 0x562   : > { %v2166_v28 = vsel %vm1211_vm3, %v6970_v29, 0.0  ;;  %v6976_v47 = vpop.eup %6307 }
 0x563   : > { %6309 = vpow2.f32 %v2143_v48  ;;  %2164 = vadd.xlane.f32.xlu1 %v2163_v15  ;;  %2167 = vadd.xlane.f32.xlu0 %v2166_v28  ;;  %v2157_v49 = vsel %vm1211_vm3, %v6976_v47, 0.0 }
 0x569   : > { %v6978_v52 = vpop.eup %6309 }
 0x56a   : > { %v2160_v17 = vsel %vm1211_vm3, %v6978_v52, 0.0 }
 0x56b   : > { %2158 = vadd.xlane.f32.xlu1 %v2157_v49  ;;  %2161 = vadd.xlane.f32.xlu0 %v2160_v17 }
 0x57f   : > { %2573 = vperm.xlu0 %6259, %v2570_v20  }
 0x587   : > { %2773 = vperm.xlu0 %6259, %v2727_v32  }
 0x5be   : > { %v2177_v4 = vpop.xlane.xlu1 %2176 }
 0x5bf   : > { %6311 = vrcp.f32 %v2177_v4  ;;  %v2282_v57 = vand.u32 2147483648, %v2177_v4  ;;  %v2280_v27 = vand.u32 2147483647, %v2177_v4  ;;  %vm2276_vm13 = vweird.f32 %v2177_v4 }
 0x5c1   : > { %v2283_v34 = vor.u32 1.1754944e-38, %v2282_v57  ;;  %vm2281_vm15 = vcmp.eq.f32.partialorder %v2280_v27, 8.507059e+37 }
 0x5c5   : > { %v6312_v10 = vpop.eup %6311 }
 0x5c6   : > { %v2272_v41 = vmul.f32 %v6312_v10, %v2177_v4  ;;  %v2180_v21 = vpop.xlane.xlu0 %2179  ;;  %vm2277_vm12 = vweird.f32 %v6312_v10 }
 0x5c7   : > { %6313 = vrcp.f32 %v2180_v21  ;;  %vm2278_vm14 = vmor %vm2276_vm13, %vm2277_vm12  ;;  %v2297_v37 = vand.u32 2147483648, %v2180_v21  ;;  %v2295_v54 = vand.u32 2147483647, %v2180_v21  ;;  %vm2291_vm5 = vweird.f32 %v2180_v21 }
 0x5c8   : > { %v2273_v22 = vsub.f32 1.0, %v2272_v41 }
 0x5c9   : > { %v2298_v11 = vor.u32 1.1754944e-38, %v2297_v37  ;;  %vm2296_vm7 = vcmp.eq.f32.partialorder %v2295_v54, 8.507059e+37 }
 0x5ca   : > { %v2274_v35 = vmul.f32 %v6312_v10, %v2273_v22 }
 0x5cc   : > { %v2275_v3 = vadd.f32 %v6312_v10, %v2274_v35 }
 0x5cd   : > { %v6314_v53 = vpop.eup %6313 }
 0x5ce   : > { %v2279_v63 = vsel %vm2278_vm14, %v6312_v10, %v2275_v3  ;;  %v2287_v46 = vmul.f32 %v6314_v53, %v2180_v21  ;;  %v2171_v12 = vpop.xlane.xlu1 %2170  ;;  %v2174_v33 = vpop.xlane.xlu0 %2173  ;;  %vm2292_vm4 = vweird.f32 %v6314_v53 }
 0x5cf   : > { %v2284_v8 = vsel %vm2281_vm15, %v2283_v34, %v2279_v63  ;;  %6315 = vrcp.f32 %v2171_v12  ;;  %vm2293_vm6 = vmor %vm2291_vm5, %vm2292_vm4  ;;  %v2250_v58 = vand.u32 2147483647, %v2171_v12  ;;  %vm2246_vm8 = vweird.f32 %v2171_v12 }
 0x5d0   : > { %v2288_v38 = vsub.f32 1.0, %v2287_v46  ;;  %6317 = vrcp.f32 %v2174_v33  ;;  %v2285_v61 = vmul.f32 %v6949_v7, %v2284_v8  ;;  %v2252_v7 = vand.u32 2147483648, %v2171_v12 }
 0x5d1   : > { %v2265_v59 = vand.u32 2147483647, %v2174_v33  ;;  %vm2261_vm9 = vweird.f32 %v2174_v33  ;;  %v2267_v31 = vand.u32 2147483648, %v2174_v33  ;;  %vm7009_vm11 = vcmp.eq.f32.partialorder %v2250_v58, 8.507059e+37 }
 0x5d2   : > { %v2289_v40 = vmul.f32 %v6314_v53, %v2288_v38  ;;  %v2323_v43 = vsel %vm1211_vm3, %v2285_v61, 0  ;;  %v2253_v15 = vor.u32 1.1754944e-38, %v2252_v7 }
 0x5d3   : > { %v7004_v44 = vand.u32 4294901760, %v2323_v43  ;;  %vm7018_vm13 = vcmp.eq.f32.partialorder %v2265_v59, 8.507059e+37  ;;  %v2268_v22 = vor.u32 1.1754944e-38, %v2267_v31 }
 0x5d4   : > { %v2290_v9 = vadd.f32 %v6314_v53, %v2289_v40 }
 0x5d5   : > { %v6993_v1 = vpop.eup %6315  ;;  %v7015_v17 = vsub.f32 %v2323_v43, %v7004_v44 }
 0x5d6   : > { %v6318_v24 = vpop.eup %6317  ;;  %v2294_v45 = vsel %vm2293_vm6, %v6314_v53, %v2290_v9  ;;  %v2242_v16 = vmul.f32 %v6993_v1, %v2171_v12  ;;  %v6999_v0 = vpop.xlane.xlu1 %2164  ;;  %vm2247_vm10 = vweird.f32 %v6993_v1 }
 0x5d7   : > { %v7001_v42 = vpop.xlane.xlu0 %2167  ;;  %v2257_v51 = vmul.f32 %v6318_v24, %v2174_v33  ;;  %6319 = vrcp.f32 %v6999_v0  ;;  %v2299_v36 = vsel %vm2296_vm7, %v2298_v11, %v2294_v45  ;;  %vm2262_vm12 = vweird.f32 %v6318_v24  ;;  %vm7025_vm14 = vmor %vm2246_vm8, %vm2247_vm10 }
 0x5d8   : > { %v2243_v14 = vsub.f32 1.0, %v2242_v16  ;;  %6321 = vrcp.f32 %v7001_v42  ;;  %v2300_v49 = vmul.f32 %v6954_v60, %v2299_v36  ;;  %v2220_v4 = vand.u32 2147483647, %v6999_v0  ;;  %vm7032_vm4 = vmor %vm2261_vm9, %vm2262_vm12 }
 0x5d9   : > { %v2258_v26 = vsub.f32 1.0, %v2257_v51  ;;  %v2222_v10 = vand.u32 2147483648, %v6999_v0  ;;  %vm2216_vm15 = vweird.f32 %v6999_v0  ;;  %vm2231_vm5 = vweird.f32 %v7001_v42 }
 0x5da   : > { %v2244_v13 = vmul.f32 %v6993_v1, %v2243_v14  ;;  %v2326_v57 = vsel %vm1211_vm3, %v2300_v49, 0  ;;  %v2235_v3 = vand.u32 2147483647, %v7001_v42  ;;  %v2237_v53 = vand.u32 2147483648, %v7001_v42 }
 0x5db   : > { %v2259_v28 = vmul.f32 %v6318_v24, %v2258_v26  ;;  %v7040_v34 = vand.u32 4294901760, %v2326_v57  ;;  %v2377_v38 = vand.u32 4294901760, %v7015_v17  ;;  %vm7053_vm6 = vcmp.eq.f32.partialorder %v2220_v4, 8.507059e+37 }
 0x5dc   : > { %v2245_v20 = vadd.f32 %v6993_v1, %v2244_v13  ;;  %v2223_v61 = vor.u32 1.1754944e-38, %v2222_v10  ;;  %vm7069_vm8 = vcmp.eq.f32.partialorder %v2235_v3, 8.507059e+37  ;;  %v2238_v16 = vor.u32 1.1754944e-38, %v2237_v53 }
 0x5dd   : > { %v6320_v41 = vpop.eup %6319  ;;  %v2260_v60 = vadd.f32 %v6318_v24, %v2259_v28  ;;  %2337 = vmatpush.xpose.msra.mxu2 %v7040_v34  ;;  %2545 = vmatpush.xpose.msrb.mxu1 %v7040_v34  ;;  %v7063_v9 = vsub.f32 %v2326_v57, %v7040_v34  ;;  %v2378_v7 = vsub.f32 %v7015_v17, %v2377_v38 }
 0x5de   : > { %v2212_v27 = vmul.f32 %v6320_v41, %v6999_v0  ;;  %v7042_v63 = vpop.xlane.xlu1 %2158  ;;  %v6322_v12 = vpop.eup %6321  ;;  %v2249_v33 = vsel %vm7025_vm14, %v6993_v1, %v2245_v20  ;;  %vm2217_vm7 = vweird.f32 %v6320_v41 }
 0x5df   : > { %v7044_v46 = vpop.xlane.xlu0 %2161  ;;  %v2264_v8 = vsel %vm7032_vm4, %v6318_v24, %v2260_v60  ;;  %6323 = vrcp.f32 %v7042_v63  ;;  %v2227_v40 = vmul.f32 %v6322_v12, %v7001_v42  ;;  %v2254_v43 = vsel %vm7009_vm11, %v2253_v15, %v2249_v33  ;;  %vm2218_vm11 = vmor %vm2216_vm15, %vm2217_vm7 }
 0x5e0   : > { %v2213_v39 = vsub.f32 1.0, %v2212_v27  ;;  %v2269_v54 = vsel %vm7018_vm13, %v2268_v22, %v2264_v8  ;;  %6325 = vrcp.f32 %v7044_v46  ;;  %v2192_v24 = vand.u32 2147483648, %v7042_v63 }
 0x5e1   : > { %v2228_v11 = vsub.f32 1.0, %v2227_v40  ;;  %v2371_v58 = vand.u32 4294901760, %v7063_v9  ;;  %vm2232_vm9 = vweird.f32 %v6322_v12  ;;  %vm2186_vm10 = vweird.f32 %v7042_v63  ;;  %2339 = vmatpush.xpose.msra.mxu2 %v7004_v44  ;;  %2547 = vmatpush.xpose.msrb.mxu1 %v7004_v44 }
 0x5e2   : > { %v2214_v1 = vmul.f32 %v6320_v41, %v2213_v39  ;;  %v2270_v14 = vmul.f32 %v6959_v50, %v2269_v54  ;;  %v2190_v26 = vand.u32 2147483647, %v7042_v63  ;;  %v2205_v31 = vand.u32 2147483647, %v7044_v46  ;;  %vm2233_vm12 = vmor %vm2231_vm5, %vm2232_vm9 }
 0x5e3   : > { %v2229_v36 = vmul.f32 %v6322_v12, %v2228_v11  ;;  %2502 = vmatpush.xpose.msrb.mxu0 %v2371_v58  ;;  %v2372_v13 = vsub.f32 %v7063_v9, %v2371_v58  ;;  %v2255_v48 = vmul.f32 %v6961_v62, %v2254_v43  ;;  %v2193_v20 = vor.u32 1.1754944e-38, %v2192_v24 }
 0x5e4   : > { %v2215_v51 = vadd.f32 %v6320_v41, %v2214_v1  ;;  %v2320_v0 = vsel %vm1211_vm3, %v2270_v14, 0  ;;  %v2207_v60 = vand.u32 2147483648, %v7044_v46  ;;  %vm2191_vm4 = vcmp.eq.f32.partialorder %v2190_v26, 8.507059e+37 }
 0x5e5   : > { %v6324_v59 = vpop.eup %6323  ;;  %v2230_v28 = vadd.f32 %v6322_v12, %v2229_v36  ;;  %v2373_v4 = vand.u32 4294901760, %v2372_v13  ;;  %v2317_v10 = vsel %vm1211_vm3, %v2255_v48, 0  ;;  %v7098_v57 = vand.u32 4294901760, %v2320_v0 }
 0x5e6   : > { %v2219_v15 = vsel %vm2218_vm11, %v6320_v41, %v2215_v51  ;;  %v2182_v49 = vmul.f32 %v6324_v59, %v7042_v63  ;;  %v6326_v50 = vpop.eup %6325  ;;  %v7100_v42 = vand.u32 4294901760, %v2317_v10  ;;  %vm2187_vm13 = vweird.f32 %v6324_v59 }
 0x5e7   : > { %v2224_v32 = vsel %vm7053_vm6, %v2223_v61, %v2219_v15  ;;  %v2234_v21 = vsel %vm2233_vm12, %v6322_v12, %v2230_v28  ;;  %v2197_v41 = vmul.f32 %v6326_v50, %v7044_v46  ;;  %2374 = vmatpush.xpose.msra.mxu3 %v2373_v4  ;;  %2506 = vmatpush.xpose.msrb.mxu0 %v2377_v38  ;;  %v2379_v12 = vand.u32 4294901760, %v2378_v7  ;;  %vm2188_vm15 = vmor %vm2186_vm10, %vm2187_vm13 }
 0x5e8   : > { %v2183_v62 = vsub.f32 1.0, %v2182_v49  ;;  %v2239_v22 = vsel %vm7069_vm8, %v2238_v16, %v2234_v21  ;;  %v2225_v35 = vmul.f32 %v6968_v19, %v2224_v32  ;;  %2341 = vmatpush.xpose.msra.mxu2 %v7098_v57  ;;  %2549 = vmatpush.xpose.msrb.mxu1 %v7098_v57  ;;  %v7107_v33 = vsub.f32 %v2320_v0, %v7098_v57 }
 0x5e9   : > { %v2198_v3 = vsub.f32 1.0, %v2197_v41  ;;  %v2240_v53 = vmul.f32 %v6970_v29, %v2239_v22  ;;  %v7110_v8 = vsub.f32 %v2317_v10, %v7100_v42  ;;  %vm2202_vm14 = vweird.f32 %v6326_v50 }
 0x5ea   : > { %v2184_v27 = vmul.f32 %v6324_v59, %v2183_v62  ;;  %v2311_v38 = vsel %vm1211_vm3, %v2225_v35, 0  ;;  %v2383_v29 = vand.u32 4294901760, %v7107_v33  ;;  %vm2201_vm5 = vweird.f32 %v7044_v46 }
 0x5eb   : > { %v2199_v19 = vmul.f32 %v6326_v50, %v2198_v3  ;;  %v2314_v37 = vsel %vm1211_vm3, %v2240_v53, 0  ;;  %2380 = vmatpush.xpose.msra.mxu3 %v2379_v12  ;;  %v2389_v40 = vand.u32 4294901760, %v7110_v8  ;;  %v7120_v54 = vand.u32 4294901760, %v2311_v38  ;;  %vm2203_vm6 = vmor %vm2201_vm5, %vm2202_vm14 }
 0x5ec   : > { %v2185_v39 = vadd.f32 %v6324_v59, %v2184_v27  ;;  %v7117_v61 = vand.u32 4294901760, %v2314_v37  ;;  %v7124_v11 = vand.u32 4294901760, %v6996_v30  ;;  %v2208_v63 = vor.u32 1.1754944e-38, %v2207_v60  ;;  %2343 = vmatpush.xpose.msra.mxu2 %v7100_v42  ;;  %2510 = vmatpush.xpose.msrb.mxu0 %v2383_v29 }
 0x5ed   : > { %v2200_v1 = vadd.f32 %v6326_v50, %v2199_v19  ;;  %v2384_v45 = vsub.f32 %v7107_v33, %v2383_v29  ;;  %vm2206_vm7 = vcmp.eq.f32.partialorder %v2205_v31, 8.507059e+37  ;;  %2551 = vmatpush.xpose.msrb.mxu1 %v7100_v42  ;;  %v2390_v36 = vsub.f32 %v7110_v8, %v2389_v40 }
 0x5ee   : > { %v2189_v43 = vsel %vm2188_vm15, %v6324_v59, %v2185_v39  ;;  %v2394_v58 = vsub.f32 %v2314_v37, %v7117_v61  ;;  %v2400_v14 = vsub.f32 %v2311_v38, %v7120_v54  ;;  %v2353_v31 = vsub.f32 %v6996_v30, %v7124_v11 }
 0x5ef   : > { %v2194_v24 = vsel %vm2191_vm4, %v2193_v20, %v2189_v43  ;;  %v2204_v16 = vsel %vm2203_vm6, %v6326_v50, %v2200_v1  ;;  %v2385_v51 = vand.u32 4294901760, %v2384_v45  ;;  %v2391_v15 = vand.u32 4294901760, %v2390_v36 }
 0x5f0   : > { %v2195_v7 = vmul.f32 %v6976_v47, %v2194_v24  ;;  %v2209_v46 = vsel %vm2206_vm7, %v2208_v63, %v2204_v16  ;;  %v2395_v59 = vand.u32 4294901760, %v2394_v58  ;;  %2345 = vmatpush.xpose.msra.mxu2 %v7117_v61  ;;  %2514 = vmatpush.xpose.msrb.mxu0 %v2389_v40  ;;  %v2401_v49 = vand.u32 4294901760, %v2400_v14 }
 0x5f1   : > { %v2210_v26 = vmul.f32 %v6978_v52, %v2209_v46  ;;  %2386 = vmatpush.xpose.msra.mxu3 %v2385_v51  ;;  %2553 = vmatpush.xpose.msrb.mxu1 %v7117_v61  ;;  %v2354_v32 = vand.u32 4294901760, %v2353_v31  ;;  %vm2796_vm12 = vcmask 195584   ;;  %vm2783_vm13 = vcmask 7168  }
 0x5f2   : > { %v2305_v13 = vsel %vm1211_vm3, %v2195_v7, 0  ;;  %v2396_v48 = vsub.f32 %v2394_v58, %v2395_v59  ;;  %v2402_v30 = vsub.f32 %v2400_v14, %v2401_v49  ;;  %v2574_v7 = vpop.permute.xlu0 %2573  ;;  %vm2788_vm14 = vcmask 515072  }
 0x5f3   : > { %v2308_v47 = vsel %vm1211_vm3, %v2210_v26, 0  ;;  %v2350_v20 = vand.u32 4294901760, %v2305_v13  ;;  %v2355_v21 = vsub.f32 %v2353_v31, %v2354_v32 }
 0x5f4   : > { %v2348_v28 = vand.u32 4294901760, %v2308_v47  ;;  %2347 = vmatpush.xpose.msra.mxu2 %v7120_v54  ;;  %v2397_v52 = vand.u32 4294901760, %v2396_v48  ;;  %2518 = vmatpush.xpose.msrb.mxu0 %v2395_v59  ;;  %v2403_v62 = vand.u32 4294901760, %v2402_v30 }
 0x5f5   : > { %2392 = vmatpush.xpose.msra.mxu3 %v2391_v15  ;;  %2555 = vmatpush.xpose.msrb.mxu1 %v7120_v54  ;;  %v2412_v4 = vsub.f32 %v2305_v13, %v2350_v20  ;;  %v2356_v22 = vand.u32 4294901760, %v2355_v21 }
 0x5f6   : > { %v2406_v50 = vsub.f32 %v2308_v47, %v2348_v28 }
 0x5f7   : > { %v2413_v41 = vand.u32 4294901760, %v2412_v4 }
 0x5f8   : > { %v2407_v0 = vand.u32 4294901760, %v2406_v50  ;;  %2349 = vmatpush.xpose.msra.mxu2 %v2348_v28  ;;  %2522 = vmatpush.xpose.msrb.mxu0 %v2401_v49 }
 0x5f9   : > { %2398 = vmatpush.xpose.msra.mxu3 %v2397_v52  ;;  %2557 = vmatpush.xpose.msrb.mxu1 %v2348_v28  ;;  %v2414_v35 = vsub.f32 %v2412_v4, %v2413_v41 }
 0x5fa   : > { %v2408_v10 = vsub.f32 %v2406_v50, %v2407_v0 }
 0x5fb   : > { %v2415_v27 = vand.u32 4294901760, %v2414_v35 }
 0x5fc   : > { %2351 = vmatpush.xpose.msra.mxu2 %v2350_v20  ;;  %v2409_v60 = vand.u32 4294901760, %v2408_v10  ;;  %2526 = vmatpush.xpose.msrb.mxu0 %v2407_v0 }
 0x5fd   : > { %2404 = vmatpush.xpose.msra.mxu3 %v2403_v62  ;;  %2559 = vmatpush.xpose.msrb.mxu1 %v2350_v20 }
 0x5ff   : > { %2357 = vmatmul.f32.vlgmr.msra.gmra.mxu2 %v2356_v22 }
 0x600   : > { %2432 = vmatpush.xpose.msrb.mxu2 %v7063_v9  ;;  %2561 = vmatmul.f32.vlgmr.msrb.gmra.mxu1 %v7124_v11 }
 0x601   : > { %2410 = vmatpush.xpose.msra.mxu3 %v2409_v60  ;;  %2530 = vmatpush.xpose.msrb.mxu0 %v2413_v41 }
 0x604   : > { %2435 = vmatpush.xpose.msrb.mxu2 %v7015_v17  ;;  %2532 = vmatmul.f32.vlgmr.msrb.gmra.mxu0 %v7124_v11 }
 0x605   : > { %2416 = vmatpush.xpose.msra.mxu3 %v2415_v27 }
 0x608   : > { %2438 = vmatpush.xpose.msrb.mxu2 %v7107_v33  ;;  %2418 = vmatmul.f32.vlgmr.msra.gmra.mxu3 %v7124_v11 }
 0x609   : > { %2469 = vmatpush.xpose.msrb.mxu3 %v7040_v34 }
 0x60c   : > { %2441 = vmatpush.xpose.msrb.mxu2 %v7110_v8 }
 0x60d   : > { %2471 = vmatpush.xpose.msrb.mxu3 %v7004_v44  ;;  %v2569_v44 = vld [vmem:[%s7981_s4] sm:$0xff] }
 0x60e   : > { %v2577_v34 = vsel %vm550_vm0, %v2569_v44, 0 }
 0x610   : > { %2444 = vmatpush.xpose.msrb.mxu2 %v2394_v58 }
 0x611   : > { %2473 = vmatpush.xpose.msrb.mxu3 %v7098_v57  ;;  %v2596_v57 = vand.u32 4294901760, %v2577_v34 }
 0x613   : > { %v2597_v33 = vsub.f32 %v2577_v34, %v2596_v57 }
 0x614   : > { %2447 = vmatpush.xpose.msrb.mxu2 %v2400_v14  ;;  %v6415_v14 = vmov 8.0  }
 0x615   : > { %2475 = vmatpush.xpose.msrb.mxu3 %v7100_v42  ;;  %v1523_v42 = vadd.f32 %v6879_v6, %v6881_v2  ;;  %v2598_v37 = vand.u32 4294901760, %v2597_v33  ;;  %v2726_v6 = vld [vmem:[%s7983_s6] sm:$0xff]  ;;  %6327 = vrcp.f32 %v6415_v14 }
 0x616   : > { %2767 = vperm.xlu1 %6260, %v2726_v6  }
 0x617   : > { %v1561_v53 = vadd.f32 %v6885_v5, %v1523_v42  ;;  %v2599_v1 = vsub.f32 %v2597_v33, %v2598_v37 }
 0x618   : > { %2450 = vmatpush.xpose.msrb.mxu2 %v2406_v50 }
 0x619   : > { %2477 = vmatpush.xpose.msrb.mxu3 %v7117_v61  ;;  %v1592_v8 = vadd.f32 %v6883_v23, %v1561_v53  ;;  %v2600_v11 = vand.u32 4294901760, %v2599_v1  ;;  %v7179_v1 = vld [vmem:[%s6529_s16] ss:$0 sm:$0xff] }
 0x61b   : > { %v1637_v61 = vadd.f32 %v6895_v56, %v1592_v8 }
 0x61c   : > { %2453 = vmatpush.xpose.msrb.mxu2 %v2412_v4 }
 0x61d   : > { %2479 = vmatpush.xpose.msrb.mxu3 %v7120_v54  ;;  %v1666_v2 = vadd.f32 %v6897_v25, %v1637_v61 }
 0x61f   : > { %2456 = vmatmul.f32.vlgmr.msrb.gmra.mxu2 %v2353_v31  ;;  %v6328_v31 = vpop.eup %6327 }
 0x620   : > { %v2736_v15 = vmul.f32 8.0, %v6328_v31  ;;  %vm2740_vm8 = vweird.f32 %v6328_v31 }
 0x621   : > { %2481 = vmatpush.xpose.msrb.mxu3 %v2348_v28 }
 0x622   : > { %v2737_v52 = vsub.f32 1.0, %v2736_v15 }
 0x624   : > { %v2738_v30 = vmul.f32 %v6328_v31, %v2737_v52 }
 0x625   : > { %2483 = vmatpush.xpose.msrb.mxu3 %v2350_v20 }
 0x626   : > { %v2739_v10 = vadd.f32 %v6328_v31, %v2738_v30 }
 0x628   : > { %2487 = vmatmul.f32.vlgmr.msrb.gmra.mxu3 %v2354_v32  ;;  %v7171_v41 = vsel %vm2740_vm8, %v6328_v31, %v2739_v10 }
 0x629   : > { %8016 = vst [vmem:[#allocation2_spill] sm:$0xff] %v7171_v41 }
 0x67d   : > { %v2562_v54 = vpop.f32.mrf.mxu1 }
 0x681   : > { %v2533_v29 = vpop.f32.mrf.mxu0 }
 0x682   : > { %v2358_v17 = vpop.f32.mrf.mxu2 }
 0x68b   : > { %v2419_v9 = vpop.f32.mrf.mxu3 }
 0x68c   : > { %v2420_v12 = vadd.f32 %v2419_v9, %v2358_v17 }
 0x6a2   : > { %v2457_v3 = vpop.f32.mrf.mxu2 }
 0x6a3   : > { %v2458_v38 = vadd.f32 %v2457_v3, %v2420_v12 }
 0x6ab   : > { %v2488_v39 = vpop.f32.mrf.mxu3 }
 0x6ac   : > { %v2489_v19 = vadd.f32 %v2488_v39, %v2458_v38 }
 0x6ae   : > { %v2534_v40 = vadd.f32 %v2533_v29, %v2489_v19 }
 0x6b0   : > { %v2563_v43 = vadd.f32 %v2562_v54, %v2534_v40  ;;  %v2774_v54 = vpop.permute.xlu0 %2773 }
 0x6b2   : > { %v2566_v5 = vrot.slane %v2563_v43, 4 }
 0x6b4   : > { %v2568_v23 = vsel %vm825_vm1, %v1666_v2, %v2566_v5  ;;  %v2790_v2 = vld [vmem:[%s7986_s9] sm:$0xff] }
 0x6b5   : > { %v2594_v24 = vand.u32 4294901760, %v2568_v23  ;;  %v2778_v5 = vld [vmem:[%s7985_s8] sm:$0xff] }
 0x6b7   : > { %2595 = vmatpush.msra.mxu2 %v2594_v24  ;;  %v2621_v63 = vsub.f32 %v2568_v23, %v2594_v24  ;;  %v2798_v23 = vsel %vm2796_vm12, %v2778_v5, 0 }
 0x6b8   : > { %2601 = vmatmul.f32.vlgmr.msra.gmra.mxu2 %v2600_v11  ;;  %v2819_v11 = vand.u32 4294901760, %v2798_v23 }
 0x6b9   : > { %2648 = vmatpush.msrb.mxu2 %v2621_v63  ;;  %v2622_v56 = vand.u32 4294901760, %v2621_v63 }
 0x6bb   : > { %2697 = vmatpush.msra.mxu2 %v2622_v56  ;;  %v2623_v45 = vsub.f32 %v2621_v63, %v2622_v56 }
 0x6bd   : > { %v2624_v16 = vand.u32 4294901760, %v2623_v45 }
 0x6bf   : > { %2625 = vmatpush.msra.mxu3 %v2624_v16 }
 0x6c0   : > { %2627 = vmatmul.f32.vlgmr.msra.gmra.mxu3 %v2596_v57  ;;  %2651 = vmatmul.f32.vlgmr.msrb.gmra.mxu2 %v2597_v33 }
 0x6c1   : > { %2671 = vmatpush.msrb.mxu3 %v2594_v24 }
 0x6c3   : > { %2719 = vmatpush.msra.mxu3 %v2594_v24  ;;  %v2820_v24 = vsub.f32 %v2798_v23, %v2819_v11 }
 0x6c5   : > { %v2821_v56 = vand.u32 4294901760, %v2820_v24 }
 0x6c8   : > { %2675 = vmatmul.f32.vlgmr.msrb.gmra.mxu3 %v2598_v37  ;;  %2699 = vmatmul.f32.vlgmr.msra.gmra.mxu2 %v2596_v57  ;;  %v2768_v37 = vpop.permute.xlu1 %2767 }
 0x6d0   : > { %2721 = vmatmul.f32.vlgmr.msra.gmra.mxu3 %v2596_v57 }
 0x73b   : > { %v2602_v25 = vpop.f32.mrf.mxu2 }
 0x73c   : > { %v2603_v51 = vadd.f32 %v2602_v25, %v2574_v7 }
 0x743   : > { %v2628_v58 = vpop.f32.mrf.mxu3  ;;  %v2652_v46 = vpop.f32.mrf.mxu2 }
 0x744   : > { %v2629_v36 = vadd.f32 %v2628_v58, %v2603_v51 }
 0x746   : > { %v2653_v26 = vadd.f32 %v2652_v46, %v2629_v36  ;;  %v2822_v46 = vsub.f32 %v2820_v24, %v2821_v56 }
 0x74b   : > { %v2676_v59 = vpop.f32.mrf.mxu3  ;;  %v2700_v47 = vpop.f32.mrf.mxu2 }
 0x74c   : > { %v2677_v13 = vadd.f32 %v2676_v59, %v2653_v26 }
 0x74e   : > { %v2701_v48 = vadd.f32 %v2700_v47, %v2677_v13  ;;  %v2823_v13 = vand.u32 4294901760, %v2822_v46 }
 0x753   : > { %v2722_v28 = vpop.f32.mrf.mxu3 }
 0x754   : > { %v2723_v49 = vadd.f32 %v2722_v28, %v2701_v48 }
 0x756   : > { %v2725_v20 = vadd.f32 %v2723_v49, %v6540_v18 }
 0x758   : > { %v2728_v50 = vsel %vm1211_vm3, %v2725_v20, 0.0 }
 0x759   : > { %v2729_v32 = vrot.slane %v2728_v50, 4 }
 0x75b   : > { %v2730_v0 = vadd.f32 %v2729_v32, %v2728_v50 }
 0x75d   : > { %v2731_v4 = vrot.slane %v2730_v0, 2 }
 0x75f   : > { %v2732_v21 = vadd.f32 %v2731_v4, %v2730_v0 }
 0x761   : > { %v2733_v62 = vrot.slane %v2732_v21, 1 }
 0x763   : > { %v2734_v60 = vadd.f32 %v2733_v62, %v2732_v21 }
 0x765   : > { %v2742_v22 = vmul.f32 %v7171_v41, %v2734_v60 }
 0x767   : > { %v2743_v35 = vsub.f32 %v2725_v20, %v2742_v22 }
 0x769   : > { %v2744_v27 = vmul.f32 %v2743_v35, %v2743_v35 }
 0x76b   : > { %v2745_v18 = vsel %vm1211_vm3, %v2744_v27, 0.0 }
 0x76c   : > { %v2746_v44 = vrot.slane %v2745_v18, 4 }
 0x76e   : > { %v2747_v17 = vadd.f32 %v2746_v44, %v2745_v18 }
 0x770   : > { %v2748_v34 = vrot.slane %v2747_v17, 2 }
 0x772   : > { %v2749_v9 = vadd.f32 %v2748_v34, %v2747_v17  ;;  %v6219_v34 = vld [vmem:[%s7983_s6 + $0x8] sm:$0xff] }
 0x774   : > { %v2750_v57 = vrot.slane %v2749_v9, 1 }
 0x776   : > { %v2751_v42 = vadd.f32 %v2750_v57, %v2749_v9  ;;  %v2984_v9 = vld [vmem:[%s7988_s11] sm:$0xff]  ;;  %v6224_v57 = vld [vmem:[%s7980_s3 + $0x18] sm:$0xff] }
 0x778   : > { %v2752_v3 = vmul.f32 %v2751_v42, %v7171_v41  ;;  %v6220_v42 = vld [vmem:[%s7984_s7 + $0x8] sm:$0xff] }
 0x77a   : > { %v2753_v53 = vadd.f32 1e-05, %v2752_v3  ;;  %v6225_v3 = vld [vmem:[%s7980_s3 + $0x20] sm:$0xff] }
 0x77c   : > { %6329 = vrsqrt.f32 %v2753_v53  ;;  %vm2760_vm10 = vweird.f32 %v2753_v53 }
 0x782   : > { %v6330_v12 = vpop.eup %6329 }
 0x783   : > { %v2755_v33 = vmul.f32 %v6330_v12, %v2753_v53  ;;  %vm2761_vm9 = vweird.f32 %v6330_v12  ;;  %v2974_v53 = vld [vmem:[%s7987_s10] sm:$0xff] }
 0x784   : > { %vm2762_vm11 = vmor %vm2760_vm10, %vm2761_vm9 }
 0x785   : > { %v2756_v8 = vmul.f32 %v6330_v12, %v2755_v33 }
 0x787   : > { %v2757_v38 = vmul.f32 0.5, %v2756_v8 }
 0x789   : > { %v2758_v39 = vsub.f32 1.5, %v2757_v38 }
 0x78b   : > { %v2759_v19 = vmul.f32 %v6330_v12, %v2758_v39 }
 0x78d   : > { %v2763_v29 = vsel %vm2762_vm11, %v6330_v12, %v2759_v19  ;;  %v2991_v12 = vsel %vm2796_vm12, %v2974_v53, 0 }
 0x78e   : > { %v2764_v61 = vmul.f32 %v2763_v29, %v2743_v35  ;;  %v3012_v33 = vand.u32 4294901760, %v2991_v12 }
 0x790   : > { %v2770_v40 = vmul.f32 %v2768_v37, %v2764_v61  ;;  %v3013_v8 = vsub.f32 %v2991_v12, %v3012_v33 }
 0x792   : > { %v7176_v43 = vadd.f32 %v2774_v54, %v2770_v40  ;;  %v3014_v39 = vand.u32 4294901760, %v3013_v8 }
 0x794   : > { %v2777_v6 = vmul.f32 %v7179_v1, %v7176_v43  ;;  %v3015_v54 = vsub.f32 %v3013_v8, %v3014_v39 }
 0x796   : > { %2780 = vrot.lane.b32.xlu0 %v2777_v6, %s6416_s24  ;;  %2785 = vrot.lane.b32.xlu1 %v2777_v6, %s7994_s25  ;;  %v2815_v63 = vand.u32 4294901760, %v2777_v6 }
 0x798   : > { %v2848_v25 = vsub.f32 %v2777_v6, %v2815_v63 }
 0x79a   : > { %v2849_v26 = vand.u32 4294901760, %v2848_v25 }
 0x79c   : > { %v2850_v15 = vsub.f32 %v2848_v25, %v2849_v26 }
 0x79e   : > { %2793 = vperm.xlu1 %6260, %v2790_v2   ;;  %v2851_v20 = vand.u32 4294901760, %v2850_v15 }
 0x808   : > { %v2781_v45 = vpop.permute.xlu0 %2780  ;;  %v2786_v16 = vpop.permute.xlu1 %2785 }
 0x809   : > { %v2784_v58 = vsel %vm2783_vm13, 0.0, %v2781_v45  ;;  %v2789_v7 = vsel %vm2788_vm14, %v2786_v16, 0.0 }
 0x80a   : > { %v2817_v51 = vand.u32 4294901760, %v2784_v58  ;;  %v2813_v36 = vand.u32 4294901760, %v2789_v7 }
 0x80c   : > { %v2854_v14 = vsub.f32 %v2784_v58, %v2817_v51  ;;  %v2842_v59 = vsub.f32 %v2789_v7, %v2813_v36  ;;  %2814 = vmatpush.msra.mxu0 %v2813_v36  ;;  %2906 = vmatpush.msrb.mxu3 %v2813_v36 }
 0x80e   : > { %v2843_v31 = vand.u32 4294901760, %v2842_v59  ;;  %2816 = vmatpush.msra.mxu0 %v2815_v63  ;;  %2879 = vmatpush.msrb.mxu2 %v2842_v59  ;;  %v2855_v47 = vand.u32 4294901760, %v2854_v14 }
 0x80f   : > { %2908 = vmatpush.msrb.mxu3 %v2815_v63 }
 0x810   : > { %v2844_v48 = vsub.f32 %v2842_v59, %v2843_v31  ;;  %2818 = vmatpush.msra.mxu0 %v2817_v51  ;;  %2882 = vmatpush.msrb.mxu2 %v2848_v25  ;;  %v2856_v49 = vsub.f32 %v2854_v14, %v2855_v47  ;;  %v2794_v32 = vpop.permute.xlu1 %2793 }
 0x811   : > { %2910 = vmatpush.msrb.mxu3 %v2817_v51  ;;  %2824 = vmatmul.f32.vlgmr.msra.gmra.mxu0 %v2823_v13 }
 0x812   : > { %v2845_v28 = vand.u32 4294901760, %v2844_v48  ;;  %2934 = vmatpush.msrb.mxu0 %v2843_v31  ;;  %2885 = vmatpush.msrb.mxu2 %v2854_v14  ;;  %v2857_v52 = vand.u32 4294901760, %v2856_v49 }
 0x813   : > { %2888 = vmatmul.f32.vlgmr.msrb.gmra.mxu2 %v2820_v24  ;;  %2914 = vmatmul.f32.vlgmr.msrb.gmra.mxu3 %v2821_v56  ;;  %v3016_v24 = vand.u32 4294901760, %v3015_v54 }
 0x814   : > { %2938 = vmatpush.msrb.mxu0 %v2849_v26  ;;  %2846 = vmatpush.msra.mxu1 %v2845_v28 }
 0x816   : > { %2942 = vmatpush.msrb.mxu0 %v2855_v47  ;;  %2852 = vmatpush.msra.mxu1 %v2851_v20 }
 0x818   : > { %2858 = vmatpush.msra.mxu1 %v2857_v52 }
 0x819   : > { %2860 = vmatmul.f32.vlgmr.msra.gmra.mxu1 %v2819_v11  ;;  %2944 = vmatmul.f32.vlgmr.msrb.gmra.mxu0 %v2819_v11 }
 0x81a   : > { %2962 = vmatpush.msrb.mxu1 %v2813_v36 }
 0x81c   : > { %2964 = vmatpush.msrb.mxu1 %v2815_v63 }
 0x81e   : > { %2966 = vmatpush.msrb.mxu1 %v2817_v51 }
 0x821   : > { %2968 = vmatmul.f32.vlgmr.msrb.gmra.mxu1 %v2819_v11 }
 0x88e   : > { %v2825_v50 = vpop.f32.mrf.mxu0 }
 0x88f   : > { %v2826_v30 = vadd.f32 %v2825_v50, %v2794_v32 }
 0x896   : > { %v2861_v0 = vpop.f32.mrf.mxu1  ;;  %v2889_v4 = vpop.f32.mrf.mxu2 }
 0x897   : > { %v2862_v10 = vadd.f32 %v2861_v0, %v2826_v30  ;;  %v2915_v21 = vpop.f32.mrf.mxu3  ;;  %v2945_v60 = vpop.f32.mrf.mxu0 }
 0x899   : > { %v2890_v62 = vadd.f32 %v2889_v4, %v2862_v10 }
 0x89b   : > { %v2916_v22 = vadd.f32 %v2915_v21, %v2890_v62 }
 0x89d   : > { %v2946_v35 = vadd.f32 %v2945_v60, %v2916_v22 }
 0x89e   : > { %v2969_v27 = vpop.f32.mrf.mxu1 }
 0x89f   : > { %v2970_v18 = vadd.f32 %v2969_v27, %v2946_v35 }
 0x8a1   : > { %v2972_v44 = vmax.f32 %v2970_v18, 0.0 }
 0x8a3   : > { %v2973_v17 = vmul.f32 %v7179_v1, %v2972_v44 }
 0x8a5   : > { %2976 = vrot.lane.b32.xlu1 %v2973_v17, %s6416_s24  ;;  %2980 = vrot.lane.b32.xlu0 %v2973_v17, %s7994_s25  ;;  %v3008_v38 = vand.u32 4294901760, %v2973_v17 }
 0x8a7   : > { %v3041_v29 = vsub.f32 %v2973_v17, %v3008_v38 }
 0x8a9   : > { %v3042_v11 = vand.u32 4294901760, %v3041_v29 }
 0x8ab   : > { %v3043_v16 = vsub.f32 %v3041_v29, %v3042_v11 }
 0x8ad   : > { %3203 = vperm.xlu1 %6260, %v6219_v34   ;;  %2987 = vperm.xlu0 %6259, %v2984_v9   ;;  %v3044_v7 = vand.u32 4294901760, %v3043_v16 }
 0x8b5   : > { %3223 = vperm.xlu1 %6260, %v6224_v57   ;;  %3209 = vperm.xlu0 %6259, %v6220_v42   ;;  %v6221_v42 = vld [vmem:[%s7979_s2 + $0x18] sm:$0xff] }
 0x8bd   : > { %3228 = vperm.xlu0 %6259, %v6225_v3   ;;  %v3237_v3 = vsel %vm550_vm0, %v6221_v42, 0 }
 0x917   : > { %v2977_v19 = vpop.permute.xlu1 %2976  ;;  %v2981_v37 = vpop.permute.xlu0 %2980 }
 0x918   : > { %v2979_v61 = vsel %vm2783_vm13, 0.0, %v2977_v19  ;;  %v2983_v40 = vsel %vm2788_vm14, %v2981_v37, 0.0 }
 0x919   : > { %v3010_v6 = vand.u32 4294901760, %v2979_v61  ;;  %v3006_v2 = vand.u32 4294901760, %v2983_v40 }
 0x91b   : > { %v3047_v5 = vsub.f32 %v2979_v61, %v3010_v6  ;;  %v3035_v23 = vsub.f32 %v2983_v40, %v3006_v2  ;;  %3007 = vmatpush.msra.mxu2 %v3006_v2  ;;  %3099 = vmatpush.msra.mxu1 %v3006_v2 }
 0x91d   : > { %v3036_v63 = vand.u32 4294901760, %v3035_v23  ;;  %3009 = vmatpush.msra.mxu2 %v3008_v38  ;;  %3072 = vmatpush.msra.mxu0 %v3035_v23  ;;  %v3048_v56 = vand.u32 4294901760, %v3047_v5 }
 0x91e   : > { %3101 = vmatpush.msra.mxu1 %v3008_v38 }
 0x91f   : > { %v3037_v45 = vsub.f32 %v3035_v23, %v3036_v63  ;;  %3011 = vmatpush.msra.mxu2 %v3010_v6  ;;  %3075 = vmatpush.msra.mxu0 %v3041_v29  ;;  %v3049_v58 = vsub.f32 %v3047_v5, %v3048_v56  ;;  %v2988_v36 = vpop.permute.xlu0 %2987  ;;  %v3204_v23 = vpop.permute.xlu1 %3203 }
 0x920   : > { %3103 = vmatpush.msra.mxu1 %v3010_v6  ;;  %3017 = vmatmul.f32.vlgmr.msra.gmra.mxu2 %v3016_v24 }
 0x921   : > { %v3038_v25 = vand.u32 4294901760, %v3037_v45  ;;  %3127 = vmatpush.msrb.mxu2 %v3036_v63  ;;  %3078 = vmatpush.msra.mxu0 %v3047_v5  ;;  %v3050_v46 = vand.u32 4294901760, %v3049_v58 }
 0x922   : > { %3081 = vmatmul.f32.vlgmr.msra.gmra.mxu0 %v3013_v8  ;;  %3107 = vmatmul.f32.vlgmr.msra.gmra.mxu1 %v3014_v39 }
 0x923   : > { %3131 = vmatpush.msrb.mxu2 %v3042_v11  ;;  %3039 = vmatpush.msra.mxu3 %v3038_v25 }
 0x925   : > { %3135 = vmatpush.msrb.mxu2 %v3048_v56  ;;  %3045 = vmatpush.msra.mxu3 %v3044_v7 }
 0x927   : > { %3051 = vmatpush.msra.mxu3 %v3050_v46  ;;  %v3210_v45 = vpop.permute.xlu0 %3209 }
 0x928   : > { %3053 = vmatmul.f32.vlgmr.msra.gmra.mxu3 %v3012_v33  ;;  %3137 = vmatmul.f32.vlgmr.msrb.gmra.mxu2 %v3012_v33 }
 0x929   : > { %3155 = vmatpush.msrb.mxu3 %v3006_v2  ;;  %v6223_v2 = vld [vmem:[%s7979_s2 + $0x28] sm:$0xff] }
 0x92a   : > { %v3243_v56 = vsel %vm550_vm0, %v6223_v2, 0 }
 0x92b   : > { %3157 = vmatpush.msrb.mxu3 %v3008_v38  ;;  %v6222_v38 = vld [vmem:[%s7979_s2 + $0x20] sm:$0xff]  ;;  %v3278_v7 = vand.u32 4294901760, %v3243_v56 }
 0x92c   : > { %v3240_v37 = vsel %vm550_vm0, %v6222_v38, 0 }
 0x92d   : > { %3159 = vmatpush.msrb.mxu3 %v3010_v6  ;;  %v3270_v54 = vand.u32 4294901760, %v3240_v37 }
 0x92f   : > { %v3271_v24 = vsub.f32 %v3240_v37, %v3270_v54 }
 0x930   : > { %3161 = vmatmul.f32.vlgmr.msrb.gmra.mxu3 %v3012_v33  ;;  %v3262_v33 = vand.u32 4294901760, %v3237_v3 }
 0x931   : > { %v3272_v58 = vand.u32 4294901760, %v3271_v24 }
 0x932   : > { %v3263_v19 = vsub.f32 %v3237_v3, %v3262_v33 }
 0x934   : > { %v3264_v40 = vand.u32 4294901760, %v3263_v19 }
 0x936   : > { %v3265_v11 = vsub.f32 %v3263_v19, %v3264_v40 }
 0x938   : > { %v3266_v25 = vand.u32 4294901760, %v3265_v11 }
 0x99f   : > { %v3082_v26 = vpop.f32.mrf.mxu0  ;;  %v3108_v31 = vpop.f32.mrf.mxu1 }
 0x9a3   : > { %v3018_v51 = vpop.f32.mrf.mxu2 }
 0x9a4   : > { %v3019_v14 = vadd.f32 %v3018_v51, %v2988_v36  ;;  %v3273_v36 = vsub.f32 %v3271_v24, %v3272_v58 }
 0x9ab   : > { %v3054_v59 = vpop.f32.mrf.mxu3  ;;  %v3138_v48 = vpop.f32.mrf.mxu2 }
 0x9ac   : > { %v3055_v13 = vadd.f32 %v3054_v59, %v3019_v14  ;;  %v3279_v14 = vsub.f32 %v3243_v56, %v3278_v7 }
 0x9ae   : > { %v3083_v47 = vadd.f32 %v3082_v26, %v3055_v13  ;;  %v3274_v13 = vand.u32 4294901760, %v3273_v36 }
 0x9b0   : > { %v3109_v15 = vadd.f32 %v3108_v31, %v3083_v47  ;;  %v3280_v31 = vand.u32 4294901760, %v3279_v14 }
 0x9b2   : > { %v3139_v28 = vadd.f32 %v3138_v48, %v3109_v15  ;;  %v3281_v48 = vsub.f32 %v3279_v14, %v3280_v31 }
 0x9b3   : > { %v3162_v49 = vpop.f32.mrf.mxu3 }
 0x9b4   : > { %v3163_v20 = vadd.f32 %v3162_v49, %v3139_v28  ;;  %v3282_v15 = vand.u32 4294901760, %v3281_v48 }
 0x9b6   : > { %v3165_v52 = vmul.f32 %v7179_v1, %v3163_v20 }
 0x9b8   : > { %v3166_v50 = vadd.f32 %v3165_v52, %v7176_v43 }
 0x9ba   : > { %v3171_v32 = vsel %vm1211_vm3, %v3166_v50, 0.0 }
 0x9bb   : > { %v3172_v30 = vrot.slane %v3171_v32, 4 }
 0x9bd   : > { %v3173_v0 = vadd.f32 %v3172_v30, %v3171_v32  ;;  %v3224_v32 = vpop.permute.xlu1 %3223 }
 0x9bf   : > { %v3174_v4 = vrot.slane %v3173_v0, 2 }
 0x9c1   : > { %v3175_v10 = vadd.f32 %v3174_v4, %v3173_v0 }
 0x9c3   : > { %v3176_v21 = vrot.slane %v3175_v10, 1 }
 0x9c5   : > { %v3177_v62 = vadd.f32 %v3176_v21, %v3175_v10 }
 0x9c7   : > { %v3178_v60 = vmul.f32 %v3177_v62, %v7171_v41 }
 0x9c9   : > { %v3179_v22 = vsub.f32 %v3166_v50, %v3178_v60  ;;  %v3229_v60 = vpop.permute.xlu0 %3228 }
 0x9cb   : > { %v3180_v35 = vmul.f32 %v3179_v22, %v3179_v22 }
 0x9cd   : > { %v3181_v27 = vsel %vm1211_vm3, %v3180_v35, 0.0 }
 0x9ce   : > { %v3182_v18 = vrot.slane %v3181_v27, 4 }
 0x9d0   : > { %v3183_v44 = vadd.f32 %v3182_v18, %v3181_v27 }
 0x9d2   : > { %v3184_v17 = vrot.slane %v3183_v44, 2 }
 0x9d4   : > { %v3185_v1 = vadd.f32 %v3184_v17, %v3183_v44 }
 0x9d6   : > { %v3186_v34 = vrot.slane %v3185_v1, 1 }
 0x9d8   : > { %v3187_v43 = vadd.f32 %v3186_v34, %v3185_v1 }
 0x9da   : > { %v3188_v9 = vmul.f32 %v3187_v43, %v7171_v41 }
 0x9dc   : > { %v3189_v57 = vadd.f32 1e-05, %v3188_v9 }
 0x9de   : > { %6331 = vrsqrt.f32 %v3189_v57  ;;  %vm3196_vm4 = vweird.f32 %v3189_v57 }
 0x9e4   : > { %v6332_v53 = vpop.eup %6331 }
 0x9e5   : > { %v3191_v12 = vmul.f32 %v6332_v53, %v3189_v57  ;;  %vm3197_vm15 = vweird.f32 %v6332_v53 }
 0x9e6   : > { %vm3198_vm5 = vmor %vm3196_vm4, %vm3197_vm15 }
 0x9e7   : > { %v3192_v8 = vmul.f32 %v6332_v53, %v3191_v12 }
 0x9e9   : > { %v3193_v39 = vmul.f32 0.5, %v3192_v8 }
 0x9eb   : > { %v3194_v29 = vsub.f32 1.5, %v3193_v39 }
 0x9ed   : > { %v3195_v61 = vmul.f32 %v6332_v53, %v3194_v29 }
 0x9ef   : > { %v3199_v6 = vsel %vm3198_vm5, %v6332_v53, %v3195_v61 }
 0x9f0   : > { %v3200_v5 = vmul.f32 %v3199_v6, %v3179_v22 }
 0x9f2   : > { %v3206_v63 = vmul.f32 %v3204_v23, %v3200_v5 }
 0x9f4   : > { %v7236_v16 = vadd.f32 %v3210_v45, %v3206_v63 }
 0x9f6   : > { %v3260_v46 = vand.u32 4294901760, %v7236_v16 }
 0x9f8   : > { %3261 = vmatpush.msrb.mxu0 %v3260_v46  ;;  %3371 = vmatpush.msra.mxu3 %v3260_v46  ;;  %v3303_v51 = vsub.f32 %v7236_v16, %v3260_v46 }
 0x9f9   : > { %3267 = vmatmul.f32.vlgmr.msrb.gmra.mxu0 %v3266_v25  ;;  %3375 = vmatmul.f32.vlgmr.msra.gmra.mxu3 %v3264_v40 }
 0x9fa   : > { %3338 = vmatpush.msra.mxu2 %v3303_v51  ;;  %v3304_v59 = vand.u32 4294901760, %v3303_v51 }
 0x9fb   : > { %3341 = vmatmul.f32.vlgmr.msra.gmra.mxu2 %v3263_v19 }
 0x9fc   : > { %3409 = vmatpush.msra.mxu0 %v3304_v59  ;;  %v3305_v26 = vsub.f32 %v3303_v51, %v3304_v59 }
 0x9fe   : > { %v3306_v47 = vand.u32 4294901760, %v3305_v26 }
 0xa00   : > { %3307 = vmatpush.msrb.mxu1 %v3306_v47 }
 0xa01   : > { %3275 = vmatmul.f32.gmra.mxu0 %v3274_v13  ;;  %3309 = vmatmul.f32.vlgmr.msrb.gmra.mxu1 %v3262_v33 }
 0xa02   : > { %3439 = vmatpush.msra.mxu1 %v3260_v46  ;;  %3381 = vmatmul.f32.gmra.mxu3 %v3272_v58 }
 0xa03   : > { %3346 = vmatmul.f32.gmra.mxu2 %v3271_v24 }
 0xa09   : > { %3283 = vmatmul.f32.gmra.mxu0 %v3282_v15  ;;  %3313 = vmatmul.f32.gmra.mxu1 %v3270_v54 }
 0xa0a   : > { %3387 = vmatmul.f32.gmra.mxu3 %v3280_v31 }
 0xa0b   : > { %3351 = vmatmul.f32.gmra.mxu2 %v3279_v14 }
 0xa11   : > { %3317 = vmatmul.f32.gmra.mxu1 %v3278_v7  ;;  %3411 = vmatmul.f32.vlgmr.msra.gmra.mxu0 %v3262_v33 }
 0xa19   : > { %3415 = vmatmul.f32.gmra.mxu0 %v3270_v54  ;;  %3441 = vmatmul.f32.vlgmr.msra.gmra.mxu1 %v3262_v33 }
 0xa21   : > { %3445 = vmatmul.f32.gmra.mxu1 %v3270_v54  ;;  %3419 = vmatmul.f32.gmra.mxu0 %v3278_v7 }
 0xa29   : > { %3449 = vmatmul.f32.gmra.mxu1 %v3278_v7 }
 0xa76   : > { %v3268_v28 = vpop.f32.mrf.mxu0 }
 0xa77   : > { %v3269_v30 = vadd.f32 %v3268_v28, %v3224_v32 }
 0xa7c   : > { %v3376_v10 = vpop.f32.mrf.mxu3 }
 0xa7e   : > { %v3276_v49 = vpop.f32.mrf.mxu0  ;;  %v3310_v20 = vpop.f32.mrf.mxu1 }
 0xa7f   : > { %v3342_v0 = vpop.f32.mrf.mxu2  ;;  %v3311_v4 = vadd.f32 %v3310_v20, %v3269_v30  ;;  %v3277_v35 = vadd.f32 %v3276_v49, %v3229_v60 }
 0xa81   : > { %v3343_v62 = vadd.f32 %v3342_v0, %v3311_v4 }
 0xa83   : > { %v3377_v27 = vadd.f32 %v3376_v10, %v3343_v62 }
 0xa85   : > { %v3382_v9 = vpop.f32.mrf.mxu3 }
 0xa86   : > { %v7240_v52 = vpop.f32.mrf.mxu0  ;;  %v3314_v50 = vpop.f32.mrf.mxu1 }
 0xa87   : > { %v3315_v18 = vadd.f32 %v3314_v50, %v3277_v35  ;;  %v3347_v44 = vpop.f32.mrf.mxu2 }
 0xa89   : > { %v3348_v34 = vadd.f32 %v3347_v44, %v3315_v18 }
 0xa8b   : > { %v3383_v42 = vadd.f32 %v3382_v9, %v3348_v34 }
 0xa8e   : > { %v7242_v21 = vpop.f32.mrf.mxu1  ;;  %v3412_v22 = vpop.f32.mrf.mxu0 }
 0xa8f   : > { %v3413_v17 = vadd.f32 %v3412_v22, %v3377_v27 }
 0xa96   : > { %v3442_v1 = vpop.f32.mrf.mxu1  ;;  %v3416_v57 = vpop.f32.mrf.mxu0 }
 0xa97   : > { %v7244_v43 = vadd.f32 %v3442_v1, %v3413_v17  ;;  %v3417_v3 = vadd.f32 %v3416_v57, %v3383_v42 }
 0xa99   : > { %3453 = vxpose.xlu1.b32.start.end [1/1] (short) (narrow) %v7244_v43, 64 }
 0xa9e   : > { %v3446_v53 = vpop.f32.mrf.mxu1 }
 0xa9f   : > { %v7247_v12 = vadd.f32 %v3446_v53, %v3417_v3 }
 0xaa1   : > { %v3510_v33 = vsel %vm825_vm1, %v7247_v12, 0 }
 0xaa2   : > { %v3527_v8 = vand.u32 4294901760, %v3510_v33 }
 0xaa4   : > { %v3610_v38 = vsub.f32 %v3510_v33, %v3527_v8  ;;  %3528 = vmatpush.msrb.mxu2 %v3527_v8  ;;  %3723 = vmatpush.msrb.mxu1 %v3527_v8 }
 0xaa6   : > { %3665 = vmatpush.msrb.mxu0 %v3610_v38  ;;  %v3611_v39 = vand.u32 4294901760, %v3610_v38 }
 0xaa8   : > { %3791 = vmatpush.msra.mxu2 %v3611_v39  ;;  %v3612_v19 = vsub.f32 %v3610_v38, %v3611_v39 }
 0xaaa   : > { %v3613_v37 = vand.u32 4294901760, %v3612_v19 }
 0xaac   : > { %3614 = vmatpush.msrb.mxu3 %v3613_v37  ;;  %v7277_v37 = vpop.f32.mrf.mxu3 }
 0xaae   : > { %3841 = vmatpush.msra.mxu3 %v3527_v8 }
 0xb3d   : > { %v3469_v29 = vpop.trf.xlu1 }
 0xb3e   : > { %v3486_v61 = vsel %vm800_vm2, %v3469_v29, 0  ;;  %v7279_v29 = vpop.f32.mrf.mxu2 }
 0xb3f   : > { %v7252_v40 = vand.u32 4294901760, %v3486_v61 }
 0xb41   : > { %v3530_v54 = vsub.f32 %v3486_v61, %v7252_v40  ;;  %3616 = vmatmul.f32.vlgmr.msrb.gmra.mxu3 %v7252_v40 }
 0xb43   : > { %v3531_v6 = vand.u32 4294901760, %v3530_v54  ;;  %3668 = vmatmul.f32.vlgmr.msrb.gmra.mxu0 %v3530_v54 }
 0xb45   : > { %v3532_v2 = vsub.f32 %v3530_v54, %v3531_v6  ;;  %3727 = vmatmul.f32.vlgmr.msrb.gmra.mxu1 %v3531_v6  ;;  %v3470_v5 = vpop.trf.xlu1 }
 0xb46   : > { %v3489_v23 = vsel %vm800_vm2, %v3470_v5, 0 }
 0xb47   : > { %v3533_v11 = vand.u32 4294901760, %v3532_v2  ;;  %v7257_v24 = vand.u32 4294901760, %v3489_v23 }
 0xb49   : > { %v3538_v63 = vsub.f32 %v3489_v23, %v7257_v24  ;;  %3534 = vmatmul.f32.vlgmr.msrb.gmra.mxu2 %v3533_v11  ;;  %3620 = vmatmul.f32.gmra.mxu3 %v7257_v24 }
 0xb4b   : > { %3673 = vmatmul.f32.gmra.mxu0 %v3538_v63  ;;  %v3539_v56 = vand.u32 4294901760, %v3538_v63 }
 0xb4d   : > { %3733 = vmatmul.f32.gmra.mxu1 %v3539_v56  ;;  %v3471_v45 = vpop.trf.xlu1  ;;  %v3540_v25 = vsub.f32 %v3538_v63, %v3539_v56 }
 0xb4e   : > { %v3492_v58 = vsel %vm800_vm2, %v3471_v45, 0  ;;  %v7289_v45 = vpop.f32.mrf.mxu0 }
 0xb4f   : > { %v7262_v7 = vand.u32 4294901760, %v3492_v58  ;;  %v3541_v46 = vand.u32 4294901760, %v3540_v25  ;;  %v7291_v25 = vpop.f32.mrf.mxu1 }
 0xb51   : > { %v3546_v51 = vsub.f32 %v3492_v58, %v7262_v7  ;;  %3542 = vmatmul.f32.gmra.mxu2 %v3541_v46  ;;  %3624 = vmatmul.f32.gmra.mxu3 %v7262_v7 }
 0xb53   : > { %3678 = vmatmul.f32.gmra.mxu0 %v3546_v51  ;;  %v3547_v36 = vand.u32 4294901760, %v3546_v51 }
 0xb55   : > { %3739 = vmatmul.f32.gmra.mxu1 %v3547_v36  ;;  %v3472_v14 = vpop.trf.xlu1  ;;  %v3548_v59 = vsub.f32 %v3546_v51, %v3547_v36 }
 0xb56   : > { %v3495_v26 = vsel %vm800_vm2, %v3472_v14, 0 }
 0xb57   : > { %v3553_v13 = vand.u32 4294901760, %v3495_v26  ;;  %v3549_v31 = vand.u32 4294901760, %v3548_v59 }
 0xb59   : > { %v3554_v47 = vsub.f32 %v3495_v26, %v3553_v13  ;;  %3550 = vmatmul.f32.gmra.mxu2 %v3549_v31  ;;  %3628 = vmatmul.f32.gmra.mxu3 %v3553_v13 }
 0xb5b   : > { %3683 = vmatmul.f32.gmra.mxu0 %v3554_v47  ;;  %v3555_v48 = vand.u32 4294901760, %v3554_v47 }
 0xb5d   : > { %3745 = vmatmul.f32.gmra.mxu1 %v3555_v48  ;;  %v3473_v15 = vpop.trf.xlu1  ;;  %v3556_v28 = vsub.f32 %v3554_v47, %v3555_v48 }
 0xb5e   : > { %v3498_v49 = vsel %vm800_vm2, %v3473_v15, 0 }
 0xb5f   : > { %v3561_v20 = vand.u32 4294901760, %v3498_v49  ;;  %v3557_v50 = vand.u32 4294901760, %v3556_v28 }
 0xb61   : > { %v3562_v32 = vsub.f32 %v3498_v49, %v3561_v20  ;;  %3558 = vmatmul.f32.gmra.mxu2 %v3557_v50  ;;  %3632 = vmatmul.f32.gmra.mxu3 %v3561_v20 }
 0xb63   : > { %3688 = vmatmul.f32.gmra.mxu0 %v3562_v32  ;;  %v3563_v30 = vand.u32 4294901760, %v3562_v32 }
 0xb65   : > { %3751 = vmatmul.f32.gmra.mxu1 %v3563_v30  ;;  %v3474_v0 = vpop.trf.xlu1  ;;  %v3564_v4 = vsub.f32 %v3562_v32, %v3563_v30 }
 0xb66   : > { %v3501_v10 = vsel %vm800_vm2, %v3474_v0, 0 }
 0xb67   : > { %v3569_v62 = vand.u32 4294901760, %v3501_v10  ;;  %v3565_v60 = vand.u32 4294901760, %v3564_v4 }
 0xb69   : > { %v3570_v22 = vsub.f32 %v3501_v10, %v3569_v62  ;;  %3566 = vmatmul.f32.gmra.mxu2 %v3565_v60  ;;  %3636 = vmatmul.f32.gmra.mxu3 %v3569_v62 }
 0xb6b   : > { %3693 = vmatmul.f32.gmra.mxu0 %v3570_v22  ;;  %v3571_v35 = vand.u32 4294901760, %v3570_v22 }
 0xb6d   : > { %3757 = vmatmul.f32.gmra.mxu1 %v3571_v35  ;;  %v3475_v27 = vpop.trf.xlu1  ;;  %v3572_v18 = vsub.f32 %v3570_v22, %v3571_v35 }
 0xb6e   : > { %v3504_v44 = vsel %vm800_vm2, %v3475_v27, 0 }
 0xb6f   : > { %v3577_v17 = vand.u32 4294901760, %v3504_v44  ;;  %v3573_v1 = vand.u32 4294901760, %v3572_v18 }
 0xb71   : > { %v3578_v34 = vsub.f32 %v3504_v44, %v3577_v17  ;;  %3574 = vmatmul.f32.gmra.mxu2 %v3573_v1  ;;  %3640 = vmatmul.f32.gmra.mxu3 %v3577_v17 }
 0xb73   : > { %3698 = vmatmul.f32.gmra.mxu0 %v3578_v34  ;;  %v3579_v9 = vand.u32 4294901760, %v3578_v34 }
 0xb75   : > { %3763 = vmatmul.f32.gmra.mxu1 %v3579_v9  ;;  %v3476_v57 = vpop.trf.xlu1  ;;  %v3580_v42 = vsub.f32 %v3578_v34, %v3579_v9 }
 0xb76   : > { %v3507_v3 = vsel %vm800_vm2, %v3476_v57, 0 }
 0xb77   : > { %v3585_v53 = vand.u32 4294901760, %v3507_v3  ;;  %v3581_v33 = vand.u32 4294901760, %v3580_v42 }
 0xb79   : > { %v3586_v8 = vsub.f32 %v3507_v3, %v3585_v53  ;;  %3582 = vmatmul.f32.gmra.mxu2 %v3581_v33  ;;  %3644 = vmatmul.f32.gmra.mxu3 %v3585_v53 }
 0xb7b   : > { %3703 = vmatmul.f32.gmra.mxu0 %v3586_v8  ;;  %v3587_v38 = vand.u32 4294901760, %v3586_v8 }
 0xb7d   : > { %3769 = vmatmul.f32.gmra.mxu1 %v3587_v38  ;;  %v3588_v39 = vsub.f32 %v3586_v8, %v3587_v38 }
 0xb7f   : > { %v3589_v19 = vand.u32 4294901760, %v3588_v39 }
 0xb81   : > { %3590 = vmatmul.f32.gmra.mxu2 %v3589_v19  ;;  %3843 = vmatmul.f32.vlgmr.msra.gmra.mxu3 %v7252_v40 }
 0xb89   : > { %3793 = vmatmul.f32.vlgmr.msra.gmra.mxu2 %v7252_v40  ;;  %3847 = vmatmul.f32.gmra.mxu3 %v7257_v24 }
 0xb91   : > { %3797 = vmatmul.f32.gmra.mxu2 %v7257_v24  ;;  %3851 = vmatmul.f32.gmra.mxu3 %v7262_v7 }
 0xb99   : > { %3801 = vmatmul.f32.gmra.mxu2 %v7262_v7  ;;  %3855 = vmatmul.f32.gmra.mxu3 %v3553_v13 }
 0xba1   : > { %3805 = vmatmul.f32.gmra.mxu2 %v3553_v13  ;;  %3859 = vmatmul.f32.gmra.mxu3 %v3561_v20 }
 0xba9   : > { %3809 = vmatmul.f32.gmra.mxu2 %v3561_v20  ;;  %3863 = vmatmul.f32.gmra.mxu3 %v3569_v62 }
 0xbb1   : > { %3813 = vmatmul.f32.gmra.mxu2 %v3569_v62  ;;  %3867 = vmatmul.f32.gmra.mxu3 %v3577_v17 }
 0xbb9   : > { %3817 = vmatmul.f32.gmra.mxu2 %v3577_v17  ;;  %3871 = vmatmul.f32.gmra.mxu3 %v3585_v53 }
 0xbc0   : > { %v3669_v46 = vpop.f32.mrf.mxu0 }
 0xbc1   : > { %3821 = vmatmul.f32.gmra.mxu2 %v3585_v53 }
 0xbc2   : > { %v3728_v51 = vpop.f32.mrf.mxu1 }
 0xbc4   : > { %v3617_v61 = vpop.f32.mrf.mxu3 }
 0xbc8   : > { %v7293_v59 = vpop.f32.mrf.mxu0 }
 0xbca   : > { %v7295_v47 = vpop.f32.mrf.mxu1 }
 0xbcc   : > { %v3535_v40 = vpop.f32.mrf.mxu2  ;;  %v7281_v54 = vpop.f32.mrf.mxu3 }
 0xbcd   : > { %v3618_v26 = vadd.f32 %v3617_v61, %v3535_v40 }
 0xbcf   : > { %v3670_v48 = vadd.f32 %v3669_v46, %v3618_v26 }
 0xbd0   : > { %v3679_v15 = vpop.f32.mrf.mxu0 }
 0xbd1   : > { %v3729_v28 = vadd.f32 %v3728_v51, %v3670_v48 }
 0xbd2   : > { %v7299_v30 = vpop.f32.mrf.mxu1 }
 0xbd4   : > { %v7283_v6 = vpop.f32.mrf.mxu2  ;;  %v7285_v2 = vpop.f32.mrf.mxu3 }
 0xbd8   : > { %v3684_v22 = vpop.f32.mrf.mxu0 }
 0xbda   : > { %v3746_v35 = vpop.f32.mrf.mxu1 }
 0xbdc   : > { %v7287_v5 = vpop.f32.mrf.mxu2  ;;  %v3629_v23 = vpop.f32.mrf.mxu3 }
 0xbe0   : > { %v3689_v44 = vpop.f32.mrf.mxu0 }
 0xbe2   : > { %v3752_v17 = vpop.f32.mrf.mxu1 }
 0xbe4   : > { %v3559_v11 = vpop.f32.mrf.mxu2  ;;  %v3633_v24 = vpop.f32.mrf.mxu3 }
 0xbe5   : > { %v3630_v40 = vadd.f32 %v3629_v23, %v3559_v11  ;;  %v3626_v23 = vadd.f32 %v7285_v2, %v7287_v5 }
 0xbe8   : > { %v3694_v9 = vpop.f32.mrf.mxu0 }
 0xbea   : > { %v3758_v42 = vpop.f32.mrf.mxu1 }
 0xbec   : > { %v3567_v63 = vpop.f32.mrf.mxu2  ;;  %v3637_v56 = vpop.f32.mrf.mxu3 }
 0xbed   : > { %v3634_v46 = vadd.f32 %v3633_v24, %v3567_v63 }
 0xbf0   : > { %v3699_v8 = vpop.f32.mrf.mxu0 }
 0xbf2   : > { %v3764_v61 = vpop.f32.mrf.mxu1 }
 0xbf4   : > { %v3575_v58 = vpop.f32.mrf.mxu2  ;;  %v3641_v7 = vpop.f32.mrf.mxu3 }
 0xbf5   : > { %v3638_v53 = vadd.f32 %v3637_v56, %v3575_v58 }
 0xbf7   : > { %v3695_v39 = vadd.f32 %v3694_v9, %v3638_v53 }
 0xbf9   : > { %v3759_v26 = vadd.f32 %v3758_v42, %v3695_v39 }
 0xbfa   : > { %v3770_v11 = vpop.f32.mrf.mxu1 }
 0xbfc   : > { %v3583_v36 = vpop.f32.mrf.mxu2  ;;  %v3645_v14 = vpop.f32.mrf.mxu3 }
 0xbfd   : > { %v3642_v33 = vadd.f32 %v3641_v7, %v3583_v36  ;;  %v3622_v36 = vadd.f32 %v7281_v54, %v7283_v6 }
 0xbff   : > { %v3700_v19 = vadd.f32 %v3699_v8, %v3642_v33  ;;  %v3675_v33 = vadd.f32 %v7293_v59, %v3622_v36  ;;  %v3680_v8 = vadd.f32 %v3679_v15, %v3626_v23 }
 0xc04   : > { %v3591_v13 = vpop.f32.mrf.mxu2  ;;  %v3844_v31 = vpop.f32.mrf.mxu3 }
 0xc05   : > { %v3646_v51 = vadd.f32 %v3645_v14, %v3591_v13 }
 0xc0c   : > { %v3794_v49 = vpop.f32.mrf.mxu2  ;;  %v7297_v20 = vpop.f32.mrf.mxu3 }
 0xc0d   : > { %v3795_v50 = vadd.f32 %v3794_v49, %v3729_v28 }
 0xc0f   : > { %v3845_v32 = vadd.f32 %v3844_v31, %v3795_v50  ;;  %v3765_v31 = vadd.f32 %v3764_v61, %v3700_v19 }
 0xc11   : > { %v3875_v0 = vmul.f32 0.5, %v3845_v32  ;;  %v3685_v32 = vadd.f32 %v3684_v22, %v3630_v40 }
 0xc13   : > { %v7302_v4 = vadd.f32 %v3875_v0, %v6630_v55  ;;  %v3704_v0 = vpop.f32.mrf.mxu0  ;;  %v3747_v24 = vadd.f32 %v3746_v35, %v3685_v32 }
 0xc14   : > { %v7304_v10 = vpop.f32.mrf.mxu2  ;;  %v7306_v62 = vpop.f32.mrf.mxu3  ;;  %v3705_v41 = vadd.f32 %v3704_v0, %v3646_v51 }
 0xc15   : > { %v3891_v60 = vsel %vm1211_vm3, %v7302_v4, -inf }
 0xc16   : > { %3892 = vmax.xlane.f32.xlu1 %v3891_v60  ;;  %v3690_v60 = vadd.f32 %v3689_v44, %v3634_v46  ;;  %v3771_v14 = vadd.f32 %v3770_v11, %v3705_v41 }
 0xc18   : > { %v3753_v63 = vadd.f32 %v3752_v17, %v3690_v60  ;;  %v3735_v17 = vadd.f32 %v7295_v47, %v3675_v33 }
 0xc1c   : > { %v3802_v27 = vpop.f32.mrf.mxu2  ;;  %v3856_v18 = vpop.f32.mrf.mxu3 }
 0xc24   : > { %v3806_v1 = vpop.f32.mrf.mxu2  ;;  %v3860_v34 = vpop.f32.mrf.mxu3 }
 0xc25   : > { %v3807_v9 = vadd.f32 %v3806_v1, %v3747_v24  ;;  %v3741_v1 = vadd.f32 %v7299_v30, %v3680_v8 }
 0xc27   : > { %v3857_v2 = vadd.f32 %v3856_v18, %v3807_v9  ;;  %v3803_v39 = vadd.f32 %v3802_v27, %v3741_v1 }
 0xc29   : > { %v3878_v59 = vmul.f32 0.5, %v3857_v2  ;;  %v3853_v47 = vadd.f32 %v7306_v62, %v3803_v39 }
 0xc2b   : > { %v3886_v61 = vadd.f32 %v3878_v59, %v6630_v55 }
 0xc2c   : > { %v3810_v57 = vpop.f32.mrf.mxu2  ;;  %v3864_v3 = vpop.f32.mrf.mxu3 }
 0xc2d   : > { %v3811_v42 = vadd.f32 %v3810_v57, %v3753_v63  ;;  %v3900_v46 = vsel %vm1211_vm3, %v3886_v61, -inf }
 0xc2f   : > { %v3861_v5 = vadd.f32 %v3860_v34, %v3811_v42 }
 0xc31   : > { %v3879_v15 = vmul.f32 0.5, %v3861_v5 }
 0xc33   : > { %v3887_v30 = vadd.f32 %v3879_v15, %v6630_v55 }
 0xc34   : > { %v3814_v38 = vpop.f32.mrf.mxu2  ;;  %v3868_v48 = vpop.f32.mrf.mxu3 }
 0xc35   : > { %v3815_v49 = vadd.f32 %v3814_v38, %v3759_v26  ;;  %v3799_v38 = vadd.f32 %v7304_v10, %v3735_v17  ;;  %v3877_v10 = vmul.f32 0.5, %v3853_v47  ;;  %v3903_v27 = vsel %vm1211_vm3, %v3887_v30, -inf }
 0xc37   : > { %v3865_v58 = vadd.f32 %v3864_v3, %v3815_v49  ;;  %v3849_v34 = vadd.f32 %v7297_v20, %v3799_v38  ;;  %v3885_v51 = vadd.f32 %v3877_v10, %v6630_v55 }
 0xc39   : > { %v3880_v44 = vmul.f32 0.5, %v3865_v58  ;;  %v3876_v40 = vmul.f32 0.5, %v3849_v34  ;;  %v3897_v20 = vsel %vm1211_vm3, %v3885_v51, -inf }
 0xc3b   : > { %v3888_v41 = vadd.f32 %v3880_v44, %v6630_v55  ;;  %v3884_v26 = vadd.f32 %v3876_v40, %v6630_v55 }
 0xc3c   : > { %v3818_v28 = vpop.f32.mrf.mxu2  ;;  %v3872_v54 = vpop.f32.mrf.mxu3 }
 0xc3d   : > { %v3819_v50 = vadd.f32 %v3818_v28, %v3765_v31  ;;  %v3906_v19 = vsel %vm1211_vm3, %v3888_v41, -inf  ;;  %v3894_v62 = vsel %vm1211_vm3, %v3884_v26, -inf }
 0xc3f   : > { %v3869_v56 = vadd.f32 %v3868_v48, %v3819_v50 }
 0xc41   : > { %v3881_v7 = vmul.f32 0.5, %v3869_v56 }
 0xc43   : > { %v3889_v13 = vadd.f32 %v3881_v7, %v6630_v55 }
 0xc44   : > { %v3822_v22 = vpop.f32.mrf.mxu2 }
 0xc45   : > { %v3823_v53 = vadd.f32 %v3822_v22, %v3771_v14  ;;  %v3909_v3 = vsel %vm1211_vm3, %v3889_v13, -inf }
 0xc46   : > { %3910 = vmax.xlane.f32.xlu2 %v3909_v3 }
 0xc47   : > { %v3873_v6 = vadd.f32 %v3872_v54, %v3823_v53 }
 0xc49   : > { %v3882_v35 = vmul.f32 0.5, %v3873_v6 }
 0xc4b   : > { %v7321_v57 = vadd.f32 %v3882_v35, %v6630_v55 }
 0xc4d   : > { %v3912_v18 = vsel %vm1211_vm3, %v7321_v57, -inf }
 0xc4e   : > { %3907 = vmax.xlane.f32.xlu2 %v3906_v19  ;;  %3913 = vmax.xlane.f32.xlu0 %v3912_v18  ;;  %v6226_v19 = vld [vmem:[%s7980_s3 + $0x28] sm:$0xff]  ;;  %v4348_v18 = vrot.slane %v7244_v43, 4 }
 0xc56   : > { %3904 = vmax.xlane.f32.xlu2 %v3903_v27  ;;  %3901 = vmax.xlane.f32.xlu0 %v3900_v46 }
 0xc5e   : > { %3898 = vmax.xlane.f32.xlu2 %v3897_v20  ;;  %3895 = vmax.xlane.f32.xlu0 %v3894_v62 }
 0xcb9   : > { %v3911_v31 = vpop.xlane.xlu2 %3910 }
 0xcba   : > { %v3921_v48 = vsub.f32 %v3889_v13, %v3911_v31  ;;  %v3893_v13 = vpop.xlane.xlu1 %3892 }
 0xcbb   : > { %v3915_v3 = vsub.f32 %v7302_v4, %v3893_v13 }
 0xcbc   : > { %v3935_v28 = vmul.f32 1.442695, %v3921_v48 }
 0xcbd   : > { %v3923_v35 = vmul.f32 1.442695, %v3915_v3 }
 0xcbe   : > { %6333 = vpow2.f32 %v3935_v28 }
 0xcc1   : > { %v3908_v49 = vpop.xlane.xlu2 %3907  ;;  %v3914_v50 = vpop.xlane.xlu0 %3913 }
 0xcc2   : > { %v3920_v32 = vsub.f32 %v3888_v41, %v3908_v49  ;;  %v3922_v6 = vsub.f32 %v7321_v57, %v3914_v50 }
 0xcc4   : > { %v7337_v0 = vpop.eup %6333  ;;  %v3933_v60 = vmul.f32 1.442695, %v3920_v32  ;;  %v3937_v41 = vmul.f32 1.442695, %v3922_v6 }
 0xcc5   : > { %v3957_v56 = vsel %vm1211_vm3, %v7337_v0, 0.0 }
 0xcc6   : > { %6335 = vpow2.f32 %v3933_v60  ;;  %3958 = vadd.xlane.f32.xlu0 %v3957_v56 }
 0xcc9   : > { %v3905_v58 = vpop.xlane.xlu2 %3904  ;;  %v3902_v7 = vpop.xlane.xlu0 %3901 }
 0xcca   : > { %v3919_v36 = vsub.f32 %v3887_v30, %v3905_v58  ;;  %v3918_v23 = vsub.f32 %v3886_v61, %v3902_v7 }
 0xccc   : > { %v7341_v11 = vpop.eup %6335  ;;  %v3931_v24 = vmul.f32 1.442695, %v3919_v36  ;;  %v3929_v63 = vmul.f32 1.442695, %v3918_v23 }
 0xccd   : > { %v3954_v14 = vsel %vm1211_vm3, %v7341_v11, 0.0 }
 0xcce   : > { %6337 = vpow2.f32 %v3931_v24  ;;  %3955 = vadd.xlane.f32.xlu2 %v3954_v14 }
 0xccf   : > { %6339 = vpow2.f32 %v3929_v63 }
 0xcd1   : > { %v3899_v9 = vpop.xlane.xlu2 %3898  ;;  %v3896_v22 = vpop.xlane.xlu0 %3895 }
 0xcd2   : > { %v3917_v42 = vsub.f32 %v3885_v51, %v3899_v9  ;;  %v3916_v44 = vsub.f32 %v3884_v26, %v3896_v22 }
 0xcd4   : > { %v7345_v53 = vpop.eup %6337  ;;  %v3927_v33 = vmul.f32 1.442695, %v3917_v42  ;;  %v3925_v8 = vmul.f32 1.442695, %v3916_v44 }
 0xcd5   : > { %v7348_v54 = vpop.eup %6339  ;;  %v3951_v2 = vsel %vm1211_vm3, %v7345_v53, 0.0 }
 0xcd6   : > { %6341 = vpow2.f32 %v3927_v33  ;;  %3952 = vadd.xlane.f32.xlu0 %v3951_v2  ;;  %v3948_v5 = vsel %vm1211_vm3, %v7348_v54, 0.0 }
 0xcd7   : > { %6343 = vpow2.f32 %v3925_v8  ;;  %3949 = vadd.xlane.f32.xlu2 %v3948_v5 }
 0xcd8   : > { %6345 = vpow2.f32 %v3923_v35 }
 0xcd9   : > { %6347 = vpow2.f32 %v3937_v41 }
 0xcdc   : > { %v7355_v17 = vpop.eup %6341 }
 0xcdd   : > { %v7357_v4 = vpop.eup %6343  ;;  %v3945_v1 = vsel %vm1211_vm3, %v7355_v17, 0.0 }
 0xcde   : > { %3946 = vadd.xlane.f32.xlu0 %v3945_v1  ;;  %v3942_v57 = vsel %vm1211_vm3, %v7357_v4, 0.0  ;;  %v7363_v38 = vpop.eup %6345 }
 0xcdf   : > { %3943 = vadd.xlane.f32.xlu2 %v3942_v57  ;;  %v7365_v39 = vpop.eup %6347  ;;  %v3939_v59 = vsel %vm1211_vm3, %v7363_v38, 0.0 }
 0xce0   : > { %v3960_v15 = vsel %vm1211_vm3, %v7365_v39, 0.0 }
 0xce6   : > { %3940 = vadd.xlane.f32.xlu0 %v3939_v59 }
 0xce7   : > { %3961 = vadd.xlane.f32.xlu2 %v3960_v15 }
 0xcff   : > { %3233 = vperm.xlu2 %6261, %v6226_v19  }
 0xd0f   : > { %4350 = vxpose.xlu0.b32.start.end [1/1] (short) (narrow) %v4348_v18, 64 }
 0xd39   : > { %v3959_v34 = vpop.xlane.xlu0 %3958 }
 0xd3a   : > { %6349 = vrcp.f32 %v3959_v34  ;;  %v4064_v48 = vand.u32 2147483648, %v3959_v34  ;;  %vm4058_vm7 = vweird.f32 %v3959_v34  ;;  %v4062_v28 = vand.u32 2147483647, %v3959_v34 }
 0xd3c   : > { %v4065_v56 = vor.u32 1.1754944e-38, %v4064_v48  ;;  %vm4063_vm9 = vcmp.eq.f32.partialorder %v4062_v28, 8.507059e+37 }
 0xd40   : > { %v6350_v30 = vpop.eup %6349 }
 0xd41   : > { %v3956_v47 = vpop.xlane.xlu2 %3955  ;;  %v4054_v61 = vmul.f32 %v6350_v30, %v3959_v34  ;;  %vm4059_vm6 = vweird.f32 %v6350_v30 }
 0xd42   : > { %6351 = vrcp.f32 %v3956_v47  ;;  %vm4060_vm8 = vmor %vm4058_vm7, %vm4059_vm6  ;;  %v4047_v13 = vand.u32 2147483647, %v3956_v47  ;;  %v4049_v9 = vand.u32 2147483648, %v3956_v47  ;;  %vm4043_vm11 = vweird.f32 %v3956_v47 }
 0xd43   : > { %v4055_v10 = vsub.f32 1.0, %v4054_v61 }
 0xd44   : > { %vm7415_vm15 = vcmp.eq.f32.partialorder %v4047_v13, 8.507059e+37  ;;  %v4050_v2 = vor.u32 1.1754944e-38, %v4049_v9 }
 0xd45   : > { %v4056_v51 = vmul.f32 %v6350_v30, %v4055_v10 }
 0xd47   : > { %v4057_v62 = vadd.f32 %v6350_v30, %v4056_v51 }
 0xd48   : > { %v7380_v46 = vpop.eup %6351 }
 0xd49   : > { %v7375_v40 = vpop.xlane.xlu0 %3952  ;;  %v4039_v43 = vmul.f32 %v7380_v46, %v3956_v47  ;;  %v4061_v60 = vsel %vm4060_vm8, %v6350_v30, %v4057_v62  ;;  %vm4044_vm10 = vweird.f32 %v7380_v46 }
 0xd4a   : > { %v7377_v27 = vpop.xlane.xlu2 %3949  ;;  %6353 = vrcp.f32 %v7375_v40  ;;  %v4066_v7 = vsel %vm4063_vm9, %v4065_v56, %v4061_v60  ;;  %v4034_v5 = vand.u32 2147483648, %v7375_v40  ;;  %vm7421_vm4 = vmor %vm4043_vm11, %vm4044_vm10  ;;  %vm4028_vm5 = vweird.f32 %v7375_v40 }
 0xd4b   : > { %6355 = vrcp.f32 %v7377_v27  ;;  %v4040_v50 = vsub.f32 1.0, %v4039_v43  ;;  %v4067_v42 = vmul.f32 %v7337_v0, %v4066_v7  ;;  %v4032_v0 = vand.u32 2147483647, %v7375_v40 }
 0xd4c   : > { %v4017_v1 = vand.u32 2147483647, %v7377_v27  ;;  %vm4013_vm7 = vweird.f32 %v7377_v27  ;;  %v4019_v34 = vand.u32 2147483648, %v7377_v27 }
 0xd4d   : > { %v4041_v36 = vmul.f32 %v7380_v46, %v4040_v50  ;;  %v4105_v57 = vsel %vm1211_vm3, %v4067_v42, 0  ;;  %vm7441_vm8 = vcmp.eq.f32.partialorder %v4032_v0, 8.507059e+37 }
 0xd4e   : > { %v7446_v62 = vand.u32 4294901760, %v4105_v57  ;;  %vm7452_vm10 = vcmp.eq.f32.partialorder %v4017_v1, 8.507059e+37  ;;  %v4020_v13 = vor.u32 1.1754944e-38, %v4019_v34 }
 0xd4f   : > { %v4042_v44 = vadd.f32 %v7380_v46, %v4041_v36 }
 0xd50   : > { %v7386_v20 = vpop.eup %6353  ;;  %v7475_v42 = vsub.f32 %v4105_v57, %v7446_v62 }
 0xd51   : > { %v7384_v26 = vpop.xlane.xlu0 %3946  ;;  %v7390_v49 = vpop.eup %6355  ;;  %v4024_v32 = vmul.f32 %v7386_v20, %v7375_v40  ;;  %v4046_v15 = vsel %vm7421_vm4, %v7380_v46, %v4042_v44  ;;  %vm4029_vm6 = vweird.f32 %v7386_v20  ;;  %v4035_v46 = vor.u32 1.1754944e-38, %v4034_v5 }
 0xd52   : > { %v7388_v31 = vpop.xlane.xlu2 %3943  ;;  %6357 = vrcp.f32 %v7384_v26  ;;  %v4009_v58 = vmul.f32 %v7390_v49, %v7377_v27  ;;  %v4051_v48 = vsel %vm7415_vm15, %v4050_v2, %v4046_v15  ;;  %vm4014_vm9 = vweird.f32 %v7390_v49  ;;  %vm7460_vm11 = vmor %vm4028_vm5, %vm4029_vm6 }
 0xd53   : > { %6359 = vrcp.f32 %v7388_v31  ;;  %v4025_v23 = vsub.f32 1.0, %v4024_v32  ;;  %v4004_v9 = vand.u32 2147483648, %v7384_v26  ;;  %vm7481_vm4 = vmor %vm4013_vm7, %vm4014_vm9  ;;  %v3987_v35 = vand.u32 2147483647, %v7388_v31 }
 0xd54   : > { %v4010_v22 = vsub.f32 1.0, %v4009_v58  ;;  %v3989_v15 = vand.u32 2147483648, %v7388_v31 }
 0xd55   : > { %v4026_v3 = vmul.f32 %v7386_v20, %v4025_v23 }
 0xd56   : > { %v4011_v41 = vmul.f32 %v7390_v49, %v4010_v22  ;;  %v3990_v32 = vor.u32 1.1754944e-38, %v3989_v15 }
 0xd57   : > { %v4027_v19 = vadd.f32 %v7386_v20, %v4026_v3 }
 0xd58   : > { %v7403_v14 = vpop.eup %6357  ;;  %v4012_v28 = vadd.f32 %v7390_v49, %v4011_v41 }
 0xd59   : > { %v7401_v63 = vpop.xlane.xlu0 %3940  ;;  %v7411_v33 = vpop.eup %6359  ;;  %v3994_v8 = vmul.f32 %v7403_v14, %v7384_v26  ;;  %v4031_v60 = vsel %vm7460_vm11, %v7386_v20, %v4027_v19  ;;  %vm3999_vm6 = vweird.f32 %v7403_v14 }
 0xd5a   : > { %v7399_v24 = vpop.xlane.xlu2 %3961  ;;  %v3979_v18 = vmul.f32 %v7411_v33, %v7388_v31  ;;  %v4036_v44 = vsel %vm7441_vm8, %v4035_v46, %v4031_v60  ;;  %vm3998_vm8 = vweird.f32 %v7384_v26  ;;  %vm3984_vm11 = vweird.f32 %v7411_v33 }
 0xd5b   : > { %6361 = vrcp.f32 %v7399_v24  ;;  %v3995_v47 = vsub.f32 1.0, %v3994_v8  ;;  %v4077_v58 = vand.u32 2147483647, %v7399_v24  ;;  %v4079_v7 = vand.u32 2147483648, %v7399_v24 }
 0xd5c   : > { %6363 = vrcp.f32 %v7401_v63  ;;  %v3980_v56 = vsub.f32 1.0, %v3979_v18  ;;  %vm4073_vm5 = vweird.f32 %v7399_v24  ;;  %v4052_v8 = vmul.f32 %v7341_v11, %v4051_v48 }
 0xd5d   : > { %v3996_v36 = vmul.f32 %v7403_v14, %v3995_v47  ;;  %v4080_v27 = vor.u32 1.1754944e-38, %v4079_v7  ;;  %vm4078_vm9 = vcmp.eq.f32.partialorder %v4077_v58, 8.507059e+37  ;;  %v4037_v41 = vmul.f32 %v7345_v53, %v4036_v44 }
 0xd5e   : > { %v3981_v6 = vmul.f32 %v7411_v33, %v3980_v56  ;;  %v4102_v57 = vsel %vm1211_vm3, %v4052_v8, 0  ;;  %v4005_v53 = vor.u32 1.1754944e-38, %v4004_v9  ;;  %v4159_v48 = vand.u32 4294901760, %v7475_v42 }
 0xd5f   : > { %v3997_v2 = vadd.f32 %v7403_v14, %v3996_v36  ;;  %v3972_v58 = vand.u32 2147483647, %v7401_v63 }
 0xd61   : > { %v6362_v59 = vpop.eup %6361 }
 0xd62   : > { %v4069_v30 = vmul.f32 %v6362_v59, %v7399_v24  ;;  %v3234_v61 = vpop.permute.xlu2 %3233  ;;  %v7439_v10 = vpop.eup %6363  ;;  %vm4074_vm15 = vweird.f32 %v6362_v59 }
 0xd63   : > { %v3285_v43 = vadd.f32 %v7240_v52, %v3234_v61  ;;  %v3964_v40 = vmul.f32 %v7439_v10, %v7401_v63  ;;  %vm4075_vm7 = vmor %vm4073_vm5, %vm4074_vm15  ;;  %v4099_v61 = vsel %vm1211_vm3, %v4037_v41, 0 }
 0xd64   : > { %v4070_v52 = vsub.f32 1.0, %v4069_v30  ;;  %vm7508_vm15 = vmor %vm3998_vm8, %vm3999_vm6  ;;  %v7521_v30 = vand.u32 4294901760, %v4102_v57  ;;  %v7548_v50 = vand.u32 4294901760, %v4099_v61 }
 0xd65   : > { %v3319_v22 = vadd.f32 %v7242_v21, %v3285_v43  ;;  %v4016_v21 = vsel %vm7481_vm4, %v7390_v49, %v4012_v28  ;;  %v3965_v5 = vsub.f32 1.0, %v3964_v40  ;;  %v4002_v49 = vand.u32 2147483647, %v7384_v26 }
 0xd66   : > { %v4071_v23 = vmul.f32 %v6362_v59, %v4070_v52  ;;  %v3982_v26 = vadd.f32 %v7411_v33, %v3981_v6  ;;  %vm7525_vm4 = vcmp.eq.f32.partialorder %v3987_v35, 8.507059e+37  ;;  %v3974_v43 = vand.u32 2147483648, %v7401_v63 }
 0xd67   : > { %v3353_v11 = vadd.f32 %v7279_v29, %v3319_v22  ;;  %v3966_v19 = vmul.f32 %v7439_v10, %v3965_v5  ;;  %vm4003_vm5 = vcmp.eq.f32.partialorder %v4002_v49, 8.507059e+37  ;;  %v7553_v56 = vsub.f32 %v4102_v57, %v7521_v30 }
 0xd68   : > { %v4072_v3 = vadd.f32 %v6362_v59, %v4071_v23  ;;  %v3975_v40 = vor.u32 1.1754944e-38, %v3974_v43 }
 0xd69   : > { %v3389_v34 = vadd.f32 %v7277_v37, %v3353_v11  ;;  %v3967_v28 = vadd.f32 %v7439_v10, %v3966_v19  ;;  %v4165_v20 = vand.u32 4294901760, %v7553_v56 }
 0xd6a   : > { %v4076_v0 = vsel %vm4075_vm7, %v6362_v59, %v4072_v3  ;;  %v4021_v59 = vsel %vm7452_vm10, %v4020_v13, %v4016_v21  ;;  %vm3983_vm10 = vweird.f32 %v7388_v31  ;;  %vm3969_vm7 = vweird.f32 %v7439_v10 }
 0xd6b   : > { %v4081_v24 = vsel %vm4078_vm9, %v4080_v27, %v4076_v0  ;;  %vm7532_vm6 = vmor %vm3983_vm10, %vm3984_vm11  ;;  %v3421_v52 = vadd.f32 %v7289_v45, %v3389_v34  ;;  %vm3968_vm9 = vweird.f32 %v7401_v63  ;;  %v7573_v13 = vsub.f32 %v4099_v61, %v7548_v50 }
 0xd6c   : > { %v4082_v1 = vmul.f32 %v7365_v39, %v4081_v24  ;;  %v4001_v39 = vsel %vm7508_vm15, %v7403_v14, %v3997_v2  ;;  %v4022_v14 = vmul.f32 %v7348_v54, %v4021_v59  ;;  %v3986_v54 = vsel %vm7532_vm6, %v7411_v33, %v3982_v26  ;;  %vm7561_vm8 = vmor %vm3968_vm9, %vm3969_vm7 }
 0xd6d   : > { %v4006_v37 = vsel %vm4003_vm5, %v4005_v53, %v4001_v39  ;;  %v3991_v36 = vsel %vm7525_vm4, %v3990_v32, %v3986_v54  ;;  %v3971_v63 = vsel %vm7561_vm8, %v7439_v10, %v3967_v28  ;;  %v7576_v9 = vadd.f32 %v7291_v25, %v3421_v52 }
 0xd6e   : > { %v4108_v18 = vsel %vm1211_vm3, %v4082_v1, 0  ;;  %v4096_v33 = vsel %vm1211_vm3, %v4022_v14, 0  ;;  %v4007_v7 = vmul.f32 %v7355_v17, %v4006_v37  ;;  %v4160_v17 = vsub.f32 %v7475_v42, %v4159_v48 }
 0xd6f   : > { %v7519_v47 = vand.u32 4294901760, %v4108_v18  ;;  %v7579_v44 = vand.u32 4294901760, %v4096_v33  ;;  %vm3973_vm11 = vcmp.eq.f32.partialorder %v3972_v58, 8.507059e+37  ;;  %v3992_v10 = vmul.f32 %v7357_v4, %v3991_v36 }
 0xd70   : > { %v4093_v3 = vsel %vm1211_vm3, %v4007_v7, 0  ;;  %v3976_v8 = vsel %vm3973_vm11, %v3975_v40, %v3971_v63  ;;  %v4161_v21 = vand.u32 4294901760, %v4160_v17  ;;  %v4171_v25 = vand.u32 4294901760, %v7573_v13 }
 0xd71   : > { %4119 = vmatpush.xpose.msra.mxu0 %v7519_v47  ;;  %v7539_v31 = vsub.f32 %v4108_v18, %v7519_v47  ;;  %4327 = vmatpush.xpose.msrb.mxu3 %v7519_v47  ;;  %v4084_v6 = vsel %vm1211_vm3, %v7576_v9, 0  ;;  %v4166_v27 = vsub.f32 %v7553_v56, %v4165_v20  ;;  %v7589_v2 = vand.u32 4294901760, %v4093_v3 }
 0xd72   : > { %v7592_v0 = vsub.f32 %v4096_v33, %v7579_v44  ;;  %v4090_v4 = vsel %vm1211_vm3, %v3992_v10, 0  ;;  %v3977_v5 = vmul.f32 %v7363_v38, %v3976_v8  ;;  %v4134_v35 = vand.u32 4294901760, %v4084_v6 }
 0xd73   : > { %v4153_v60 = vand.u32 4294901760, %v7539_v31  ;;  %v4172_v24 = vsub.f32 %v7573_v13, %v4171_v25  ;;  %v4167_v11 = vand.u32 4294901760, %v4166_v27  ;;  %v7600_v49 = vand.u32 4294901760, %v4090_v4 }
 0xd74   : > { %v4177_v41 = vand.u32 4294901760, %v7592_v0  ;;  %v4182_v1 = vsub.f32 %v4093_v3, %v7589_v2  ;;  %v4087_v57 = vsel %vm1211_vm3, %v3977_v5, 0  ;;  %v7605_v38 = vsub.f32 %v4084_v6, %v4134_v35 }
 0xd75   : > { %4121 = vmatpush.xpose.msra.mxu0 %v7446_v62  ;;  %4284 = vmatpush.xpose.msrb.mxu2 %v4153_v60  ;;  %v4154_v45 = vsub.f32 %v7539_v31, %v4153_v60  ;;  %v4173_v59 = vand.u32 4294901760, %v4172_v24  ;;  %v4132_v53 = vand.u32 4294901760, %v4087_v57  ;;  %v4188_v26 = vsub.f32 %v4090_v4, %v7600_v49 }
 0xd76   : > { %4329 = vmatpush.xpose.msrb.mxu3 %v7446_v62  ;;  %v4178_v15 = vsub.f32 %v7592_v0, %v4177_v41  ;;  %v4183_v29 = vand.u32 4294901760, %v4182_v1  ;;  %v4382_v39 = vrot.slane %v7247_v12, 4  ;;  %v4136_v19 = vand.u32 4294901760, %v7605_v38 }
 0xd77   : > { %v4155_v22 = vand.u32 4294901760, %v4154_v45  ;;  %v4189_v61 = vand.u32 4294901760, %v4188_v26  ;;  %v4194_v51 = vsub.f32 %v4087_v57, %v4132_v53 }
 0xd78   : > { %v4179_v18 = vand.u32 4294901760, %v4178_v15  ;;  %v4184_v34 = vsub.f32 %v4182_v1, %v4183_v29  ;;  %v4407_v14 = vsel %vm825_vm1, %v4382_v39, 0  ;;  %v4137_v46 = vsub.f32 %v7605_v38, %v4136_v19 }
 0xd79   : > { %4123 = vmatpush.xpose.msra.mxu0 %v7521_v30  ;;  %4156 = vmatpush.xpose.msra.mxu1 %v4155_v22  ;;  %v4190_v37 = vsub.f32 %v4188_v26, %v4189_v61  ;;  %v4195_v43 = vand.u32 4294901760, %v4194_v51 }
 0xd7a   : > { %4288 = vmatpush.xpose.msrb.mxu2 %v4159_v48  ;;  %4331 = vmatpush.xpose.msrb.mxu3 %v7521_v30  ;;  %v4185_v12 = vand.u32 4294901760, %v4184_v34  ;;  %v4424_v48 = vand.u32 4294901760, %v4407_v14  ;;  %v4138_v54 = vand.u32 4294901760, %v4137_v46 }
 0xd7b   : > { %v4191_v28 = vand.u32 4294901760, %v4190_v37  ;;  %v4196_v32 = vsub.f32 %v4194_v51, %v4195_v43 }
 0xd7c   : > { %v4507_v52 = vsub.f32 %v4407_v14, %v4424_v48 }
 0xd7d   : > { %4125 = vmatpush.xpose.msra.mxu0 %v7548_v50  ;;  %4162 = vmatpush.xpose.msra.mxu1 %v4161_v21  ;;  %v4197_v60 = vand.u32 4294901760, %v4196_v32 }
 0xd7e   : > { %4292 = vmatpush.xpose.msrb.mxu2 %v4165_v20  ;;  %4333 = vmatpush.xpose.msrb.mxu3 %v7548_v50 }
 0xd81   : > { %4127 = vmatpush.xpose.msra.mxu0 %v7579_v44  ;;  %4168 = vmatpush.xpose.msra.mxu1 %v4167_v11 }
 0xd82   : > { %4296 = vmatpush.xpose.msrb.mxu2 %v4171_v25  ;;  %4335 = vmatpush.xpose.msrb.mxu3 %v7579_v44 }
 0xd85   : > { %4129 = vmatpush.xpose.msra.mxu0 %v7589_v2  ;;  %4174 = vmatpush.xpose.msra.mxu1 %v4173_v59 }
 0xd86   : > { %4300 = vmatpush.xpose.msrb.mxu2 %v4177_v41  ;;  %4337 = vmatpush.xpose.msrb.mxu3 %v7589_v2 }
 0xd89   : > { %4131 = vmatpush.xpose.msra.mxu0 %v7600_v49  ;;  %4180 = vmatpush.xpose.msra.mxu1 %v4179_v18 }
 0xd8a   : > { %4304 = vmatpush.xpose.msrb.mxu2 %v4183_v29  ;;  %4339 = vmatpush.xpose.msrb.mxu3 %v7600_v49 }
 0xd8d   : > { %4133 = vmatpush.xpose.msra.mxu0 %v4132_v53  ;;  %4186 = vmatpush.xpose.msra.mxu1 %v4185_v12 }
 0xd8e   : > { %4308 = vmatpush.xpose.msrb.mxu2 %v4189_v61  ;;  %4341 = vmatpush.xpose.msrb.mxu3 %v4132_v53 }
 0xd90   : > { %4139 = vmatmul.f32.vlgmr.msra.gmra.mxu0 %v4138_v54 }
 0xd91   : > { %4214 = vmatpush.xpose.msrb.mxu0 %v7539_v31  ;;  %4343 = vmatmul.f32.vlgmr.msrb.gmra.mxu3 %v4134_v35 }
 0xd92   : > { %4620 = vmatpush.msra.mxu3 %v4424_v48  ;;  %4192 = vmatpush.xpose.msra.mxu1 %v4191_v28 }
 0xd93   : > { %4312 = vmatpush.xpose.msrb.mxu2 %v4195_v43 }
 0xd95   : > { %4217 = vmatpush.xpose.msrb.mxu0 %v7475_v42  ;;  %v4508_v42 = vand.u32 4294901760, %v4507_v52 }
 0xd96   : > { %4314 = vmatmul.f32.vlgmr.msrb.gmra.mxu2 %v4134_v35  ;;  %4198 = vmatpush.xpose.msra.mxu1 %v4197_v60 }
 0xd97   : > { %4562 = vmatpush.msra.mxu2 %v4507_v52 }
 0xd99   : > { %4220 = vmatpush.xpose.msrb.mxu0 %v7553_v56  ;;  %4200 = vmatmul.f32.vlgmr.msra.gmra.mxu1 %v4134_v35 }
 0xd9a   : > { %4251 = vmatpush.xpose.msrb.mxu1 %v7519_v47  ;;  %v4509_v47 = vsub.f32 %v4507_v52, %v4508_v42 }
 0xd9d   : > { %4223 = vmatpush.xpose.msrb.mxu0 %v7573_v13 }
 0xd9e   : > { %4253 = vmatpush.xpose.msrb.mxu1 %v7446_v62  ;;  %v4510_v62 = vand.u32 4294901760, %v4509_v47 }
 0xda1   : > { %4226 = vmatpush.xpose.msrb.mxu0 %v7592_v0 }
 0xda2   : > { %4255 = vmatpush.xpose.msrb.mxu1 %v7521_v30 }
 0xda5   : > { %4229 = vmatpush.xpose.msrb.mxu0 %v4182_v1 }
 0xda6   : > { %4257 = vmatpush.xpose.msrb.mxu1 %v7548_v50 }
 0xda9   : > { %4232 = vmatpush.xpose.msrb.mxu0 %v4188_v26 }
 0xdaa   : > { %4259 = vmatpush.xpose.msrb.mxu1 %v7579_v44 }
 0xdad   : > { %4235 = vmatpush.xpose.msrb.mxu0 %v4194_v51 }
 0xdae   : > { %4261 = vmatpush.xpose.msrb.mxu1 %v7589_v2 }
 0xdb0   : > { %4238 = vmatmul.f32.vlgmr.msrb.gmra.mxu0 %v7605_v38 }
 0xdb1   : > { %4425 = vmatpush.msra.mxu0 %v4424_v48 }
 0xdb2   : > { %4263 = vmatpush.xpose.msrb.mxu1 %v7600_v49 }
 0xdb3   : > { %4688 = vmatpush.msrb.mxu0 %v4508_v42  ;;  %v4366_v30 = vpop.trf.xlu0 }
 0xdb4   : > { %v4384_v31 = vsel %vm800_vm2, %v4366_v30, 0 }
 0xdb5   : > { %v7632_v50 = vand.u32 4294901760, %v4384_v31 }
 0xdb6   : > { %4265 = vmatpush.xpose.msrb.mxu1 %v4132_v53 }
 0xdb7   : > { %v4427_v56 = vsub.f32 %v4384_v31, %v7632_v50 }
 0xdb9   : > { %4269 = vmatmul.f32.vlgmr.msrb.gmra.mxu1 %v4136_v19  ;;  %v4428_v58 = vand.u32 4294901760, %v4427_v56  ;;  %4565 = vmatmul.f32.vlgmr.msra.gmra.mxu2 %v4427_v56 }
 0xdba   : > { %4511 = vmatpush.msra.mxu1 %v4510_v62 }
 0xdbb   : > { %v4429_v33 = vsub.f32 %v4427_v56, %v4428_v58  ;;  %4624 = vmatmul.f32.vlgmr.msra.gmra.mxu3 %v4428_v58  ;;  %v4367_v7 = vpop.trf.xlu0 }
 0xdbc   : > { %4738 = vmatpush.msrb.mxu1 %v4424_v48  ;;  %v4387_v36 = vsel %vm800_vm2, %v4367_v7, 0 }
 0xdbd   : > { %v4430_v23 = vand.u32 4294901760, %v4429_v33  ;;  %v7636_v45 = vand.u32 4294901760, %v4387_v36 }
 0xdbf   : > { %v4435_v63 = vsub.f32 %v4387_v36, %v7636_v45  ;;  %4431 = vmatmul.f32.vlgmr.msra.gmra.mxu0 %v4430_v23 }
 0xdc1   : > { %4513 = vmatmul.f32.vlgmr.msra.gmra.mxu1 %v7632_v50  ;;  %4570 = vmatmul.f32.gmra.mxu2 %v4435_v63  ;;  %v4436_v40 = vand.u32 4294901760, %v4435_v63 }
 0xdc3   : > { %4630 = vmatmul.f32.gmra.mxu3 %v4436_v40  ;;  %v4368_v17 = vpop.trf.xlu0  ;;  %v4437_v13 = vsub.f32 %v4435_v63, %v4436_v40 }
 0xdc4   : > { %v4390_v22 = vsel %vm800_vm2, %v4368_v17, 0 }
 0xdc5   : > { %v7641_v20 = vand.u32 4294901760, %v4390_v22  ;;  %v4438_v44 = vand.u32 4294901760, %v4437_v13 }
 0xdc7   : > { %v4443_v3 = vsub.f32 %v4390_v22, %v7641_v20  ;;  %4439 = vmatmul.f32.gmra.mxu0 %v4438_v44 }
 0xdc9   : > { %4517 = vmatmul.f32.gmra.mxu1 %v7636_v45  ;;  %4575 = vmatmul.f32.gmra.mxu2 %v4443_v3  ;;  %v4444_v10 = vand.u32 4294901760, %v4443_v3 }
 0xdcb   : > { %4636 = vmatmul.f32.gmra.mxu3 %v4444_v10  ;;  %v4369_v8 = vpop.trf.xlu0  ;;  %v4445_v21 = vsub.f32 %v4443_v3, %v4444_v10 }
 0xdcc   : > { %v4393_v25 = vsel %vm800_vm2, %v4369_v8, 0 }
 0xdcd   : > { %v4450_v6 = vand.u32 4294901760, %v4393_v25  ;;  %v4446_v27 = vand.u32 4294901760, %v4445_v21 }
 0xdcf   : > { %v4451_v2 = vsub.f32 %v4393_v25, %v4450_v6  ;;  %4447 = vmatmul.f32.gmra.mxu0 %v4446_v27 }
 0xdd1   : > { %4521 = vmatmul.f32.gmra.mxu1 %v7641_v20  ;;  %4580 = vmatmul.f32.gmra.mxu2 %v4451_v2  ;;  %v4452_v0 = vand.u32 4294901760, %v4451_v2 }
 0xdd3   : > { %4642 = vmatmul.f32.gmra.mxu3 %v4452_v0  ;;  %v4370_v4 = vpop.trf.xlu0  ;;  %v4453_v5 = vsub.f32 %v4451_v2, %v4452_v0 }
 0xdd4   : > { %v4396_v35 = vsel %vm800_vm2, %v4370_v4, 0 }
 0xdd5   : > { %v4458_v24 = vand.u32 4294901760, %v4396_v35  ;;  %v4454_v11 = vand.u32 4294901760, %v4453_v5 }
 0xdd7   : > { %v4459_v41 = vsub.f32 %v4396_v35, %v4458_v24  ;;  %4455 = vmatmul.f32.gmra.mxu0 %v4454_v11 }
 0xdd9   : > { %4525 = vmatmul.f32.gmra.mxu1 %v4450_v6  ;;  %4585 = vmatmul.f32.gmra.mxu2 %v4459_v41  ;;  %v4460_v49 = vand.u32 4294901760, %v4459_v41 }
 0xddb   : > { %4648 = vmatmul.f32.gmra.mxu3 %v4460_v49  ;;  %v4371_v1 = vpop.trf.xlu0  ;;  %v4461_v57 = vsub.f32 %v4459_v41, %v4460_v49 }
 0xddc   : > { %v4399_v38 = vsel %vm800_vm2, %v4371_v1, 0 }
 0xddd   : > { %v4466_v59 = vand.u32 4294901760, %v4399_v38  ;;  %v4462_v15 = vand.u32 4294901760, %v4461_v57 }
 0xddf   : > { %v4467_v29 = vsub.f32 %v4399_v38, %v4466_v59  ;;  %4463 = vmatmul.f32.gmra.mxu0 %v4462_v15 }
 0xde1   : > { %4529 = vmatmul.f32.gmra.mxu1 %v4458_v24  ;;  %4590 = vmatmul.f32.gmra.mxu2 %v4467_v29  ;;  %v4468_v53 = vand.u32 4294901760, %v4467_v29 }
 0xde3   : > { %4654 = vmatmul.f32.gmra.mxu3 %v4468_v53  ;;  %v4372_v26 = vpop.trf.xlu0  ;;  %v4469_v39 = vsub.f32 %v4467_v29, %v4468_v53 }
 0xde4   : > { %v4402_v19 = vsel %vm800_vm2, %v4372_v26, 0 }
 0xde5   : > { %v4474_v18 = vand.u32 4294901760, %v4402_v19  ;;  %v4470_v34 = vand.u32 4294901760, %v4469_v39 }
 0xde7   : > { %v4475_v61 = vsub.f32 %v4402_v19, %v4474_v18  ;;  %4471 = vmatmul.f32.gmra.mxu0 %v4470_v34 }
 0xde9   : > { %4533 = vmatmul.f32.gmra.mxu1 %v4466_v59  ;;  %4595 = vmatmul.f32.gmra.mxu2 %v4475_v61  ;;  %v4476_v51 = vand.u32 4294901760, %v4475_v61 }
 0xdeb   : > { %4660 = vmatmul.f32.gmra.mxu3 %v4476_v51  ;;  %v4373_v14 = vpop.trf.xlu0  ;;  %v4477_v46 = vsub.f32 %v4475_v61, %v4476_v51 }
 0xdec   : > { %v4405_v12 = vsel %vm800_vm2, %v4373_v14, 0 }
 0xded   : > { %v4482_v37 = vand.u32 4294901760, %v4405_v12  ;;  %v4478_v43 = vand.u32 4294901760, %v4477_v46 }
 0xdef   : > { %v4483_v48 = vsub.f32 %v4405_v12, %v4482_v37  ;;  %4479 = vmatmul.f32.gmra.mxu0 %v4478_v43 }
 0xdf1   : > { %4537 = vmatmul.f32.gmra.mxu1 %v4474_v18  ;;  %4600 = vmatmul.f32.gmra.mxu2 %v4483_v48  ;;  %v4484_v54 = vand.u32 4294901760, %v4483_v48 }
 0xdf3   : > { %4666 = vmatmul.f32.gmra.mxu3 %v4484_v54  ;;  %v4485_v28 = vsub.f32 %v4483_v48, %v4484_v54 }
 0xdf5   : > { %v4486_v32 = vand.u32 4294901760, %v4485_v28 }
 0xdf7   : > { %4487 = vmatmul.f32.gmra.mxu0 %v4486_v32 }
 0xdf9   : > { %4541 = vmatmul.f32.gmra.mxu1 %v4482_v37 }
 0xdff   : > { %4690 = vmatmul.f32.vlgmr.msrb.gmra.mxu0 %v7632_v50 }
 0xe01   : > { %4740 = vmatmul.f32.vlgmr.msrb.gmra.mxu1 %v7632_v50 }
 0xe07   : > { %4694 = vmatmul.f32.gmra.mxu0 %v7636_v45 }
 0xe09   : > { %4744 = vmatmul.f32.gmra.mxu1 %v7636_v45 }
 0xe0d   : > { %v4140_v52 = vpop.f32.mrf.mxu0 }
 0xe0f   : > { %4698 = vmatmul.f32.gmra.mxu0 %v7641_v20 }
 0xe11   : > { %4748 = vmatmul.f32.gmra.mxu1 %v7641_v20 }
 0xe14   : > { %v4344_v58 = vpop.f32.mrf.mxu3 }
 0xe16   : > { %v4201_v60 = vpop.f32.mrf.mxu1 }
 0xe17   : > { %4702 = vmatmul.f32.gmra.mxu0 %v4450_v6  ;;  %v4202_v47 = vadd.f32 %v4201_v60, %v4140_v52 }
 0xe19   : > { %4752 = vmatmul.f32.gmra.mxu1 %v4450_v6  ;;  %v4315_v50 = vpop.f32.mrf.mxu2 }
 0xe1f   : > { %4706 = vmatmul.f32.gmra.mxu0 %v4458_v24 }
 0xe21   : > { %4756 = vmatmul.f32.gmra.mxu1 %v4458_v24 }
 0xe27   : > { %4710 = vmatmul.f32.gmra.mxu0 %v4466_v59 }
 0xe29   : > { %4760 = vmatmul.f32.gmra.mxu1 %v4466_v59 }
 0xe2d   : > { %v4239_v42 = vpop.f32.mrf.mxu0 }
 0xe2e   : > { %v4240_v62 = vadd.f32 %v4239_v42, %v4202_v47 }
 0xe2f   : > { %4714 = vmatmul.f32.gmra.mxu0 %v4474_v18 }
 0xe31   : > { %4764 = vmatmul.f32.gmra.mxu1 %v4474_v18 }
 0xe36   : > { %v4270_v30 = vpop.f32.mrf.mxu1 }
 0xe37   : > { %v4271_v31 = vadd.f32 %v4270_v30, %v4240_v62  ;;  %4718 = vmatmul.f32.gmra.mxu0 %v4482_v37 }
 0xe39   : > { %v4316_v56 = vadd.f32 %v4315_v50, %v4271_v31  ;;  %4768 = vmatmul.f32.gmra.mxu1 %v4482_v37 }
 0xe3b   : > { %v7657_v33 = vadd.f32 %v4344_v58, %v4316_v56 }
 0xe3c   : > { %v4432_v36 = vpop.f32.mrf.mxu0  ;;  %v4566_v23 = vpop.f32.mrf.mxu2 }
 0xe3e   : > { %v4514_v7 = vpop.f32.mrf.mxu1  ;;  %v4625_v63 = vpop.f32.mrf.mxu3 }
 0xe3f   : > { %v4515_v45 = vadd.f32 %v4514_v7, %v4432_v36 }
 0xe41   : > { %v4567_v40 = vadd.f32 %v4566_v23, %v4515_v45 }
 0xe43   : > { %v4626_v17 = vadd.f32 %v4625_v63, %v4567_v40 }
 0xe44   : > { %v4440_v22 = vpop.f32.mrf.mxu0  ;;  %v4571_v44 = vpop.f32.mrf.mxu2 }
 0xe46   : > { %v4518_v13 = vpop.f32.mrf.mxu1  ;;  %v4631_v10 = vpop.f32.mrf.mxu3 }
 0xe47   : > { %v4519_v20 = vadd.f32 %v4518_v13, %v4440_v22 }
 0xe49   : > { %v4572_v3 = vadd.f32 %v4571_v44, %v4519_v20 }
 0xe4b   : > { %v4632_v8 = vadd.f32 %v4631_v10, %v4572_v3 }
 0xe4c   : > { %v4448_v25 = vpop.f32.mrf.mxu0  ;;  %v7661_v59 = vpop.f32.mrf.mxu2 }
 0xe4e   : > { %v4522_v21 = vpop.f32.mrf.mxu1  ;;  %v7665_v26 = vpop.f32.mrf.mxu3 }
 0xe4f   : > { %v7659_v6 = vadd.f32 %v4522_v21, %v4448_v25 }
 0xe54   : > { %v4456_v2 = vpop.f32.mrf.mxu0  ;;  %v4581_v34 = vpop.f32.mrf.mxu2 }
 0xe56   : > { %v4526_v27 = vpop.f32.mrf.mxu1  ;;  %v4643_v51 = vpop.f32.mrf.mxu3 }
 0xe57   : > { %v4527_v0 = vadd.f32 %v4526_v27, %v4456_v2 }
 0xe59   : > { %v4582_v27 = vadd.f32 %v4581_v34, %v4527_v0  ;;  %v4577_v0 = vadd.f32 %v7661_v59, %v7659_v6 }
 0xe5c   : > { %v4464_v5 = vpop.f32.mrf.mxu0  ;;  %v4586_v12 = vpop.f32.mrf.mxu2 }
 0xe5e   : > { %v4530_v4 = vpop.f32.mrf.mxu1  ;;  %v4649_v43 = vpop.f32.mrf.mxu3 }
 0xe5f   : > { %v4531_v35 = vadd.f32 %v4530_v4, %v4464_v5 }
 0xe61   : > { %v4587_v42 = vadd.f32 %v4586_v12, %v4531_v35 }
 0xe63   : > { %v4650_v30 = vadd.f32 %v4649_v43, %v4587_v42 }
 0xe64   : > { %v4472_v11 = vpop.f32.mrf.mxu0  ;;  %v4591_v54 = vpop.f32.mrf.mxu2 }
 0xe66   : > { %v4534_v24 = vpop.f32.mrf.mxu1  ;;  %v4655_v60 = vpop.f32.mrf.mxu3 }
 0xe67   : > { %v4535_v32 = vadd.f32 %v4534_v24, %v4472_v11  ;;  %v4644_v11 = vadd.f32 %v4643_v51, %v4582_v27  ;;  %v4638_v51 = vadd.f32 %v7665_v26, %v4577_v0  ;;  %v6228_v0 = vld [vmem:[%s7982_s5 + $0x8] sm:$0xff] }
 0xe69   : > { %v4592_v47 = vadd.f32 %v4591_v54, %v4535_v32 }
 0xe6b   : > { %v4656_v31 = vadd.f32 %v4655_v60, %v4592_v47 }
 0xe6c   : > { %v4480_v49 = vpop.f32.mrf.mxu0  ;;  %v4596_v56 = vpop.f32.mrf.mxu2 }
 0xe6e   : > { %v4538_v41 = vpop.f32.mrf.mxu1  ;;  %v4661_v63 = vpop.f32.mrf.mxu3 }
 0xe6f   : > { %v4539_v50 = vadd.f32 %v4538_v41, %v4480_v49 }
 0xe71   : > { %v4597_v23 = vadd.f32 %v4596_v56, %v4539_v50 }
 0xe73   : > { %v4662_v13 = vadd.f32 %v4661_v63, %v4597_v23 }
 0xe74   : > { %v4488_v57 = vpop.f32.mrf.mxu0  ;;  %v4601_v25 = vpop.f32.mrf.mxu2 }
 0xe76   : > { %v4542_v1 = vpop.f32.mrf.mxu1  ;;  %v4667_v24 = vpop.f32.mrf.mxu3 }
 0xe77   : > { %v4543_v22 = vadd.f32 %v4542_v1, %v4488_v57 }
 0xe79   : > { %v4602_v2 = vadd.f32 %v4601_v25, %v4543_v22 }
 0xe7b   : > { %v4668_v41 = vadd.f32 %v4667_v24, %v4602_v2 }
 0xe7c   : > { %v4691_v15 = vpop.f32.mrf.mxu0 }
 0xe7d   : > { %v4692_v29 = vadd.f32 %v4691_v15, %v4626_v17 }
 0xe7e   : > { %v4741_v38 = vpop.f32.mrf.mxu1 }
 0xe7f   : > { %v7663_v53 = vadd.f32 %v4741_v38, %v4692_v29 }
 0xe84   : > { %v4695_v19 = vpop.f32.mrf.mxu0 }
 0xe85   : > { %v4696_v18 = vadd.f32 %v4695_v19, %v4632_v8 }
 0xe86   : > { %v4745_v39 = vpop.f32.mrf.mxu1 }
 0xe87   : > { %v7667_v61 = vadd.f32 %v4745_v39, %v4696_v18 }
 0xe89   : > { %v4773_v59 = vmul.f32 0.5, %v7667_v61 }
 0xe8c   : > { %v4699_v46 = vpop.f32.mrf.mxu0 }
 0xe8d   : > { %v4700_v43 = vadd.f32 %v4699_v46, %v4638_v51  ;;  %v4781_v46 = vadd.f32 %v4773_v59, %v6630_v55 }
 0xe8e   : > { %v7669_v14 = vpop.f32.mrf.mxu1 }
 0xe8f   : > { %v4791_v42 = vsel %vm1211_vm3, %v4781_v46, -inf }
 0xe94   : > { %v4703_v48 = vpop.f32.mrf.mxu0 }
 0xe95   : > { %v4704_v57 = vadd.f32 %v4703_v48, %v4644_v11 }
 0xe96   : > { %v4753_v37 = vpop.f32.mrf.mxu1 }
 0xe97   : > { %v4754_v18 = vadd.f32 %v4753_v37, %v4704_v57  ;;  %v4772_v37 = vmul.f32 0.5, %v7663_v53 }
 0xe99   : > { %v4775_v48 = vmul.f32 0.5, %v4754_v18  ;;  %v6229_v18 = vld [vmem:[%s7983_s6 + $0x10] sm:$0xff] }
 0xe9b   : > { %v4783_v32 = vadd.f32 %v4775_v48, %v6630_v55 }
 0xe9c   : > { %v4707_v52 = vpop.f32.mrf.mxu0 }
 0xe9d   : > { %v4708_v7 = vadd.f32 %v4707_v52, %v4650_v30  ;;  %v4797_v60 = vsel %vm1211_vm3, %v4783_v32, -inf }
 0xe9e   : > { %v4757_v28 = vpop.f32.mrf.mxu1 }
 0xe9f   : > { %v4758_v40 = vadd.f32 %v4757_v28, %v4708_v7  ;;  %v4750_v28 = vadd.f32 %v7669_v14, %v4700_v43  ;;  %v4780_v14 = vadd.f32 %v4772_v37, %v6630_v55 }
 0xea1   : > { %v4776_v10 = vmul.f32 0.5, %v4758_v40  ;;  %v4774_v52 = vmul.f32 0.5, %v4750_v28  ;;  %v4788_v47 = vsel %vm1211_vm3, %v4780_v14, -inf }
 0xea3   : > { %v4784_v35 = vadd.f32 %v4776_v10, %v6630_v55  ;;  %v4782_v6 = vadd.f32 %v4774_v52, %v6630_v55 }
 0xea4   : > { %v4711_v58 = vpop.f32.mrf.mxu0 }
 0xea5   : > { %v4712_v36 = vadd.f32 %v4711_v58, %v4656_v31  ;;  %v4800_v29 = vsel %vm1211_vm3, %v4784_v35, -inf  ;;  %v4794_v26 = vsel %vm1211_vm3, %v4782_v6, -inf }
 0xea6   : > { %v4761_v62 = vpop.f32.mrf.mxu1 }
 0xea7   : > { %v4762_v45 = vadd.f32 %v4761_v62, %v4712_v36 }
 0xea9   : > { %v4777_v17 = vmul.f32 0.5, %v4762_v45 }
 0xeab   : > { %v7672_v20 = vadd.f32 %v4777_v17, %v6630_v55 }
 0xeac   : > { %v4715_v3 = vpop.f32.mrf.mxu0 }
 0xead   : > { %v4716_v8 = vadd.f32 %v4715_v3, %v4662_v13  ;;  %v4803_v21 = vsel %vm1211_vm3, %v7672_v20, -inf }
 0xeae   : > { %v4765_v44 = vpop.f32.mrf.mxu1  ;;  %4804 = vmax.xlane.f32.xlu2 %v4803_v21 }
 0xeaf   : > { %v4766_v4 = vadd.f32 %v4765_v44, %v4716_v8 }
 0xeb1   : > { %v4778_v5 = vmul.f32 0.5, %v4766_v4 }
 0xeb3   : > { %v4786_v49 = vadd.f32 %v4778_v5, %v6630_v55 }
 0xeb4   : > { %v4719_v1 = vpop.f32.mrf.mxu0 }
 0xeb5   : > { %v4720_v38 = vadd.f32 %v4719_v1, %v4668_v41  ;;  %v4806_v15 = vsel %vm1211_vm3, %v4786_v49, -inf }
 0xeb6   : > { %v4769_v39 = vpop.f32.mrf.mxu1  ;;  %4807 = vmax.xlane.f32.xlu0 %v4806_v15  ;;  %4801 = vmax.xlane.f32.xlu2 %v4800_v29 }
 0xeb7   : > { %v4770_v19 = vadd.f32 %v4769_v39, %v4720_v38 }
 0xeb9   : > { %v4779_v34 = vmul.f32 0.5, %v4770_v19  ;;  %v6230_v19 = vld [vmem:[%s7984_s7 + $0x10] sm:$0xff] }
 0xebb   : > { %v4787_v12 = vadd.f32 %v4779_v34, %v6630_v55 }
 0xebd   : > { %v4809_v54 = vsel %vm1211_vm3, %v4787_v12, -inf }
 0xebe   : > { %4810 = vmax.xlane.f32.xlu2 %v4809_v54 }
 0xec6   : > { %4798 = vmax.xlane.f32.xlu2 %v4797_v60 }
 0xece   : > { %4795 = vmax.xlane.f32.xlu2 %v4794_v26 }
 0xed6   : > { %4792 = vmax.xlane.f32.xlu2 %v4791_v42 }
 0xede   : > { %4789 = vmax.xlane.f32.xlu2 %v4788_v47 }
 0xf21   : > { %v4805_v62 = vpop.xlane.xlu2 %4804 }
 0xf22   : > { %v4817_v53 = vsub.f32 %v7672_v20, %v4805_v62 }
 0xf24   : > { %v4830_v63 = vmul.f32 1.442695, %v4817_v53 }
 0xf29   : > { %v4808_v30 = vpop.xlane.xlu0 %4807  ;;  %v4802_v31 = vpop.xlane.xlu2 %4801 }
 0xf2a   : > { %v4818_v50 = vsub.f32 %v4786_v49, %v4808_v30  ;;  %v4816_v56 = vsub.f32 %v4784_v35, %v4802_v31 }
 0xf2c   : > { %v4832_v61 = vmul.f32 1.442695, %v4818_v50  ;;  %v4828_v58 = vmul.f32 1.442695, %v4816_v56 }
 0xf2e   : > { %6365 = vpow2.f32 %v4832_v61 }
 0xf2f   : > { %6367 = vpow2.f32 %v4828_v58 }
 0xf31   : > { %v4811_v7 = vpop.xlane.xlu2 %4810 }
 0xf32   : > { %v4819_v36 = vsub.f32 %v4787_v12, %v4811_v7 }
 0xf34   : > { %v7696_v23 = vpop.eup %6365  ;;  %v4834_v45 = vmul.f32 1.442695, %v4819_v36 }
 0xf35   : > { %v4854_v55 = vsel %vm1211_vm3, %v7696_v23, 0.0  ;;  %v7701_v17 = vpop.eup %6367 }
 0xf36   : > { %6369 = vpow2.f32 %v4834_v45  ;;  %4855 = vadd.xlane.f32.xlu1 %v4854_v55  ;;  %v4848_v44 = vsel %vm1211_vm3, %v7701_v17, 0.0 }
 0xf37   : > { %6371 = vpow2.f32 %v4830_v63 }
 0xf39   : > { %v4799_v40 = vpop.xlane.xlu2 %4798 }
 0xf3a   : > { %v4815_v22 = vsub.f32 %v4783_v32, %v4799_v40 }
 0xf3c   : > { %v7703_v13 = vpop.eup %6369  ;;  %v4826_v3 = vmul.f32 1.442695, %v4815_v22 }
 0xf3d   : > { %v4857_v20 = vsel %vm1211_vm3, %v7703_v13, 0.0  ;;  %v7709_v8 = vpop.eup %6371 }
 0xf3e   : > { %4849 = vadd.xlane.f32.xlu1 %v4848_v44  ;;  %4858 = vadd.xlane.f32.xlu2 %v4857_v20  ;;  %6373 = vpow2.f32 %v4826_v3  ;;  %v4851_v27 = vsel %vm1211_vm3, %v7709_v8, 0.0 }
 0xf41   : > { %v4796_v10 = vpop.xlane.xlu2 %4795 }
 0xf42   : > { %v4814_v21 = vsub.f32 %v4782_v6, %v4796_v10 }
 0xf44   : > { %v4824_v25 = vmul.f32 1.442695, %v4814_v21  ;;  %v7713_v4 = vpop.eup %6373 }
 0xf45   : > { %v4845_v11 = vsel %vm1211_vm3, %v7713_v4, 0.0 }
 0xf46   : > { %6375 = vpow2.f32 %v4824_v25  ;;  %4852 = vadd.xlane.f32.xlu2 %v4851_v27  ;;  %v4980_v25 = vrot.slane %v7576_v9, 4 }
 0xf49   : > { %v4793_v2 = vpop.xlane.xlu2 %4792 }
 0xf4a   : > { %v4813_v5 = vsub.f32 %v4781_v46, %v4793_v2 }
 0xf4c   : > { %v7715_v35 = vpop.eup %6375  ;;  %v4822_v24 = vmul.f32 1.442695, %v4813_v5 }
 0xf4d   : > { %v4842_v41 = vsel %vm1211_vm3, %v7715_v35, 0.0 }
 0xf4e   : > { %6377 = vpow2.f32 %v4822_v24  ;;  %4846 = vadd.xlane.f32.xlu2 %v4845_v11  ;;  %4843 = vadd.xlane.f32.xlu1 %v4842_v41 }
 0xf51   : > { %v4790_v49 = vpop.xlane.xlu2 %4789 }
 0xf52   : > { %v4812_v1 = vsub.f32 %v4780_v14, %v4790_v49 }
 0xf54   : > { %v7721_v57 = vpop.eup %6377  ;;  %v4820_v38 = vmul.f32 1.442695, %v4812_v1 }
 0xf55   : > { %v4839_v15 = vsel %vm1211_vm3, %v7721_v57, 0.0 }
 0xf56   : > { %6379 = vpow2.f32 %v4820_v38  ;;  %4840 = vadd.xlane.f32.xlu2 %v4839_v15  ;;  %v7758_v15 = vsel %vm1211_vm3, %v4980_v25, 0 }
 0xf5c   : > { %v7725_v29 = vpop.eup %6379 }
 0xf5d   : > { %v4836_v39 = vsel %vm1211_vm3, %v7725_v29, 0.0 }
 0xf5e   : > { %4837 = vadd.xlane.f32.xlu1 %v4836_v39 }
 0xf6e   : > { %5254 = vperm.xlu2 %6261, %v6228_v0  }
 0xf76   : > { %5449 = vperm.xlu2 %6261, %v6230_v19  }
 0xf77   : > { %5443 = vperm.xlu1 %6260, %v6229_v18  }
 0xfa9   : > { %v4856_v34 = vpop.xlane.xlu1 %4855 }
 0xfaa   : > { %6381 = vrcp.f32 %v4856_v34  ;;  %v4961_v28 = vand.u32 2147483648, %v4856_v34  ;;  %v4959_v52 = vand.u32 2147483647, %v4856_v34  ;;  %vm4955_vm15 = vweird.f32 %v4856_v34 }
 0xfac   : > { %v4962_v59 = vor.u32 1.1754944e-38, %v4961_v28  ;;  %vm4960_vm4 = vcmp.eq.f32.partialorder %v4959_v52, 8.507059e+37 }
 0xfb0   : > { %v6382_v51 = vpop.eup %6381 }
 0xfb1   : > { %v4951_v12 = vmul.f32 %v6382_v51, %v4856_v34  ;;  %v4850_v43 = vpop.xlane.xlu1 %4849  ;;  %v4859_v48 = vpop.xlane.xlu2 %4858  ;;  %vm4956_vm2 = vweird.f32 %v6382_v51 }
 0xfb2   : > { %6383 = vrcp.f32 %v4850_v43  ;;  %vm4957_vm10 = vmor %vm4955_vm15, %vm4956_vm2  ;;  %v4931_v30 = vand.u32 2147483648, %v4850_v43  ;;  %v4976_v61 = vand.u32 2147483648, %v4859_v48  ;;  %v4929_v58 = vand.u32 2147483647, %v4850_v43 }
 0xfb3   : > { %v4952_v54 = vsub.f32 1.0, %v4951_v12  ;;  %6385 = vrcp.f32 %v4859_v48  ;;  %v4974_v36 = vand.u32 2147483647, %v4859_v48  ;;  %vm4925_vm7 = vweird.f32 %v4850_v43 }
 0xfb4   : > { %v4932_v63 = vor.u32 1.1754944e-38, %v4931_v30  ;;  %vm4970_vm8 = vweird.f32 %v4859_v48  ;;  %v4977_v44 = vor.u32 1.1754944e-38, %v4976_v61  ;;  %vm4930_vm2 = vcmp.eq.f32.partialorder %v4929_v58, 8.507059e+37 }
 0xfb5   : > { %v4953_v32 = vmul.f32 %v6382_v51, %v4952_v54  ;;  %vm4975_vm15 = vcmp.eq.f32.partialorder %v4974_v36, 8.507059e+37 }
 0xfb7   : > { %v4954_v60 = vadd.f32 %v6382_v51, %v4953_v32 }
 0xfb8   : > { %v6384_v6 = vpop.eup %6383 }
 0xfb9   : > { %v6386_v26 = vpop.eup %6385  ;;  %v4958_v46 = vsel %vm4957_vm10, %v6382_v51, %v4954_v60  ;;  %v4921_v37 = vmul.f32 %v6384_v6, %v4850_v43  ;;  %v4853_v42 = vpop.xlane.xlu2 %4852  ;;  %vm4926_vm5 = vweird.f32 %v6384_v6 }
 0xfba   : > { %v4963_v14 = vsel %vm4960_vm4, %v4962_v59, %v4958_v46  ;;  %v4966_v47 = vmul.f32 %v6386_v26, %v4859_v48  ;;  %6387 = vrcp.f32 %v4853_v42  ;;  %vm4971_vm6 = vweird.f32 %v6386_v26  ;;  %vm7739_vm9 = vmor %vm4925_vm7, %vm4926_vm5 }
 0xfbb   : > { %v4922_v62 = vsub.f32 1.0, %v4921_v37  ;;  %v4964_v56 = vmul.f32 %v7696_v23, %v4963_v14  ;;  %vm4972_vm11 = vmor %vm4970_vm8, %vm4971_vm6  ;;  %v4944_v24 = vand.u32 2147483647, %v4853_v42  ;;  %v4946_v11 = vand.u32 2147483648, %v4853_v42 }
 0xfbc   : > { %v4967_v31 = vsub.f32 1.0, %v4966_v47  ;;  %vm4940_vm4 = vweird.f32 %v4853_v42 }
 0xfbd   : > { %v4923_v50 = vmul.f32 %v6384_v6, %v4922_v62  ;;  %v5002_v10 = vsel %vm1211_vm3, %v4964_v56, 0  ;;  %vm4945_vm6 = vcmp.eq.f32.partialorder %v4944_v24, 8.507059e+37  ;;  %v4947_v19 = vor.u32 1.1754944e-38, %v4946_v11 }
 0xfbe   : > { %v4968_v7 = vmul.f32 %v6386_v26, %v4967_v31  ;;  %v7753_v41 = vand.u32 4294901760, %v5002_v10 }
 0xfbf   : > { %v4924_v53 = vadd.f32 %v6384_v6, %v4923_v50 }
 0xfc0   : > { %v6388_v45 = vpop.eup %6387  ;;  %v4969_v40 = vadd.f32 %v6386_v26, %v4968_v7  ;;  %v7764_v34 = vsub.f32 %v5002_v10, %v7753_v41 }
 0xfc1   : > { %v4928_v22 = vsel %vm7739_vm9, %v6384_v6, %v4924_v53  ;;  %v4936_v23 = vmul.f32 %v6388_v45, %v4853_v42  ;;  %v7745_v20 = vpop.xlane.xlu1 %4843  ;;  %v7747_v3 = vpop.xlane.xlu2 %4846  ;;  %vm4941_vm10 = vweird.f32 %v6388_v45 }
 0xfc2   : > { %v4973_v21 = vsel %vm4972_vm11, %v6386_v26, %v4969_v40  ;;  %6389 = vrcp.f32 %v7745_v20  ;;  %v4933_v27 = vsel %vm4930_vm2, %v4932_v63, %v4928_v22  ;;  %vm4942_vm5 = vmor %vm4940_vm4, %vm4941_vm10  ;;  %vm4895_vm7 = vweird.f32 %v7745_v20 }
 0xfc3   : > { %v4978_v2 = vsel %vm4975_vm15, %v4977_v44, %v4973_v21  ;;  %v4937_v5 = vsub.f32 1.0, %v4936_v23  ;;  %6391 = vrcp.f32 %v7747_v3  ;;  %v4934_v38 = vmul.f32 %v7701_v17, %v4933_v27 }
 0xfc4   : > { %v4979_v1 = vmul.f32 %v7703_v13, %v4978_v2  ;;  %v4899_v54 = vand.u32 2147483647, %v7745_v20  ;;  %v4901_v52 = vand.u32 2147483648, %v7745_v20  ;;  %vm4910_vm9 = vweird.f32 %v7747_v3 }
 0xfc5   : > { %v4938_v49 = vmul.f32 %v6388_v45, %v4937_v5  ;;  %v4996_v12 = vsel %vm1211_vm3, %v4934_v38, 0  ;;  %v5056_v26 = vand.u32 4294901760, %v7764_v34  ;;  %v4914_v14 = vand.u32 2147483647, %v7747_v3 }
 0xfc6   : > { %v5005_v9 = vsel %vm1211_vm3, %v4979_v1, 0  ;;  %v7784_v46 = vand.u32 4294901760, %v4996_v12  ;;  %vm7787_vm11 = vcmp.eq.f32.partialorder %v4899_v54, 8.507059e+37  ;;  %v4916_v62 = vand.u32 2147483648, %v7747_v3 }
 0xfc7   : > { %v4939_v39 = vadd.f32 %v6388_v45, %v4938_v49  ;;  %v7761_v18 = vand.u32 4294901760, %v5005_v9  ;;  %v4902_v58 = vor.u32 1.1754944e-38, %v4901_v52  ;;  %v5057_v36 = vsub.f32 %v7764_v34, %v5056_v26 }
 0xfc8   : > { %v6390_v0 = vpop.eup %6389  ;;  %v7803_v53 = vsub.f32 %v4996_v12, %v7784_v46  ;;  %vm7805_vm10 = vcmp.eq.f32.partialorder %v4914_v14, 8.507059e+37  ;;  %v4917_v23 = vor.u32 1.1754944e-38, %v4916_v62  ;;  %v7832_v38 = vand.u32 4294901760, %v7758_v15 }
 0xfc9   : > { %v4943_v51 = vsel %vm4942_vm5, %v6388_v45, %v4939_v39  ;;  %v4891_v13 = vmul.f32 %v6390_v0, %v7745_v20  ;;  %v7768_v17 = vpop.xlane.xlu2 %4840  ;;  %v6392_v43 = vpop.eup %6391  ;;  %5016 = vmatpush.xpose.msrb.mxu2 %v7761_v18  ;;  %v7774_v28 = vsub.f32 %v5005_v9, %v7761_v18  ;;  %5224 = vmatpush.xpose.msra.mxu1 %v7761_v18  ;;  %vm4896_vm8 = vweird.f32 %v6390_v0 }
 0xfca   : > { %v4948_v48 = vsel %vm4945_vm6, %v4947_v19, %v4943_v51  ;;  %6393 = vrcp.f32 %v7768_v17  ;;  %v4906_v60 = vmul.f32 %v6392_v43, %v7747_v3  ;;  %vm4911_vm2 = vweird.f32 %v6392_v43  ;;  %vm4897_vm15 = vmor %vm4895_vm7, %vm4896_vm8 }
 0xfcb   : > { %v4892_v32 = vsub.f32 1.0, %v4891_v13  ;;  %v5050_v6 = vand.u32 4294901760, %v7774_v28  ;;  %v4949_v59 = vmul.f32 %v7709_v8, %v4948_v48  ;;  %vm4912_vm4 = vmor %vm4910_vm9, %vm4911_vm2  ;;  %v4884_v20 = vand.u32 2147483647, %v7768_v17 }
 0xfcc   : > { %v4907_v42 = vsub.f32 1.0, %v4906_v60  ;;  %v4886_v25 = vand.u32 2147483648, %v7768_v17  ;;  %v5058_v2 = vand.u32 4294901760, %v5057_v36  ;;  %v5068_v5 = vand.u32 4294901760, %v7803_v53 }
 0xfcd   : > { %v4893_v37 = vmul.f32 %v6390_v0, %v4892_v32  ;;  %5018 = vmatpush.xpose.msrb.mxu2 %v7753_v41  ;;  %5181 = vmatpush.xpose.msra.mxu0 %v5050_v6  ;;  %v4999_v8 = vsel %vm1211_vm3, %v4949_v59, 0  ;;  %v5051_v30 = vsub.f32 %v7774_v28, %v5050_v6  ;;  %vm4880_vm6 = vweird.f32 %v7768_v17 }
 0xfce   : > { %v4908_v50 = vmul.f32 %v6392_v43, %v4907_v42  ;;  %5226 = vmatpush.xpose.msra.mxu1 %v7753_v41  ;;  %v7796_v61 = vand.u32 4294901760, %v4999_v8  ;;  %v4887_v51 = vor.u32 1.1754944e-38, %v4886_v25  ;;  %vm4885_vm9 = vcmp.eq.f32.partialorder %v4884_v20, 8.507059e+37 }
 0xfcf   : > { %v4894_v31 = vadd.f32 %v6390_v0, %v4893_v37  ;;  %v5052_v7 = vand.u32 4294901760, %v5051_v30  ;;  %v7856_v60 = vsub.f32 %v7758_v15, %v7832_v38 }
 0xfd0   : > { %v6394_v56 = vpop.eup %6393  ;;  %v4909_v55 = vadd.f32 %v6392_v43, %v4908_v50  ;;  %v7823_v27 = vsub.f32 %v4999_v8, %v7796_v61 }
 0xfd1   : > { %v4898_v45 = vsel %vm4897_vm15, %v6390_v0, %v4894_v31  ;;  %v4876_v40 = vmul.f32 %v6394_v56, %v7768_v17  ;;  %v7810_v22 = vpop.xlane.xlu1 %4837  ;;  %5020 = vmatpush.xpose.msrb.mxu2 %v7796_v61  ;;  %5053 = vmatpush.xpose.msrb.mxu3 %v5052_v7  ;;  %vm4881_vm5 = vweird.f32 %v6394_v56  ;;  %v5069_v17 = vsub.f32 %v7803_v53, %v5068_v5 }
 0xfd2   : > { %v4903_v44 = vsel %vm7787_vm11, %v4902_v58, %v4898_v45  ;;  %6395 = vrcp.f32 %v7810_v22  ;;  %v4913_v10 = vsel %vm4912_vm4, %v6392_v43, %v4909_v55  ;;  %5185 = vmatpush.xpose.msra.mxu0 %v5056_v26  ;;  %5228 = vmatpush.xpose.msra.mxu1 %v7796_v61  ;;  %v5062_v49 = vand.u32 4294901760, %v7823_v27  ;;  %vm4882_vm7 = vmor %vm4880_vm6, %vm4881_vm5 }
 0xfd3   : > { %v4877_v21 = vsub.f32 1.0, %v4876_v40  ;;  %v4918_v3 = vsel %vm7805_vm10, %v4917_v23, %v4913_v10  ;;  %v4904_v24 = vmul.f32 %v7715_v35, %v4903_v44  ;;  %v4869_v26 = vand.u32 2147483647, %v7810_v22 }
 0xfd4   : > { %v4919_v1 = vmul.f32 %v7713_v4, %v4918_v3  ;;  %v5063_v0 = vsub.f32 %v7823_v27, %v5062_v49  ;;  %v4871_v37 = vand.u32 2147483648, %v7810_v22  ;;  %v5070_v42 = vand.u32 4294901760, %v5069_v17 }
 0xfd5   : > { %v4878_v11 = vmul.f32 %v6394_v56, %v4877_v21  ;;  %5022 = vmatpush.xpose.msrb.mxu2 %v7784_v46  ;;  %5059 = vmatpush.xpose.msrb.mxu3 %v5058_v2  ;;  %v4990_v39 = vsel %vm1211_vm3, %v4904_v24, 0  ;;  %vm4865_vm11 = vweird.f32 %v7810_v22  ;;  %vm4870_vm15 = vcmp.eq.f32.partialorder %v4869_v26, 8.507059e+37 }
 0xfd6   : > { %5189 = vmatpush.xpose.msra.mxu0 %v5062_v49  ;;  %5230 = vmatpush.xpose.msra.mxu1 %v7784_v46  ;;  %v4993_v35 = vsel %vm1211_vm3, %v4919_v1, 0  ;;  %v7840_v19 = vand.u32 4294901760, %v4990_v39  ;;  %v5064_v48 = vand.u32 4294901760, %v5063_v0  ;;  %v4872_v31 = vor.u32 1.1754944e-38, %v4871_v37 }
 0xfd7   : > { %v4879_v9 = vadd.f32 %v6394_v56, %v4878_v11  ;;  %v7843_v13 = vand.u32 4294901760, %v4993_v35  ;;  %v5033_v36 = vand.u32 4294901760, %v7856_v60 }
 0xfd8   : > { %v6396_v4 = vpop.eup %6395  ;;  %v7852_v52 = vsub.f32 %v4990_v39, %v7840_v19 }
 0xfd9   : > { %v4883_v12 = vsel %vm4882_vm7, %v6394_v56, %v4879_v9  ;;  %v4861_v43 = vmul.f32 %v6396_v4, %v7810_v22  ;;  %5024 = vmatpush.xpose.msrb.mxu2 %v7843_v13  ;;  %v7849_v32 = vsub.f32 %v4993_v35, %v7843_v13  ;;  %5065 = vmatpush.xpose.msrb.mxu3 %v5064_v48  ;;  %vm4866_vm8 = vweird.f32 %v6396_v4 }
 0xfda   : > { %v4888_v54 = vsel %vm4885_vm9, %v4887_v51, %v4883_v12  ;;  %5193 = vmatpush.xpose.msra.mxu0 %v5068_v5  ;;  %5232 = vmatpush.xpose.msra.mxu1 %v7843_v13  ;;  %v5080_v15 = vand.u32 4294901760, %v7852_v52  ;;  %vm4867_vm2 = vmor %vm4865_vm11, %vm4866_vm8  ;;  %v5034_v23 = vsub.f32 %v7856_v60, %v5033_v36 }
 0xfdb   : > { %v4862_v6 = vsub.f32 1.0, %v4861_v43  ;;  %v4889_v59 = vmul.f32 %v7721_v57, %v4888_v54  ;;  %v5074_v14 = vand.u32 4294901760, %v7849_v32  ;;  %v5255_v54 = vpop.permute.xlu2 %5254 }
 0xfdc   : > { %v5081_v7 = vsub.f32 %v7852_v52, %v5080_v15  ;;  %v5035_v25 = vand.u32 4294901760, %v5034_v23 }
 0xfdd   : > { %v4863_v47 = vmul.f32 %v6396_v4, %v4862_v6  ;;  %v4987_v62 = vsel %vm1211_vm3, %v4889_v59, 0  ;;  %5026 = vmatpush.xpose.msrb.mxu2 %v7840_v19  ;;  %v5075_v57 = vsub.f32 %v7849_v32, %v5074_v14  ;;  %5071 = vmatpush.xpose.msrb.mxu3 %v5070_v42 }
 0xfde   : > { %v5027_v8 = vand.u32 4294901760, %v4987_v62  ;;  %5197 = vmatpush.xpose.msra.mxu0 %v5074_v14  ;;  %5234 = vmatpush.xpose.msra.mxu1 %v7840_v19  ;;  %v5082_v22 = vand.u32 4294901760, %v5081_v7 }
 0xfdf   : > { %v4864_v30 = vadd.f32 %v6396_v4, %v4863_v47  ;;  %v5076_v50 = vand.u32 4294901760, %v5075_v57 }
 0xfe0   : > { %v5085_v56 = vsub.f32 %v4987_v62, %v5027_v8 }
 0xfe1   : > { %v4868_v58 = vsel %vm4867_vm2, %v6396_v4, %v4864_v30  ;;  %5028 = vmatpush.xpose.msrb.mxu2 %v5027_v8  ;;  %5077 = vmatpush.xpose.msrb.mxu3 %v5076_v50 }
 0xfe2   : > { %v4873_v45 = vsel %vm4870_vm15, %v4872_v31, %v4868_v58  ;;  %v5086_v55 = vand.u32 4294901760, %v5085_v56  ;;  %5201 = vmatpush.xpose.msra.mxu0 %v5080_v15  ;;  %5236 = vmatpush.xpose.msra.mxu1 %v5027_v8  ;;  %v8043_v58 = vld [vmem:[#allocation2_spill] sm:$0xff] }
 0xfe3   : > { %v4874_v63 = vmul.f32 %v7725_v29, %v4873_v45 }
 0xfe4   : > { %v5087_v40 = vsub.f32 %v5085_v56, %v5086_v55 }
 0xfe5   : > { %v4984_v44 = vsel %vm1211_vm3, %v4874_v63, 0  ;;  %5083 = vmatpush.xpose.msrb.mxu3 %v5082_v22 }
 0xfe6   : > { %v5029_v20 = vand.u32 4294901760, %v4984_v44  ;;  %5205 = vmatpush.xpose.msra.mxu0 %v5086_v55  ;;  %v5088_v10 = vand.u32 4294901760, %v5087_v40 }
 0xfe8   : > { %5030 = vmatpush.xpose.msrb.mxu2 %v5029_v20  ;;  %5238 = vmatpush.xpose.msra.mxu1 %v5029_v20  ;;  %v5091_v21 = vsub.f32 %v4984_v44, %v5029_v20 }
 0xfe9   : > { %5089 = vmatpush.xpose.msrb.mxu3 %v5088_v10 }
 0xfea   : > { %v5092_v3 = vand.u32 4294901760, %v5091_v21 }
 0xfeb   : > { %5036 = vmatmul.f32.vlgmr.msrb.gmra.mxu2 %v5035_v25  ;;  %5240 = vmatmul.f32.vlgmr.msra.gmra.mxu1 %v7832_v38 }
 0xfec   : > { %5111 = vmatpush.xpose.msra.mxu2 %v7774_v28  ;;  %5209 = vmatpush.xpose.msra.mxu0 %v5092_v3  ;;  %v5093_v29 = vsub.f32 %v5091_v21, %v5092_v3 }
 0xfee   : > { %v5094_v2 = vand.u32 4294901760, %v5093_v29 }
 0xfef   : > { %5211 = vmatmul.f32.vlgmr.msra.gmra.mxu0 %v7832_v38 }
 0xff0   : > { %5114 = vmatpush.xpose.msra.mxu2 %v7764_v34  ;;  %5095 = vmatpush.xpose.msrb.mxu3 %v5094_v2 }
 0xff3   : > { %5097 = vmatmul.f32.vlgmr.msrb.gmra.mxu3 %v7832_v38 }
 0xff4   : > { %5117 = vmatpush.xpose.msra.mxu2 %v7823_v27  ;;  %5148 = vmatpush.xpose.msra.mxu3 %v7761_v18 }
 0xff8   : > { %5120 = vmatpush.xpose.msra.mxu2 %v7803_v53  ;;  %5150 = vmatpush.xpose.msra.mxu3 %v7753_v41  ;;  %v6227_v41 = vld [vmem:[%s7981_s4 + $0x8] sm:$0xff] }
 0xff9   : > { %v5258_v34 = vsel %vm550_vm0, %v6227_v41, 0 }
 0xffc   : > { %5123 = vmatpush.xpose.msra.mxu2 %v7849_v32  ;;  %5152 = vmatpush.xpose.msra.mxu3 %v7796_v61 }
0x1000   : > { %5126 = vmatpush.xpose.msra.mxu2 %v7852_v52  ;;  %5154 = vmatpush.xpose.msra.mxu3 %v7784_v46  ;;  %v5277_v46 = vand.u32 4294901760, %v5258_v34 }
0x1002   : > { %v5278_v27 = vsub.f32 %v5258_v34, %v5277_v46 }
0x1004   : > { %5129 = vmatpush.xpose.msra.mxu2 %v5085_v56  ;;  %5156 = vmatpush.xpose.msra.mxu3 %v7843_v13  ;;  %v5279_v49 = vand.u32 4294901760, %v5278_v27 }
0x1006   : > { %v5280_v35 = vsub.f32 %v5278_v27, %v5279_v49 }
0x1008   : > { %5132 = vmatpush.xpose.msra.mxu2 %v5091_v21  ;;  %5158 = vmatpush.xpose.msra.mxu3 %v7840_v19  ;;  %v5281_v4 = vand.u32 4294901760, %v5280_v35 }
0x100b   : > { %5135 = vmatmul.f32.vlgmr.msra.gmra.mxu2 %v7856_v60 }
0x100c   : > { %5160 = vmatpush.xpose.msra.mxu3 %v5027_v8 }
0x1010   : > { %5162 = vmatpush.xpose.msra.mxu3 %v5029_v20 }
0x1013   : > { %5166 = vmatmul.f32.vlgmr.msra.gmra.mxu3 %v5033_v36 }
0x1068   : > { %v5241_v39 = vpop.f32.mrf.mxu1 }
0x106c   : > { %v5212_v1 = vpop.f32.mrf.mxu0 }
0x106e   : > { %v5037_v18 = vpop.f32.mrf.mxu2 }
0x1076   : > { %v5098_v28 = vpop.f32.mrf.mxu3 }
0x1077   : > { %v5099_v53 = vadd.f32 %v5098_v28, %v5037_v18  ;;  %v5444_v28 = vpop.permute.xlu1 %5443 }
0x108e   : > { %v5136_v61 = vpop.f32.mrf.mxu2 }
0x108f   : > { %v5137_v5 = vadd.f32 %v5136_v61, %v5099_v53  ;;  %v5450_v61 = vpop.permute.xlu2 %5449 }
0x1096   : > { %v5167_v24 = vpop.f32.mrf.mxu3 }
0x1097   : > { %v5168_v11 = vadd.f32 %v5167_v24, %v5137_v5  ;;  %v6232_v24 = vld [vmem:[%s7986_s9 + $0x8] sm:$0xff] }
0x1099   : > { %v5213_v38 = vadd.f32 %v5212_v1, %v5168_v11  ;;  %v6231_v11 = vld [vmem:[%s7985_s8 + $0x8] sm:$0xff] }
0x109b   : > { %v5242_v9 = vadd.f32 %v5241_v39, %v5213_v38 }
0x109d   : > { %v5245_v0 = vrot.slane %v5242_v9, 4 }
0x109f   : > { %v5247_v19 = vsel %vm825_vm1, %v7657_v33, %v5245_v0 }
0x10a0   : > { %v5275_v51 = vand.u32 4294901760, %v5247_v19 }
0x10a2   : > { %5276 = vmatpush.msrb.mxu2 %v5275_v51  ;;  %v5302_v13 = vsub.f32 %v5247_v19, %v5275_v51 }
0x10a3   : > { %5282 = vmatmul.f32.vlgmr.msrb.gmra.mxu2 %v5281_v4 }
0x10a4   : > { %5329 = vmatpush.msra.mxu2 %v5302_v13  ;;  %v5303_v17 = vand.u32 4294901760, %v5302_v13 }
0x10a6   : > { %5378 = vmatpush.msrb.mxu2 %v5303_v17  ;;  %v5304_v12 = vsub.f32 %v5302_v13, %v5303_v17 }
0x10a8   : > { %v5305_v43 = vand.u32 4294901760, %v5304_v12 }
0x10aa   : > { %5306 = vmatpush.msrb.mxu3 %v5305_v43 }
0x10ab   : > { %5308 = vmatmul.f32.vlgmr.msrb.gmra.mxu3 %v5277_v46  ;;  %5332 = vmatmul.f32.vlgmr.msra.gmra.mxu2 %v5278_v27  ;;  %v7904_v27 = vld [vmem:[%s6529_s16] ss:$0 sm:$0xff] }
0x10ac   : > { %5352 = vmatpush.msra.mxu3 %v5275_v51 }
0x10ae   : > { %5400 = vmatpush.msrb.mxu3 %v5275_v51 }
0x10b3   : > { %5356 = vmatmul.f32.vlgmr.msra.gmra.mxu3 %v5279_v49  ;;  %5380 = vmatmul.f32.vlgmr.msrb.gmra.mxu2 %v5277_v46  ;;  %v5473_v49 = vsel %vm2796_vm12, %v6231_v11, 0 }
0x10b4   : > { %v5494_v1 = vand.u32 4294901760, %v5473_v49 }
0x10b6   : > { %v5495_v39 = vsub.f32 %v5473_v49, %v5494_v1 }
0x10b8   : > { %v5496_v0 = vand.u32 4294901760, %v5495_v39 }
0x10ba   : > { %v5497_v17 = vsub.f32 %v5495_v39, %v5496_v0 }
0x10bb   : > { %5402 = vmatmul.f32.vlgmr.msrb.gmra.mxu3 %v5277_v46 }
0x1126   : > { %v5283_v48 = vpop.f32.mrf.mxu2 }
0x1127   : > { %v5284_v52 = vadd.f32 %v5283_v48, %v5255_v54  ;;  %v5498_v54 = vand.u32 4294901760, %v5497_v17 }
0x112e   : > { %v5309_v33 = vpop.f32.mrf.mxu3  ;;  %v5333_v32 = vpop.f32.mrf.mxu2 }
0x112f   : > { %v5310_v60 = vadd.f32 %v5309_v33, %v5284_v52 }
0x1131   : > { %v5334_v59 = vadd.f32 %v5333_v32, %v5310_v60 }
0x1136   : > { %v5357_v6 = vpop.f32.mrf.mxu3  ;;  %v5381_v37 = vpop.f32.mrf.mxu2 }
0x1137   : > { %v5358_v26 = vadd.f32 %v5357_v6, %v5334_v59 }
0x1139   : > { %v5382_v42 = vadd.f32 %v5381_v37, %v5358_v26 }
0x113e   : > { %v5403_v14 = vpop.f32.mrf.mxu3 }
0x113f   : > { %v5404_v47 = vadd.f32 %v5403_v14, %v5382_v42 }
0x1141   : > { %v5406_v62 = vadd.f32 %v5404_v47, %v7236_v16 }
0x1143   : > { %v5411_v15 = vsel %vm1211_vm3, %v5406_v62, 0.0 }
0x1144   : > { %v5412_v8 = vrot.slane %v5411_v15, 4 }
0x1146   : > { %v5413_v57 = vadd.f32 %v5412_v8, %v5411_v15 }
0x1148   : > { %v5414_v30 = vrot.slane %v5413_v57, 2 }
0x114a   : > { %v5415_v31 = vadd.f32 %v5414_v30, %v5413_v57 }
0x114c   : > { %v5416_v50 = vrot.slane %v5415_v31, 1 }
0x114e   : > { %v5417_v56 = vadd.f32 %v5416_v50, %v5415_v31 }
0x1150   : > { %v5418_v7 = vmul.f32 %v5417_v56, %v8043_v58 }
0x1152   : > { %v5419_v36 = vsub.f32 %v5406_v62, %v5418_v7 }
0x1154   : > { %v5420_v45 = vmul.f32 %v5419_v36, %v5419_v36 }
0x1156   : > { %v5421_v55 = vsel %vm1211_vm3, %v5420_v45, 0.0 }
0x1157   : > { %v5422_v63 = vrot.slane %v5421_v55, 4 }
0x1159   : > { %v5423_v40 = vadd.f32 %v5422_v63, %v5421_v55 }
0x115b   : > { %v5424_v22 = vrot.slane %v5423_v40, 2 }
0x115d   : > { %v5425_v44 = vadd.f32 %v5424_v22, %v5423_v40  ;;  %v6235_v40 = vld [vmem:[%s7983_s6 + $0x18] sm:$0xff]  ;;  %v6234_v22 = vld [vmem:[%s7988_s11 + $0x8] sm:$0xff] }
0x115f   : > { %v5426_v23 = vrot.slane %v5425_v44, 1 }
0x1161   : > { %v5427_v16 = vadd.f32 %v5426_v23, %v5425_v44  ;;  %v5895_v44 = vld [vmem:[%s7990_s13 + $0x8] sm:$0xff]  ;;  %v6236_v23 = vld [vmem:[%s7984_s7 + $0x18] sm:$0xff] }
0x1163   : > { %v5428_v20 = vmul.f32 %v5427_v16, %v8043_v58  ;;  %v5894_v16 = vld [vmem:[%s7990_s13] sm:$0xff] }
0x1165   : > { %v5429_v10 = vadd.f32 1e-05, %v5428_v20 }
0x1167   : > { %6397 = vrsqrt.f32 %v5429_v10  ;;  %vm5436_vm10 = vweird.f32 %v5429_v10 }
0x116d   : > { %v6398_v21 = vpop.eup %6397 }
0x116e   : > { %v5431_v25 = vmul.f32 %v6398_v21, %v5429_v10  ;;  %vm5437_vm1 = vweird.f32 %v6398_v21 }
0x116f   : > { %vm5438_vm4 = vmor %vm5436_vm10, %vm5437_vm1 }
0x1170   : > { %v5432_v3 = vmul.f32 %v6398_v21, %v5431_v25 }
0x1172   : > { %v5433_v29 = vmul.f32 0.5, %v5432_v3 }
0x1174   : > { %v5434_v2 = vsub.f32 1.5, %v5433_v29  ;;  %v6233_v29 = vld [vmem:[%s7987_s10 + $0x8] sm:$0xff] }
0x1176   : > { %v5435_v41 = vmul.f32 %v6398_v21, %v5434_v2 }
0x1178   : > { %v5439_v18 = vsel %vm5438_vm4, %v6398_v21, %v5435_v41 }
0x1179   : > { %v5440_v34 = vmul.f32 %v5439_v18, %v5419_v36 }
0x117b   : > { %v5446_v46 = vmul.f32 %v5444_v28, %v5440_v34  ;;  %v5668_v34 = vsel %vm2796_vm12, %v6233_v29, 0 }
0x117d   : > { %v7901_v53 = vadd.f32 %v5450_v61, %v5446_v46  ;;  %v5689_v61 = vand.u32 4294901760, %v5668_v34 }
0x117f   : > { %v5453_v5 = vmul.f32 %v7904_v27, %v7901_v53  ;;  %v5690_v11 = vsub.f32 %v5668_v34, %v5689_v61 }
0x1181   : > { %5457 = vrot.lane.b32.xlu2 %v5453_v5, %s6416_s24  ;;  %5461 = vrot.lane.b32.xlu1 %v5453_v5, %s8044_s29  ;;  %v5490_v35 = vand.u32 4294901760, %v5453_v5  ;;  %v5691_v49 = vand.u32 4294901760, %v5690_v11 }
0x1183   : > { %v5523_v51 = vsub.f32 %v5453_v5, %v5490_v35 }
0x1185   : > { %v5524_v33 = vand.u32 4294901760, %v5523_v51 }
0x1187   : > { %v5525_v6 = vsub.f32 %v5523_v51, %v5524_v33 }
0x1189   : > { %5469 = vperm.xlu1 %6260, %v6232_v24   ;;  %v5526_v37 = vand.u32 4294901760, %v5525_v6 }
0x11db   : > { %v5458_v38 = vpop.permute.xlu2 %5457 }
0x11dc   : > { %v5460_v9 = vsel %vm2783_vm13, 0.0, %v5458_v38 }
0x11dd   : > { %v5492_v19 = vand.u32 4294901760, %v5460_v9 }
0x11df   : > { %v5529_v12 = vsub.f32 %v5460_v9, %v5492_v19 }
0x11e1   : > { %v5530_v52 = vand.u32 4294901760, %v5529_v12 }
0x11e3   : > { %v5531_v26 = vsub.f32 %v5529_v12, %v5530_v52 }
0x11e5   : > { %v5532_v42 = vand.u32 4294901760, %v5531_v26 }
0x11f3   : > { %v5462_v4 = vpop.permute.xlu1 %5461 }
0x11f4   : > { %v5464_v13 = vsel %vm2788_vm14, %v5462_v4, 0.0 }
0x11f5   : > { %v5488_v43 = vand.u32 4294901760, %v5464_v13 }
0x11f7   : > { %v5517_v48 = vsub.f32 %v5464_v13, %v5488_v43  ;;  %5489 = vmatpush.msrb.mxu0 %v5488_v43  ;;  %5581 = vmatpush.msra.mxu3 %v5488_v43 }
0x11f9   : > { %v5518_v32 = vand.u32 4294901760, %v5517_v48  ;;  %5491 = vmatpush.msrb.mxu0 %v5490_v35  ;;  %5554 = vmatpush.msra.mxu2 %v5517_v48 }
0x11fa   : > { %5583 = vmatpush.msra.mxu3 %v5490_v35 }
0x11fb   : > { %v5519_v60 = vsub.f32 %v5517_v48, %v5518_v32  ;;  %5493 = vmatpush.msrb.mxu0 %v5492_v19  ;;  %5557 = vmatpush.msra.mxu2 %v5523_v51  ;;  %v5470_v47 = vpop.permute.xlu1 %5469 }
0x11fc   : > { %5585 = vmatpush.msra.mxu3 %v5492_v19  ;;  %5499 = vmatmul.f32.vlgmr.msrb.gmra.mxu0 %v5498_v54 }
0x11fd   : > { %v5520_v59 = vand.u32 4294901760, %v5519_v60  ;;  %5609 = vmatpush.msra.mxu0 %v5518_v32  ;;  %5560 = vmatpush.msra.mxu2 %v5529_v12 }
0x11fe   : > { %5563 = vmatmul.f32.vlgmr.msra.gmra.mxu2 %v5495_v39  ;;  %5589 = vmatmul.f32.vlgmr.msra.gmra.mxu3 %v5496_v0 }
0x11ff   : > { %5613 = vmatpush.msra.mxu0 %v5524_v33  ;;  %5521 = vmatpush.msrb.mxu1 %v5520_v59 }
0x1201   : > { %5617 = vmatpush.msra.mxu0 %v5530_v52  ;;  %5527 = vmatpush.msrb.mxu1 %v5526_v37 }
0x1203   : > { %5533 = vmatpush.msrb.mxu1 %v5532_v42 }
0x1204   : > { %5535 = vmatmul.f32.vlgmr.msrb.gmra.mxu1 %v5494_v1  ;;  %5619 = vmatmul.f32.vlgmr.msra.gmra.mxu0 %v5494_v1 }
0x1205   : > { %5637 = vmatpush.msra.mxu1 %v5488_v43 }
0x1207   : > { %5639 = vmatpush.msra.mxu1 %v5490_v35 }
0x1209   : > { %5641 = vmatpush.msra.mxu1 %v5492_v19 }
0x120c   : > { %5643 = vmatmul.f32.vlgmr.msra.gmra.mxu1 %v5494_v1  ;;  %v5692_v1 = vsub.f32 %v5690_v11, %v5691_v49 }
0x120e   : > { %v5693_v9 = vand.u32 4294901760, %v5692_v1 }
0x1279   : > { %v5500_v14 = vpop.f32.mrf.mxu0 }
0x127a   : > { %v5501_v62 = vadd.f32 %v5500_v14, %v5470_v47 }
0x1281   : > { %v5536_v15 = vpop.f32.mrf.mxu1  ;;  %v5564_v8 = vpop.f32.mrf.mxu2 }
0x1282   : > { %v5537_v57 = vadd.f32 %v5536_v15, %v5501_v62  ;;  %v5590_v30 = vpop.f32.mrf.mxu3  ;;  %v5620_v50 = vpop.f32.mrf.mxu0 }
0x1284   : > { %v5565_v31 = vadd.f32 %v5564_v8, %v5537_v57 }
0x1286   : > { %v5591_v56 = vadd.f32 %v5590_v30, %v5565_v31 }
0x1288   : > { %v5621_v7 = vadd.f32 %v5620_v50, %v5591_v56 }
0x1289   : > { %v5644_v36 = vpop.f32.mrf.mxu1 }
0x128a   : > { %v5645_v45 = vadd.f32 %v5644_v36, %v5621_v7 }
0x128c   : > { %v5647_v55 = vmax.f32 %v5645_v45, 0.0 }
0x128e   : > { %v5648_v63 = vmul.f32 %v7904_v27, %v5647_v55 }
0x1290   : > { %5652 = vrot.lane.b32.xlu1 %v5648_v63, %s6416_s24  ;;  %5656 = vrot.lane.b32.xlu2 %v5648_v63, %s8044_s29  ;;  %v5685_v20 = vand.u32 4294901760, %v5648_v63  ;;  %s519_s29 = scalar_lea.vmem %s7992_s15, %s8047_s19 }
0x1292   : > { %v5718_v21 = vsub.f32 %v5648_v63, %v5685_v20 }
0x1294   : > { %v5719_v41 = vand.u32 4294901760, %v5718_v21 }
0x1296   : > { %v5720_v46 = vsub.f32 %v5718_v21, %v5719_v41 }
0x1298   : > { %5880 = vperm.xlu1 %6260, %v6235_v40   ;;  %5664 = vperm.xlu2 %6261, %v6234_v22   ;;  %v5721_v24 = vand.u32 4294901760, %v5720_v46 }
0x12a0   : > { %5903 = vperm.xlu1 %6260, %v5895_v44   ;;  %5886 = vperm.xlu2 %6261, %v6236_v23   ;;  %v5891_v23 = vld [vmem:[%s7989_s12] sm:$0xff] }
0x12a8   : > { %5898 = vperm.xlu1 %6260, %v5894_v16  }
0x12ea   : > { %v5657_v10 = vpop.permute.xlu2 %5656 }
0x12eb   : > { %v5659_v25 = vsel %vm2788_vm14, %v5657_v10, 0.0  ;;  %v5907_v10 = vsel %vm550_vm0, %v5891_v23, 0 }
0x12ec   : > { %v5683_v3 = vand.u32 4294901760, %v5659_v25 }
0x12ee   : > { %v5712_v2 = vsub.f32 %v5659_v25, %v5683_v3  ;;  %5684 = vmatpush.msrb.mxu2 %v5683_v3  ;;  %5776 = vmatpush.msrb.mxu1 %v5683_v3 }
0x12f0   : > { %v5713_v18 = vand.u32 4294901760, %v5712_v2  ;;  %5686 = vmatpush.msrb.mxu2 %v5685_v20  ;;  %5749 = vmatpush.msrb.mxu0 %v5712_v2 }
0x12f1   : > { %5778 = vmatpush.msrb.mxu1 %v5685_v20 }
0x12f2   : > { %v5714_v28 = vsub.f32 %v5712_v2, %v5713_v18  ;;  %5752 = vmatpush.msrb.mxu0 %v5718_v21  ;;  %v5665_v17 = vpop.permute.xlu2 %5664  ;;  %v5892_v2 = vld [vmem:[%s7989_s12 + $0x8] sm:$0xff] }
0x12f4   : > { %v5715_v5 = vand.u32 4294901760, %v5714_v28 }
0x12f6   : > { %5716 = vmatpush.msrb.mxu3 %v5715_v5 }
0x12f8   : > { %5722 = vmatpush.msrb.mxu3 %v5721_v24 }
0x1302   : > { %v5653_v38 = vpop.permute.xlu1 %5652 }
0x1303   : > { %v5655_v39 = vsel %vm2783_vm13, 0.0, %v5653_v38 }
0x1304   : > { %v5687_v35 = vand.u32 4294901760, %v5655_v39 }
0x1306   : > { %v5724_v0 = vsub.f32 %v5655_v39, %v5687_v35  ;;  %5688 = vmatpush.msrb.mxu2 %v5687_v35  ;;  %5780 = vmatpush.msrb.mxu1 %v5687_v35 }
0x1307   : > { %5694 = vmatmul.f32.vlgmr.msrb.gmra.mxu2 %v5693_v9  ;;  %5784 = vmatmul.f32.vlgmr.msrb.gmra.mxu1 %v5691_v49  ;;  %v6405_v9 = vld [vmem:[%s6536_s21] sm:$0xff] }
0x1308   : > { %5804 = vmatpush.msra.mxu2 %v5713_v18  ;;  %5755 = vmatpush.msrb.mxu0 %v5724_v0  ;;  %v5725_v19 = vand.u32 4294901760, %v5724_v0  ;;  %v5910_v18 = vsel %vm550_vm0, %v5892_v2, 0  ;;  %vm6108_vm0 = vcmask 0  }
0x1309   : > { %5758 = vmatmul.f32.vlgmr.msrb.gmra.mxu0 %v5690_v11  ;;  %v5937_v5 = vand.u32 4294901760, %v5910_v18  ;;  %v5887_v11 = vpop.permute.xlu2 %5886 }
0x130a   : > { %5808 = vmatpush.msra.mxu2 %v5719_v41  ;;  %v5726_v4 = vsub.f32 %v5724_v0, %v5725_v19  ;;  %v5881_v46 = vpop.permute.xlu1 %5880 }
0x130b   : > { %v5938_v38 = vsub.f32 %v5910_v18, %v5937_v5 }
0x130c   : > { %5812 = vmatpush.msra.mxu2 %v5725_v19  ;;  %v5727_v51 = vand.u32 4294901760, %v5726_v4 }
0x130d   : > { %v5939_v19 = vand.u32 4294901760, %v5938_v38 }
0x130e   : > { %5728 = vmatpush.msrb.mxu3 %v5727_v51 }
0x130f   : > { %5730 = vmatmul.f32.vlgmr.msrb.gmra.mxu3 %v5689_v61  ;;  %5814 = vmatmul.f32.vlgmr.msra.gmra.mxu2 %v5689_v61 }
0x1310   : > { %5832 = vmatpush.msra.mxu3 %v5683_v3  ;;  %v5929_v3 = vand.u32 4294901760, %v5907_v10 }
0x1312   : > { %5834 = vmatpush.msra.mxu3 %v5685_v20  ;;  %v5930_v41 = vsub.f32 %v5907_v10, %v5929_v3 }
0x1314   : > { %5836 = vmatpush.msra.mxu3 %v5687_v35 }
0x1317   : > { %5838 = vmatmul.f32.vlgmr.msra.gmra.mxu3 %v5689_v61  ;;  %v5931_v61 = vand.u32 4294901760, %v5930_v41 }
0x1319   : > { %v5932_v1 = vsub.f32 %v5930_v41, %v5931_v61 }
0x131b   : > { %v5933_v0 = vand.u32 4294901760, %v5932_v1 }
0x1384   : > { %v5785_v54 = vpop.f32.mrf.mxu1 }
0x1386   : > { %v5759_v48 = vpop.f32.mrf.mxu0 }
0x138a   : > { %v5695_v13 = vpop.f32.mrf.mxu2 }
0x138b   : > { %v5696_v12 = vadd.f32 %v5695_v13, %v5665_v17  ;;  %v5940_v13 = vsub.f32 %v5938_v38, %v5939_v19 }
0x1392   : > { %v5731_v43 = vpop.f32.mrf.mxu3  ;;  %v5815_v52 = vpop.f32.mrf.mxu2 }
0x1393   : > { %v5732_v33 = vadd.f32 %v5731_v43, %v5696_v12  ;;  %v5941_v43 = vand.u32 4294901760, %v5940_v13 }
0x1395   : > { %v5760_v32 = vadd.f32 %v5759_v48, %v5732_v33 }
0x1397   : > { %v5786_v60 = vadd.f32 %v5785_v54, %v5760_v32 }
0x1399   : > { %v5816_v6 = vadd.f32 %v5815_v52, %v5786_v60 }
0x139a   : > { %v5839_v59 = vpop.f32.mrf.mxu3 }
0x139b   : > { %v5840_v26 = vadd.f32 %v5839_v59, %v5816_v6  ;;  %v5904_v59 = vpop.permute.xlu1 %5903 }
0x139d   : > { %v5842_v37 = vmul.f32 %v7904_v27, %v5840_v26 }
0x139f   : > { %v5843_v42 = vadd.f32 %v5842_v37, %v7901_v53 }
0x13a1   : > { %v5848_v14 = vsel %vm1211_vm3, %v5843_v42, 0.0 }
0x13a2   : > { %v5849_v47 = vrot.slane %v5848_v14, 4 }
0x13a4   : > { %v5850_v62 = vadd.f32 %v5849_v47, %v5848_v14 }
0x13a6   : > { %v5851_v15 = vrot.slane %v5850_v62, 2 }
0x13a8   : > { %v5852_v8 = vadd.f32 %v5851_v15, %v5850_v62 }
0x13aa   : > { %v5853_v57 = vrot.slane %v5852_v8, 1 }
0x13ac   : > { %v5854_v30 = vadd.f32 %v5853_v57, %v5852_v8  ;;  %v5899_v57 = vpop.permute.xlu1 %5898 }
0x13ae   : > { %v5855_v31 = vmul.f32 %v5854_v30, %v8043_v58 }
0x13b0   : > { %v5856_v50 = vsub.f32 %v5843_v42, %v5855_v31 }
0x13b2   : > { %v5857_v56 = vmul.f32 %v5856_v50, %v5856_v50 }
0x13b4   : > { %v5858_v7 = vsel %vm1211_vm3, %v5857_v56, 0.0 }
0x13b5   : > { %v5859_v36 = vrot.slane %v5858_v7, 4 }
0x13b7   : > { %v5860_v45 = vadd.f32 %v5859_v36, %v5858_v7 }
0x13b9   : > { %v5861_v55 = vrot.slane %v5860_v45, 2 }
0x13bb   : > { %v5862_v63 = vadd.f32 %v5861_v55, %v5860_v45 }
0x13bd   : > { %v5863_v40 = vrot.slane %v5862_v63, 1 }
0x13bf   : > { %v5864_v53 = vadd.f32 %v5863_v40, %v5862_v63 }
0x13c1   : > { %v5865_v22 = vmul.f32 %v5864_v53, %v8043_v58 }
0x13c3   : > { %v5866_v44 = vadd.f32 1e-05, %v5865_v22 }
0x13c5   : > { %6399 = vrsqrt.f32 %v5866_v44  ;;  %vm5873_vm13 = vweird.f32 %v5866_v44 }
0x13cb   : > { %v6400_v16 = vpop.eup %6399 }
0x13cc   : > { %v5868_v20 = vmul.f32 %v6400_v16, %v5866_v44  ;;  %vm5874_vm12 = vweird.f32 %v6400_v16  ;;  %v521_v44 = vld [vmem:[%s6536_s21 + $0x8] sm:$0xff] }
0x13cd   : > { %vm5875_vm14 = vmor %vm5873_vm13, %vm5874_vm12 }
0x13ce   : > { %v5869_v21 = vmul.f32 %v6400_v16, %v5868_v20 }
0x13d0   : > { %v5870_v25 = vmul.f32 0.5, %v5869_v21 }
0x13d2   : > { %v5871_v29 = vsub.f32 1.5, %v5870_v25 }
0x13d4   : > { %v5872_v58 = vmul.f32 %v6400_v16, %v5871_v29 }
0x13d6   : > { %v5876_v34 = vsel %vm5875_vm14, %v6400_v16, %v5872_v58 }
0x13d7   : > { %v5877_v28 = vmul.f32 %v5876_v34, %v5856_v50 }
0x13d9   : > { %v5883_v24 = vmul.f32 %v5881_v46, %v5877_v28 }
0x13db   : > { %v5889_v49 = vadd.f32 %v5887_v11, %v5883_v24 }
0x13dd   : > { %v5890_v39 = vmul.f32 %v7904_v27, %v5889_v49 }
0x13df   : > { %v5893_v35 = vadd.f32 %v6405_v9, %v5890_v39 }
0x13e1   : > { %v5927_v4 = vand.u32 4294901760, %v5893_v35 }
0x13e3   : > { %5928 = vmatpush.msra.mxu0 %v5927_v4  ;;  %6021 = vmatpush.msrb.mxu3 %v5927_v4  ;;  %v5962_v51 = vsub.f32 %v5893_v35, %v5927_v4 }
0x13e4   : > { %5934 = vmatmul.f32.vlgmr.msra.gmra.mxu0 %v5933_v0  ;;  %6025 = vmatmul.f32.vlgmr.msrb.gmra.mxu3 %v5931_v61 }
0x13e5   : > { %5993 = vmatpush.msrb.mxu2 %v5962_v51  ;;  %v5963_v17 = vand.u32 4294901760, %v5962_v51 }
0x13e6   : > { %5996 = vmatmul.f32.vlgmr.msrb.gmra.mxu2 %v5930_v41 }
0x13e7   : > { %6053 = vmatpush.msrb.mxu0 %v5963_v17  ;;  %v5964_v12 = vsub.f32 %v5962_v51, %v5963_v17 }
0x13e9   : > { %v5965_v48 = vand.u32 4294901760, %v5964_v12 }
0x13eb   : > { %5966 = vmatpush.msra.mxu1 %v5965_v48 }
0x13ec   : > { %5942 = vmatmul.f32.gmra.mxu0 %v5941_v43  ;;  %5968 = vmatmul.f32.vlgmr.msra.gmra.mxu1 %v5929_v3 }
0x13ed   : > { %6079 = vmatpush.msrb.mxu1 %v5927_v4  ;;  %6031 = vmatmul.f32.gmra.mxu3 %v5939_v19 }
0x13ee   : > { %6001 = vmatmul.f32.gmra.mxu2 %v5938_v38 }
0x13f4   : > { %5972 = vmatmul.f32.gmra.mxu1 %v5937_v5  ;;  %6055 = vmatmul.f32.vlgmr.msrb.gmra.mxu0 %v5929_v3 }
0x13fc   : > { %6059 = vmatmul.f32.gmra.mxu0 %v5937_v5  ;;  %6081 = vmatmul.f32.vlgmr.msrb.gmra.mxu1 %v5929_v3 }
0x1404   : > { %6085 = vmatmul.f32.gmra.mxu1 %v5937_v5 }
0x1461   : > { %v5935_v33 = vpop.f32.mrf.mxu0 }
0x1462   : > { %v5936_v31 = vadd.f32 %v5935_v33, %v5899_v57 }
0x1467   : > { %v6026_v60 = vpop.f32.mrf.mxu3 }
0x1469   : > { %v5943_v54 = vpop.f32.mrf.mxu0  ;;  %v5969_v32 = vpop.f32.mrf.mxu1 }
0x146a   : > { %v5997_v52 = vpop.f32.mrf.mxu2  ;;  %v5944_v37 = vadd.f32 %v5943_v54, %v5904_v59  ;;  %v5970_v56 = vadd.f32 %v5969_v32, %v5936_v31 }
0x146c   : > { %v5998_v55 = vadd.f32 %v5997_v52, %v5970_v56 }
0x146e   : > { %v6027_v53 = vadd.f32 %v6026_v60, %v5998_v55 }
0x1470   : > { %v6032_v15 = vpop.f32.mrf.mxu3 }
0x1471   : > { %v5973_v6 = vpop.f32.mrf.mxu1  ;;  %v6056_v26 = vpop.f32.mrf.mxu0 }
0x1472   : > { %v5974_v42 = vadd.f32 %v5973_v6, %v5944_v37  ;;  %v6002_v14 = vpop.f32.mrf.mxu2  ;;  %v6057_v22 = vadd.f32 %v6056_v26, %v6027_v53 }
0x1474   : > { %v6003_v62 = vadd.f32 %v6002_v14, %v5974_v42 }
0x1476   : > { %v6033_v30 = vadd.f32 %v6032_v15, %v6003_v62 }
0x1479   : > { %v6082_v47 = vpop.f32.mrf.mxu1  ;;  %v6060_v8 = vpop.f32.mrf.mxu0 }
0x147a   : > { %v6061_v50 = vadd.f32 %v6060_v8, %v6033_v30  ;;  %v6083_v23 = vadd.f32 %v6082_v47, %v6057_v22 }
0x147c   : > { %v6089_v10 = vmul.f32 %v7904_v27, %v6083_v23 }
0x1481   : > { %v6086_v7 = vpop.f32.mrf.mxu1 }
0x1482   : > { %v6087_v36 = vadd.f32 %v6086_v7, %v6061_v50 }
0x1484   : > { %v6090_v45 = vmul.f32 %v7904_v27, %v6087_v36 }
0x1486   : > { %v6097_v63 = vsel %vm1211_vm3, %v6090_v45, 0.0  ;;  %v6091_v40 = vmul.f32 1.442695, %v6090_v45 }
0x1487   : > { %6098 = vadd.xlane.f32.xlu2 %v6097_v63 }
0x1488   : > { %6401 = vpow2.f32 %v6091_v40 }
0x148e   : > { %v6402_v16 = vpop.eup %6401 }
0x148f   : > { %v6093_v20 = vmul.f32 %v6402_v16, %v521_v44 }
0x1491   : > { %v6094_v21 = vmul.f32 %v7904_v27, %v6093_v20 }
0x1493   : > { %v6095_v25 = vadd.f32 %v6094_v21, %v6089_v10 }
0x1495   : > { %6237 = vst.msk [vmem:[%s6161_s17 + $0x8] sm:$0xff] %vm1211_vm3, %v6095_v25 }
0x14fa   : > { %v6099_v3 = vpop.xlane.xlu2 %6098 }
0x14fb   : > { %v6100_v29 = vrot.slane %v6099_v3, 4 }
0x14fd   : > { %v6101_v2 = vadd.f32 %v6100_v29, %v6099_v3 }
0x14ff   : > { %v6102_v58 = vrot.slane %v6101_v2, 2 }
0x1501   : > { %v6103_v41 = vadd.f32 %v6102_v58, %v6101_v2 }
0x1503   : > { %v6104_v18 = vrot.slane %v6103_v41, 1 }
0x1505   : > { %v6105_v34 = vadd.f32 %v6104_v18, %v6103_v41 }
0x1507   : > { %6244 = vpush %v6105_v34 }
0x1538   : > { %s6245_s20 = spop %6244 }
0x1539   : > { %v6107_v27 = vstv %s6245_s20 }
0x153a   : > { %6109 = vst.msk [vmem:[%s519_s29] sm:$0x1] %vm6108_vm0, %v6107_v27 }
0x153b PF: > { %s26_s18 = sadd.s32 1, %s6412_s18  }
0x153c   : > { %p23_p4 = scmp.ge.s32.totalorder %s26_s18, 4  }
0x153e   :  { %25 = sbr.rel (!%p23_p4) target bundleno = 1 (0x1), region = 135 }

</bundles_post_ra>
